<compile_context>
chip_gen: v7x
topology: tpu7x:2x2x1
jax: 0.10.0
libtpu: 0.0.40
codegen_flags: <defaults>
</compile_context>

<pallas_src>
import functools

import jax
import jax.numpy as jnp
import numpy as np
from jax.experimental import pallas as pl
from jax.experimental.pallas import tpu as pltpu

EPS = 1e-5
LANE = 128


def _round_up(x, m):
    return ((x + m - 1) // m) * m


# ----------------------------- Pallas kernel ------------------------------- #

def _res_block_kernel(*refs, stride, pad, ho, wo, downsample):
    if downsample:
        (xph_ref, w1_ref, s1_ref, w2_ref, s2_ref, w3_ref, s3_ref,
         wsc_ref, ssc_ref, out_ref, h1p, h2p) = refs
    else:
        (xph_ref, w1_ref, s1_ref, w2_ref, s2_ref, w3_ref, s3_ref,
         out_ref, h1p, h2p) = refs
        wsc_ref = ssc_ref = None

    cout = out_ref.shape[-1]
    m = ho * wo

    # Zero the padded intermediate buffers: their 1-wide borders provide the
    # zero padding for conv2/conv3.  Zeroed every grid step so the kernel is
    # correct under megacore grid sharding.
    h1p[...] = jnp.zeros_like(h1p)
    h2p[...] = jnp.zeros_like(h2p)

    def conv3x3_from_phases(w_ref):
        # 3x3 conv, stride `stride`, reading from the phase-split padded input.
        acc = jnp.zeros((m, cout), jnp.float32)
        for i in range(3):
            for j in range(3):
                ph = (i % stride) * stride + (j % stride)
                oy, ox = i // stride, j // stride
                win = xph_ref[ph, oy:oy + ho, ox:ox + wo, :]   # (ho, wo, cin_p)
                acc = acc + jnp.dot(win.reshape(m, win.shape[-1]),
                                    w_ref[i * 3 + j],
                                    preferred_element_type=jnp.float32)
        return acc

    def conv3x3_from_padded(src_ref, w_ref):
        # 3x3 conv, stride 1, reading from a zero-padded VMEM scratch buffer.
        acc = jnp.zeros((m, cout), jnp.float32)
        for i in range(3):
            for j in range(3):
                win = src_ref[i:i + ho, j:j + wo, :]           # (ho, wo, cout)
                acc = acc + jnp.dot(win.reshape(m, cout), w_ref[i * 3 + j],
                                    preferred_element_type=jnp.float32)
        return acc

    # conv1 + bn1 + relu  (BN scale already folded into the weights).
    h1 = jnp.maximum(conv3x3_from_phases(w1_ref) + s1_ref[...], 0.0)
    h1p[1:1 + ho, 1:1 + wo, :] = h1.reshape(ho, wo, cout)

    # conv2 + bn2 + relu.
    h2 = jnp.maximum(conv3x3_from_padded(h1p, w2_ref) + s2_ref[...], 0.0)
    h2p[1:1 + ho, 1:1 + wo, :] = h2.reshape(ho, wo, cout)

    # conv3 + bn3 + relu.
    h3 = jnp.maximum(conv3x3_from_padded(h2p, w3_ref) + s3_ref[...], 0.0)

    # Shortcut branch, read from the same phase-split input.
    ph = (pad % stride) * stride + (pad % stride)
    off = pad // stride
    xwin = xph_ref[ph, off:off + ho, off:off + wo, :]
    xflat = xwin.reshape(m, xwin.shape[-1])
    if downsample:
        sc = jnp.dot(xflat, wsc_ref[...],
                     preferred_element_type=jnp.float32) + ssc_ref[...]
    else:
        sc = xflat  # identity shortcut (Cin == Cout, stride == 1)

    # Residual add + final ReLU.
    out_ref[...] = jnp.maximum(h3 + sc, 0.0).reshape(1, ho, wo, cout)


# ------------------------------ JAX glue ----------------------------------- #

def _phase_split(xpad, s):
    """(N, Hp, Wp, C) zero-padded NHWC -> (N*s*s, ceil(Hp/s), ceil(Wp/s), C).

    Phase (py, px) plane holds xpad[:, py::s, px::s, :] (zero padded at the
    far edge; those cells are never read by the kernel).
    """
    n, hp, wp, c = xpad.shape
    hq = -(-hp // s)
    wq = -(-wp // s)
    xpad = jnp.pad(xpad, ((0, 0), (0, hq * s - hp), (0, wq * s - wp), (0, 0)))
    xr = xpad.reshape(n, hq, s, wq, s, c)
    xr = jnp.transpose(xr, (0, 2, 4, 1, 3, 5))        # (N, s, s, Hq, Wq, C)
    return xr.reshape(n * s * s, hq, wq, c), hq, wq


def _prep_conv_bn(w_oihw, conv_b, bn_params, cin_p, cout_p):
    """Fold inference-mode BN into (per-offset weight matrices, shift)."""
    gamma, beta, mean, var = bn_params
    scale = gamma / jnp.sqrt(var + EPS)                # (Cout,)
    shift = (conv_b - mean) * scale + beta             # (Cout,)
    cout, cin, kh, kw = w_oihw.shape
    wk = jnp.transpose(w_oihw, (2, 3, 1, 0)).reshape(kh * kw, cin, cout)
    wk = wk * scale[None, None, :]
    wk = jnp.pad(wk, ((0, 0), (0, cin_p - cin),
                      (0, cout_p - cout))).astype(jnp.float32)
    sh = jnp.pad(shift, (0, cout_p - cout)).reshape(1, cout_p).astype(jnp.float32)
    return wk, sh


def res_block_pallas(x_nchw, p, downsample, stride=2):
    n, cin, h, w = x_nchw.shape
    cout = p['w1'].shape[0]
    if not downsample:
        assert stride == 1, "identity shortcut requires stride == 1"
        assert cin == cout, "identity shortcut requires Cin == Cout"
    pad = 1
    ho = (h + 2 * pad - 3) // stride + 1
    wo = (w + 2 * pad - 3) // stride + 1

    cin_p = _round_up(cin, LANE)
    cout_p = _round_up(cout, LANE)

    # NCHW -> NHWC, lane-pad channels, spatial zero-pad for the 3x3 convs,
    # then split into stride phases (no 9x im2col expansion).
    x = jnp.transpose(x_nchw, (0, 2, 3, 1)).astype(jnp.float32)
    x = jnp.pad(x, ((0, 0), (pad, pad), (pad, pad), (0, cin_p - cin)))
    xph, hq, wq = _phase_split(x, stride)
    s2 = stride * stride

    w1, sh1 = _prep_conv_bn(p['w1'], p['b1'], p['bn1'], cin_p, cout_p)
    w2, sh2 = _prep_conv_bn(p['w2'], p['b2'], p['bn2'], cout_p, cout_p)
    w3, sh3 = _prep_conv_bn(p['w3'], p['b3'], p['bn3'], cout_p, cout_p)

    ins = [xph, w1, sh1, w2, sh2, w3, sh3]
    in_specs = [
        pl.BlockSpec((s2, hq, wq, cin_p), lambda i: (i, 0, 0, 0)),
        pl.BlockSpec((9, cin_p, cout_p), lambda i: (0, 0, 0)),
        pl.BlockSpec((1, cout_p), lambda i: (0, 0)),
        pl.BlockSpec((9, cout_p, cout_p), lambda i: (0, 0, 0)),
        pl.BlockSpec((1, cout_p), lambda i: (0, 0)),
        pl.BlockSpec((9, cout_p, cout_p), lambda i: (0, 0, 0)),
        pl.BlockSpec((1, cout_p), lambda i: (0, 0)),
    ]
    if downsample:
        wsc, shsc = _prep_conv_bn(p['w_sc'], p['b_sc'], p['bn_sc'], cin_p, cout_p)
        wsc = wsc.reshape(cin_p, cout_p)               # 1x1 kernel
        ins += [wsc, shsc]
        in_specs += [
            pl.BlockSpec((cin_p, cout_p), lambda i: (0, 0)),
            pl.BlockSpec((1, cout_p), lambda i: (0, 0)),
        ]

    kernel = functools.partial(_res_block_kernel, stride=stride, pad=pad,
                               ho=ho, wo=wo, downsample=downsample)

    flops = 2 * n * ho * wo * cout_p * (
        9 * cin_p + 2 * 9 * cout_p + (cin_p if downsample else 0))
    bytes_accessed = 4 * (xph.size + w1.size + w2.size + w3.size
                          + 3 * cout_p + n * ho * wo * cout_p
                          + (cin_p * cout_p + cout_p if downsample else 0))

    out = pl.pallas_call(
        kernel,
        out_shape=jax.ShapeDtypeStruct((n, ho, wo, cout_p), jnp.float32),
        grid=(n,),
        in_specs=in_specs,
        out_specs=pl.BlockSpec((1, ho, wo, cout_p), lambda i: (i, 0, 0, 0)),
        scratch_shapes=[pltpu.VMEM((ho + 2, wo + 2, cout_p), jnp.float32),
                        pltpu.VMEM((ho + 2, wo + 2, cout_p), jnp.float32)],
        compiler_params=pltpu.CompilerParams(
            dimension_semantics=("parallel",),
            vmem_limit_bytes=32 * 1024 * 1024),
        cost_estimate=pl.CostEstimate(flops=flops, transcendentals=0,
                                      bytes_accessed=bytes_accessed),
    )(*ins)

    # Drop channel padding, back to NCHW.
    return jnp.transpose(out[..., :cout], (0, 3, 1, 2))


# --------------------------- parameter init -------------------------------- #

def init_params(key, cin, cout, downsample):
    ks = iter(jax.random.split(key, 32))

    def conv_w(co, ci, kh, kw):
        bound = 1.0 / np.sqrt(ci * kh * kw)
        return jax.random.uniform(next(ks), (co, ci, kh, kw), jnp.float32, -bound, bound)

    def conv_b(co, ci, kh, kw):
        bound = 1.0 / np.sqrt(ci * kh * kw)
        return jax.random.uniform(next(ks), (co,), jnp.float32, -bound, bound)

    def bn(co):
        gamma = jax.random.uniform(next(ks), (co,), jnp.float32, 0.5, 1.5)
        beta = 0.1 * jax.random.normal(next(ks), (co,), jnp.float32)
        mean = 0.1 * jax.random.normal(next(ks), (co,), jnp.float32)
        var = jax.random.uniform(next(ks), (co,), jnp.float32, 0.5, 1.5)
        return (gamma, beta, mean, var)

    p = {
        'w1': conv_w(cout, cin, 3, 3), 'b1': conv_b(cout, cin, 3, 3), 'bn1': bn(cout),
        'w2': conv_w(cout, cout, 3, 3), 'b2': conv_b(cout, cout, 3, 3), 'bn2': bn(cout),
        'w3': conv_w(cout, cout, 3, 3), 'b3': conv_b(cout, cout, 3, 3), 'bn3': bn(cout),
    }
    if downsample:
        p['w_sc'] = conv_w(cout, cin, 1, 1)
        p['b_sc'] = conv_b(cout, cin, 1, 1)
        p['bn_sc'] = bn(cout)
    return p


# --------------------------- pure-JAX reference ----------------------------- #

def res_block_ref(x, p, downsample, stride):
    def conv(x, w, b, s, pad):
        y = jax.lax.conv_general_dilated(
            x, w, (s, s), [(pad, pad), (pad, pad)],
            dimension_numbers=('NCHW', 'OIHW', 'NCHW'))
        return y + b[None, :, None, None]

    def bn(x, bnp):
        g, be, m, v = bnp
        return (g[None, :, None, None] * (x - m[None, :, None, None])
                / jnp.sqrt(v[None, :, None, None] + EPS) + be[None, :, None, None])

    if downsample:
        sc = bn(conv(x, p['w_sc'], p['b_sc'], stride, 0), p['bn_sc'])
    else:
        sc = x
    h = jax.nn.relu(bn(conv(x, p['w1'], p['b1'], stride, 1), p['bn1']))
    h = jax.nn.relu(bn(conv(h, p['w2'], p['b2'], 1, 1), p['bn2']))
    h = jax.nn.relu(bn(conv(h, p['w3'], p['b3'], 1, 1), p['bn3']))
    return jax.nn.relu(h + sc)


# --------------------------------- main ------------------------------------ #

if __name__ == "__main__":
    key = jax.random.PRNGKey(0)

    # Case 1: downsample ResBlock, in=4, out=8, stride (2,2), input NCHW (2,4,16,16).
    k_x, k_p, k_x2, k_p2 = jax.random.split(key, 4)
    x = jax.random.normal(k_x, (2, 4, 16, 16), jnp.float32)
    params = init_params(k_p, cin=4, cout=8, downsample=True)
    out = res_block_pallas(x, params, downsample=True, stride=2)
    out = jax.block_until_ready(out)
    ref = res_block_ref(x, params, downsample=True, stride=2)
    assert out.shape == (2, 8, 8, 8), out.shape
    assert jnp.allclose(out, ref, rtol=1e-4, atol=1e-4), \
        f"max abs err {jnp.max(jnp.abs(out - ref))}"

    # Case 2: no downsample (identity shortcut), in=out=8, input NCHW (2,8,16,16).
    x2 = jax.random.normal(k_x2, (2, 8, 16, 16), jnp.float32)
    params2 = init_params(k_p2, cin=8, cout=8, downsample=False)
    out2 = res_block_pallas(x2, params2, downsample=False, stride=1)
    out2 = jax.block_until_ready(out2)
    ref2 = res_block_ref(x2, params2, downsample=False, stride=1)
    assert out2.shape == (2, 8, 16, 16), out2.shape
    assert jnp.allclose(out2, ref2, rtol=1e-4, atol=1e-4), \
        f"max abs err {jnp.max(jnp.abs(out2 - ref2))}"

    print("KERNEL_OK")
</pallas_src>

<mosaic_0001>
module attributes {stable_mosaic.version = 11 : i64} {
  func.func @_res_block_kernel(%arg0: i32, %arg1: memref<4x9x9x128xf32, #tpu.memory_space<vmem>>, %arg2: memref<9x128x128xf32, #tpu.memory_space<vmem>>, %arg3: memref<1x128xf32, #tpu.memory_space<vmem>>, %arg4: memref<9x128x128xf32, #tpu.memory_space<vmem>>, %arg5: memref<1x128xf32, #tpu.memory_space<vmem>>, %arg6: memref<9x128x128xf32, #tpu.memory_space<vmem>>, %arg7: memref<1x128xf32, #tpu.memory_space<vmem>>, %arg8: memref<128x128xf32, #tpu.memory_space<vmem>>, %arg9: memref<1x128xf32, #tpu.memory_space<vmem>>, %arg10: memref<1x8x8x128xf32, #tpu.memory_space<vmem>>, %arg11: memref<10x10x128xf32, #tpu.memory_space<vmem>>, %arg12: memref<10x10x128xf32, #tpu.memory_space<vmem>>) attributes {dimension_semantics = [#tpu.dimension_semantics<parallel>], iteration_bounds = array<i64: 2>, scalar_prefetch = 0 : i64, scratch_operands = 2 : i64, tpu.core_type = #tpu.core_type<tc>, window_params = [{transform_indices = @transform_0, window_bounds = array<i64: 4, 9, 9, 128>}, {pipeline_mode = #tpu.pipeline_mode<synchronous>, transform_indices = @transform_1, window_bounds = array<i64: 9, 128, 128>}, {pipeline_mode = #tpu.pipeline_mode<synchronous>, transform_indices = @transform_2, window_bounds = array<i64: 1, 128>}, {pipeline_mode = #tpu.pipeline_mode<synchronous>, transform_indices = @transform_3, window_bounds = array<i64: 9, 128, 128>}, {pipeline_mode = #tpu.pipeline_mode<synchronous>, transform_indices = @transform_4, window_bounds = array<i64: 1, 128>}, {pipeline_mode = #tpu.pipeline_mode<synchronous>, transform_indices = @transform_5, window_bounds = array<i64: 9, 128, 128>}, {pipeline_mode = #tpu.pipeline_mode<synchronous>, transform_indices = @transform_6, window_bounds = array<i64: 1, 128>}, {pipeline_mode = #tpu.pipeline_mode<synchronous>, transform_indices = @transform_7, window_bounds = array<i64: 128, 128>}, {pipeline_mode = #tpu.pipeline_mode<synchronous>, transform_indices = @transform_8, window_bounds = array<i64: 1, 128>}, {transform_indices = @transform_9, window_bounds = array<i64: 1, 8, 8, 128>}]} {
    %cst = arith.constant 0.000000e+00 : f32
    %0 = vector.broadcast %cst : f32 to vector<10x10x128xf32>
    %c0 = arith.constant 0 : index
    %c0_0 = arith.constant 0 : index
    %c0_1 = arith.constant 0 : index
    %1 = vector.load %arg11[%c0, %c0_0, %c0_1] : memref<10x10x128xf32, #tpu.memory_space<vmem>>, vector<10x10x128xf32>
    tpu.vector_store %arg11[%c0, %c0_0, %c0_1], %0 {strides = array<i32>} : memref<10x10x128xf32, #tpu.memory_space<vmem>>, vector<10x10x128xf32>,
    %cst_2 = arith.constant 0.000000e+00 : f32
    %2 = vector.broadcast %cst_2 : f32 to vector<10x10x128xf32>
    %c0_3 = arith.constant 0 : index
    %c0_4 = arith.constant 0 : index
    %c0_5 = arith.constant 0 : index
    %3 = vector.load %arg12[%c0_3, %c0_4, %c0_5] : memref<10x10x128xf32, #tpu.memory_space<vmem>>, vector<10x10x128xf32>
    tpu.vector_store %arg12[%c0_3, %c0_4, %c0_5], %2 {strides = array<i32>} : memref<10x10x128xf32, #tpu.memory_space<vmem>>, vector<10x10x128xf32>,
    %cst_6 = arith.constant 0.000000e+00 : f32
    %4 = vector.broadcast %cst_6 : f32 to vector<64x128xf32>
    %c0_7 = arith.constant 0 : index
    %c0_8 = arith.constant 0 : index
    %c0_9 = arith.constant 0 : index
    %c0_10 = arith.constant 0 : index
    %5 = vector.load %arg1[%c0_7, %c0_8, %c0_9, %c0_10] : memref<4x9x9x128xf32, #tpu.memory_space<vmem>>, vector<1x8x8x128xf32>
    %6 = vector.shape_cast %5 : vector<1x8x8x128xf32> to vector<8x8x128xf32>
    %7 = vector.shape_cast %6 : vector<8x8x128xf32> to vector<64x128xf32>
    %c0_11 = arith.constant 0 : index
    %c0_12 = arith.constant 0 : index
    %c0_13 = arith.constant 0 : index
    %8 = vector.load %arg2[%c0_11, %c0_12, %c0_13] : memref<9x128x128xf32, #tpu.memory_space<vmem>>, vector<1x128x128xf32>
    %9 = vector.shape_cast %8 : vector<1x128x128xf32> to vector<128x128xf32>
    %cst_14 = arith.constant dense<0.000000e+00> : vector<64x128xf32>
    %10 = tpu.matmul %7, %9, %cst_14 {dimension_numbers = #tpu.dot_dimension_numbers<[1], [0], [0], [1], [0, 0, 1, 1], [], []>} : vector<64x128xf32>, vector<128x128xf32>, vector<64x128xf32> -> vector<64x128xf32>
    %11 = arith.addf %4, %10 : vector<64x128xf32>
    %c1 = arith.constant 1 : index
    %c0_15 = arith.constant 0 : index
    %c0_16 = arith.constant 0 : index
    %c0_17 = arith.constant 0 : index
    %12 = vector.load %arg1[%c1, %c0_15, %c0_16, %c0_17] : memref<4x9x9x128xf32, #tpu.memory_space<vmem>>, vector<1x8x8x128xf32>
    %13 = vector.shape_cast %12 : vector<1x8x8x128xf32> to vector<8x8x128xf32>
    %14 = vector.shape_cast %13 : vector<8x8x128xf32> to vector<64x128xf32>
    %c1_18 = arith.constant 1 : index
    %c0_19 = arith.constant 0 : index
    %c0_20 = arith.constant 0 : index
    %15 = vector.load %arg2[%c1_18, %c0_19, %c0_20] : memref<9x128x128xf32, #tpu.memory_space<vmem>>, vector<1x128x128xf32>
    %16 = vector.shape_cast %15 : vector<1x128x128xf32> to vector<128x128xf32>
    %cst_21 = arith.constant dense<0.000000e+00> : vector<64x128xf32>
    %17 = tpu.matmul %14, %16, %cst_21 {dimension_numbers = #tpu.dot_dimension_numbers<[1], [0], [0], [1], [0, 0, 1, 1], [], []>} : vector<64x128xf32>, vector<128x128xf32>, vector<64x128xf32> -> vector<64x128xf32>
    %18 = arith.addf %11, %17 : vector<64x128xf32>
    %c0_22 = arith.constant 0 : index
    %c0_23 = arith.constant 0 : index
    %c1_24 = arith.constant 1 : index
    %c0_25 = arith.constant 0 : index
    %19 = vector.load %arg1[%c0_22, %c0_23, %c1_24, %c0_25] : memref<4x9x9x128xf32, #tpu.memory_space<vmem>>, vector<1x8x8x128xf32>
    %20 = vector.shape_cast %19 : vector<1x8x8x128xf32> to vector<8x8x128xf32>
    %21 = vector.shape_cast %20 : vector<8x8x128xf32> to vector<64x128xf32>
    %c2 = arith.constant 2 : index
    %c0_26 = arith.constant 0 : index
    %c0_27 = arith.constant 0 : index
    %22 = vector.load %arg2[%c2, %c0_26, %c0_27] : memref<9x128x128xf32, #tpu.memory_space<vmem>>, vector<1x128x128xf32>
    %23 = vector.shape_cast %22 : vector<1x128x128xf32> to vector<128x128xf32>
    %cst_28 = arith.constant dense<0.000000e+00> : vector<64x128xf32>
    %24 = tpu.matmul %21, %23, %cst_28 {dimension_numbers = #tpu.dot_dimension_numbers<[1], [0], [0], [1], [0, 0, 1, 1], [], []>} : vector<64x128xf32>, vector<128x128xf32>, vector<64x128xf32> -> vector<64x128xf32>
    %25 = arith.addf %18, %24 : vector<64x128xf32>
    %c2_29 = arith.constant 2 : index
    %c0_30 = arith.constant 0 : index
    %c0_31 = arith.constant 0 : index
    %c0_32 = arith.constant 0 : index
    %26 = vector.load %arg1[%c2_29, %c0_30, %c0_31, %c0_32] : memref<4x9x9x128xf32, #tpu.memory_space<vmem>>, vector<1x8x8x128xf32>
    %27 = vector.shape_cast %26 : vector<1x8x8x128xf32> to vector<8x8x128xf32>
    %28 = vector.shape_cast %27 : vector<8x8x128xf32> to vector<64x128xf32>
    %c3 = arith.constant 3 : index
    %c0_33 = arith.constant 0 : index
    %c0_34 = arith.constant 0 : index
    %29 = vector.load %arg2[%c3, %c0_33, %c0_34] : memref<9x128x128xf32, #tpu.memory_space<vmem>>, vector<1x128x128xf32>
    %30 = vector.shape_cast %29 : vector<1x128x128xf32> to vector<128x128xf32>
    %cst_35 = arith.constant dense<0.000000e+00> : vector<64x128xf32>
    %31 = tpu.matmul %28, %30, %cst_35 {dimension_numbers = #tpu.dot_dimension_numbers<[1], [0], [0], [1], [0, 0, 1, 1], [], []>} : vector<64x128xf32>, vector<128x128xf32>, vector<64x128xf32> -> vector<64x128xf32>
    %32 = arith.addf %25, %31 : vector<64x128xf32>
    %c3_36 = arith.constant 3 : index
    %c0_37 = arith.constant 0 : index
    %c0_38 = arith.constant 0 : index
    %c0_39 = arith.constant 0 : index
    %33 = vector.load %arg1[%c3_36, %c0_37, %c0_38, %c0_39] : memref<4x9x9x128xf32, #tpu.memory_space<vmem>>, vector<1x8x8x128xf32>
    %34 = vector.shape_cast %33 : vector<1x8x8x128xf32> to vector<8x8x128xf32>
    %35 = vector.shape_cast %34 : vector<8x8x128xf32> to vector<64x128xf32>
    %c4 = arith.constant 4 : index
    %c0_40 = arith.constant 0 : index
    %c0_41 = arith.constant 0 : index
    %36 = vector.load %arg2[%c4, %c0_40, %c0_41] : memref<9x128x128xf32, #tpu.memory_space<vmem>>, vector<1x128x128xf32>
    %37 = vector.shape_cast %36 : vector<1x128x128xf32> to vector<128x128xf32>
    %cst_42 = arith.constant dense<0.000000e+00> : vector<64x128xf32>
    %38 = tpu.matmul %35, %37, %cst_42 {dimension_numbers = #tpu.dot_dimension_numbers<[1], [0], [0], [1], [0, 0, 1, 1], [], []>} : vector<64x128xf32>, vector<128x128xf32>, vector<64x128xf32> -> vector<64x128xf32>
    %39 = arith.addf %32, %38 : vector<64x128xf32>
    %c2_43 = arith.constant 2 : index
    %c0_44 = arith.constant 0 : index
    %c1_45 = arith.constant 1 : index
    %c0_46 = arith.constant 0 : index
    %40 = vector.load %arg1[%c2_43, %c0_44, %c1_45, %c0_46] : memref<4x9x9x128xf32, #tpu.memory_space<vmem>>, vector<1x8x8x128xf32>
    %41 = vector.shape_cast %40 : vector<1x8x8x128xf32> to vector<8x8x128xf32>
    %42 = vector.shape_cast %41 : vector<8x8x128xf32> to vector<64x128xf32>
    %c5 = arith.constant 5 : index
    %c0_47 = arith.constant 0 : index
    %c0_48 = arith.constant 0 : index
    %43 = vector.load %arg2[%c5, %c0_47, %c0_48] : memref<9x128x128xf32, #tpu.memory_space<vmem>>, vector<1x128x128xf32>
    %44 = vector.shape_cast %43 : vector<1x128x128xf32> to vector<128x128xf32>
    %cst_49 = arith.constant dense<0.000000e+00> : vector<64x128xf32>
    %45 = tpu.matmul %42, %44, %cst_49 {dimension_numbers = #tpu.dot_dimension_numbers<[1], [0], [0], [1], [0, 0, 1, 1], [], []>} : vector<64x128xf32>, vector<128x128xf32>, vector<64x128xf32> -> vector<64x128xf32>
    %46 = arith.addf %39, %45 : vector<64x128xf32>
    %c0_50 = arith.constant 0 : index
    %c1_51 = arith.constant 1 : index
    %c0_52 = arith.constant 0 : index
    %c0_53 = arith.constant 0 : index
    %47 = vector.load %arg1[%c0_50, %c1_51, %c0_52, %c0_53] : memref<4x9x9x128xf32, #tpu.memory_space<vmem>>, vector<1x8x8x128xf32>
    %48 = vector.shape_cast %47 : vector<1x8x8x128xf32> to vector<8x8x128xf32>
    %49 = vector.shape_cast %48 : vector<8x8x128xf32> to vector<64x128xf32>
    %c6 = arith.constant 6 : index
    %c0_54 = arith.constant 0 : index
    %c0_55 = arith.constant 0 : index
    %50 = vector.load %arg2[%c6, %c0_54, %c0_55] : memref<9x128x128xf32, #tpu.memory_space<vmem>>, vector<1x128x128xf32>
    %51 = vector.shape_cast %50 : vector<1x128x128xf32> to vector<128x128xf32>
    %cst_56 = arith.constant dense<0.000000e+00> : vector<64x128xf32>
    %52 = tpu.matmul %49, %51, %cst_56 {dimension_numbers = #tpu.dot_dimension_numbers<[1], [0], [0], [1], [0, 0, 1, 1], [], []>} : vector<64x128xf32>, vector<128x128xf32>, vector<64x128xf32> -> vector<64x128xf32>
    %53 = arith.addf %46, %52 : vector<64x128xf32>
    %c1_57 = arith.constant 1 : index
    %c1_58 = arith.constant 1 : index
    %c0_59 = arith.constant 0 : index
    %c0_60 = arith.constant 0 : index
    %54 = vector.load %arg1[%c1_57, %c1_58, %c0_59, %c0_60] : memref<4x9x9x128xf32, #tpu.memory_space<vmem>>, vector<1x8x8x128xf32>
    %55 = vector.shape_cast %54 : vector<1x8x8x128xf32> to vector<8x8x128xf32>
    %56 = vector.shape_cast %55 : vector<8x8x128xf32> to vector<64x128xf32>
    %c7 = arith.constant 7 : index
    %c0_61 = arith.constant 0 : index
    %c0_62 = arith.constant 0 : index
    %57 = vector.load %arg2[%c7, %c0_61, %c0_62] : memref<9x128x128xf32, #tpu.memory_space<vmem>>, vector<1x128x128xf32>
    %58 = vector.shape_cast %57 : vector<1x128x128xf32> to vector<128x128xf32>
    %cst_63 = arith.constant dense<0.000000e+00> : vector<64x128xf32>
    %59 = tpu.matmul %56, %58, %cst_63 {dimension_numbers = #tpu.dot_dimension_numbers<[1], [0], [0], [1], [0, 0, 1, 1], [], []>} : vector<64x128xf32>, vector<128x128xf32>, vector<64x128xf32> -> vector<64x128xf32>
    %60 = arith.addf %53, %59 : vector<64x128xf32>
    %c0_64 = arith.constant 0 : index
    %c1_65 = arith.constant 1 : index
    %c1_66 = arith.constant 1 : index
    %c0_67 = arith.constant 0 : index
    %61 = vector.load %arg1[%c0_64, %c1_65, %c1_66, %c0_67] : memref<4x9x9x128xf32, #tpu.memory_space<vmem>>, vector<1x8x8x128xf32>
    %62 = vector.shape_cast %61 : vector<1x8x8x128xf32> to vector<8x8x128xf32>
    %63 = vector.shape_cast %62 : vector<8x8x128xf32> to vector<64x128xf32>
    %c8 = arith.constant 8 : index
    %c0_68 = arith.constant 0 : index
    %c0_69 = arith.constant 0 : index
    %64 = vector.load %arg2[%c8, %c0_68, %c0_69] : memref<9x128x128xf32, #tpu.memory_space<vmem>>, vector<1x128x128xf32>
    %65 = vector.shape_cast %64 : vector<1x128x128xf32> to vector<128x128xf32>
    %cst_70 = arith.constant dense<0.000000e+00> : vector<64x128xf32>
    %66 = tpu.matmul %63, %65, %cst_70 {dimension_numbers = #tpu.dot_dimension_numbers<[1], [0], [0], [1], [0, 0, 1, 1], [], []>} : vector<64x128xf32>, vector<128x128xf32>, vector<64x128xf32> -> vector<64x128xf32>
    %67 = arith.addf %60, %66 : vector<64x128xf32>
    %c0_71 = arith.constant 0 : index
    %c0_72 = arith.constant 0 : index
    %68 = vector.load %arg3[%c0_71, %c0_72] : memref<1x128xf32, #tpu.memory_space<vmem>>, vector<1x128xf32>
    %69 = vector.broadcast %68 : vector<1x128xf32> to vector<64x128xf32>
    %70 = arith.addf %67, %69 : vector<64x128xf32>
    %cst_73 = arith.constant 0.000000e+00 : f32
    %71 = vector.broadcast %cst_73 : f32 to vector<64x128xf32>
    %72 = arith.maximumf %70, %71 : vector<64x128xf32>
    %73 = vector.shape_cast %72 : vector<64x128xf32> to vector<8x8x128xf32>
    %c1_74 = arith.constant 1 : index
    %c1_75 = arith.constant 1 : index
    %c0_76 = arith.constant 0 : index
    %74 = vector.load %arg11[%c1_74, %c1_75, %c0_76] : memref<10x10x128xf32, #tpu.memory_space<vmem>>, vector<8x8x128xf32>
    tpu.vector_store %arg11[%c1_74, %c1_75, %c0_76], %73 {strides = array<i32>} : memref<10x10x128xf32, #tpu.memory_space<vmem>>, vector<8x8x128xf32>,
    %cst_77 = arith.constant 0.000000e+00 : f32
    %75 = vector.broadcast %cst_77 : f32 to vector<64x128xf32>
    %c0_78 = arith.constant 0 : index
    %c0_79 = arith.constant 0 : index
    %c0_80 = arith.constant 0 : index
    %76 = vector.load %arg11[%c0_78, %c0_79, %c0_80] : memref<10x10x128xf32, #tpu.memory_space<vmem>>, vector<8x8x128xf32>
    %77 = vector.shape_cast %76 : vector<8x8x128xf32> to vector<64x128xf32>
    %c0_81 = arith.constant 0 : index
    %c0_82 = arith.constant 0 : index
    %c0_83 = arith.constant 0 : index
    %78 = vector.load %arg4[%c0_81, %c0_82, %c0_83] : memref<9x128x128xf32, #tpu.memory_space<vmem>>, vector<1x128x128xf32>
    %79 = vector.shape_cast %78 : vector<1x128x128xf32> to vector<128x128xf32>
    %cst_84 = arith.constant dense<0.000000e+00> : vector<64x128xf32>
    %80 = tpu.matmul %77, %79, %cst_84 {dimension_numbers = #tpu.dot_dimension_numbers<[1], [0], [0], [1], [0, 0, 1, 1], [], []>} : vector<64x128xf32>, vector<128x128xf32>, vector<64x128xf32> -> vector<64x128xf32>
    %81 = arith.addf %75, %80 : vector<64x128xf32>
    %c0_85 = arith.constant 0 : index
    %c1_86 = arith.constant 1 : index
    %c0_87 = arith.constant 0 : index
    %82 = vector.load %arg11[%c0_85, %c1_86, %c0_87] : memref<10x10x128xf32, #tpu.memory_space<vmem>>, vector<8x8x128xf32>
    %83 = vector.shape_cast %82 : vector<8x8x128xf32> to vector<64x128xf32>
    %c1_88 = arith.constant 1 : index
    %c0_89 = arith.constant 0 : index
    %c0_90 = arith.constant 0 : index
    %84 = vector.load %arg4[%c1_88, %c0_89, %c0_90] : memref<9x128x128xf32, #tpu.memory_space<vmem>>, vector<1x128x128xf32>
    %85 = vector.shape_cast %84 : vector<1x128x128xf32> to vector<128x128xf32>
    %cst_91 = arith.constant dense<0.000000e+00> : vector<64x128xf32>
    %86 = tpu.matmul %83, %85, %cst_91 {dimension_numbers = #tpu.dot_dimension_numbers<[1], [0], [0], [1], [0, 0, 1, 1], [], []>} : vector<64x128xf32>, vector<128x128xf32>, vector<64x128xf32> -> vector<64x128xf32>
    %87 = arith.addf %81, %86 : vector<64x128xf32>
    %c0_92 = arith.constant 0 : index
    %c2_93 = arith.constant 2 : index
    %c0_94 = arith.constant 0 : index
    %88 = vector.load %arg11[%c0_92, %c2_93, %c0_94] : memref<10x10x128xf32, #tpu.memory_space<vmem>>, vector<8x8x128xf32>
    %89 = vector.shape_cast %88 : vector<8x8x128xf32> to vector<64x128xf32>
    %c2_95 = arith.constant 2 : index
    %c0_96 = arith.constant 0 : index
    %c0_97 = arith.constant 0 : index
    %90 = vector.load %arg4[%c2_95, %c0_96, %c0_97] : memref<9x128x128xf32, #tpu.memory_space<vmem>>, vector<1x128x128xf32>
    %91 = vector.shape_cast %90 : vector<1x128x128xf32> to vector<128x128xf32>
    %cst_98 = arith.constant dense<0.000000e+00> : vector<64x128xf32>
    %92 = tpu.matmul %89, %91, %cst_98 {dimension_numbers = #tpu.dot_dimension_numbers<[1], [0], [0], [1], [0, 0, 1, 1], [], []>} : vector<64x128xf32>, vector<128x128xf32>, vector<64x128xf32> -> vector<64x128xf32>
    %93 = arith.addf %87, %92 : vector<64x128xf32>
    %c1_99 = arith.constant 1 : index
    %c0_100 = arith.constant 0 : index
    %c0_101 = arith.constant 0 : index
    %94 = vector.load %arg11[%c1_99, %c0_100, %c0_101] : memref<10x10x128xf32, #tpu.memory_space<vmem>>, vector<8x8x128xf32>
    %95 = vector.shape_cast %94 : vector<8x8x128xf32> to vector<64x128xf32>
    %c3_102 = arith.constant 3 : index
    %c0_103 = arith.constant 0 : index
    %c0_104 = arith.constant 0 : index
    %96 = vector.load %arg4[%c3_102, %c0_103, %c0_104] : memref<9x128x128xf32, #tpu.memory_space<vmem>>, vector<1x128x128xf32>
    %97 = vector.shape_cast %96 : vector<1x128x128xf32> to vector<128x128xf32>
    %cst_105 = arith.constant dense<0.000000e+00> : vector<64x128xf32>
    %98 = tpu.matmul %95, %97, %cst_105 {dimension_numbers = #tpu.dot_dimension_numbers<[1], [0], [0], [1], [0, 0, 1, 1], [], []>} : vector<64x128xf32>, vector<128x128xf32>, vector<64x128xf32> -> vector<64x128xf32>
    %99 = arith.addf %93, %98 : vector<64x128xf32>
    %c1_106 = arith.constant 1 : index
    %c1_107 = arith.constant 1 : index
    %c0_108 = arith.constant 0 : index
    %100 = vector.load %arg11[%c1_106, %c1_107, %c0_108] : memref<10x10x128xf32, #tpu.memory_space<vmem>>, vector<8x8x128xf32>
    %101 = vector.shape_cast %100 : vector<8x8x128xf32> to vector<64x128xf32>
    %c4_109 = arith.constant 4 : index
    %c0_110 = arith.constant 0 : index
    %c0_111 = arith.constant 0 : index
    %102 = vector.load %arg4[%c4_109, %c0_110, %c0_111] : memref<9x128x128xf32, #tpu.memory_space<vmem>>, vector<1x128x128xf32>
    %103 = vector.shape_cast %102 : vector<1x128x128xf32> to vector<128x128xf32>
    %cst_112 = arith.constant dense<0.000000e+00> : vector<64x128xf32>
    %104 = tpu.matmul %101, %103, %cst_112 {dimension_numbers = #tpu.dot_dimension_numbers<[1], [0], [0], [1], [0, 0, 1, 1], [], []>} : vector<64x128xf32>, vector<128x128xf32>, vector<64x128xf32> -> vector<64x128xf32>
    %105 = arith.addf %99, %104 : vector<64x128xf32>
    %c1_113 = arith.constant 1 : index
    %c2_114 = arith.constant 2 : index
    %c0_115 = arith.constant 0 : index
    %106 = vector.load %arg11[%c1_113, %c2_114, %c0_115] : memref<10x10x128xf32, #tpu.memory_space<vmem>>, vector<8x8x128xf32>
    %107 = vector.shape_cast %106 : vector<8x8x128xf32> to vector<64x128xf32>
    %c5_116 = arith.constant 5 : index
    %c0_117 = arith.constant 0 : index
    %c0_118 = arith.constant 0 : index
    %108 = vector.load %arg4[%c5_116, %c0_117, %c0_118] : memref<9x128x128xf32, #tpu.memory_space<vmem>>, vector<1x128x128xf32>
    %109 = vector.shape_cast %108 : vector<1x128x128xf32> to vector<128x128xf32>
    %cst_119 = arith.constant dense<0.000000e+00> : vector<64x128xf32>
    %110 = tpu.matmul %107, %109, %cst_119 {dimension_numbers = #tpu.dot_dimension_numbers<[1], [0], [0], [1], [0, 0, 1, 1], [], []>} : vector<64x128xf32>, vector<128x128xf32>, vector<64x128xf32> -> vector<64x128xf32>
    %111 = arith.addf %105, %110 : vector<64x128xf32>
    %c2_120 = arith.constant 2 : index
    %c0_121 = arith.constant 0 : index
    %c0_122 = arith.constant 0 : index
    %112 = vector.load %arg11[%c2_120, %c0_121, %c0_122] : memref<10x10x128xf32, #tpu.memory_space<vmem>>, vector<8x8x128xf32>
    %113 = vector.shape_cast %112 : vector<8x8x128xf32> to vector<64x128xf32>
    %c6_123 = arith.constant 6 : index
    %c0_124 = arith.constant 0 : index
    %c0_125 = arith.constant 0 : index
    %114 = vector.load %arg4[%c6_123, %c0_124, %c0_125] : memref<9x128x128xf32, #tpu.memory_space<vmem>>, vector<1x128x128xf32>
    %115 = vector.shape_cast %114 : vector<1x128x128xf32> to vector<128x128xf32>
    %cst_126 = arith.constant dense<0.000000e+00> : vector<64x128xf32>
    %116 = tpu.matmul %113, %115, %cst_126 {dimension_numbers = #tpu.dot_dimension_numbers<[1], [0], [0], [1], [0, 0, 1, 1], [], []>} : vector<64x128xf32>, vector<128x128xf32>, vector<64x128xf32> -> vector<64x128xf32>
    %117 = arith.addf %111, %116 : vector<64x128xf32>
    %c2_127 = arith.constant 2 : index
    %c1_128 = arith.constant 1 : index
    %c0_129 = arith.constant 0 : index
    %118 = vector.load %arg11[%c2_127, %c1_128, %c0_129] : memref<10x10x128xf32, #tpu.memory_space<vmem>>, vector<8x8x128xf32>
    %119 = vector.shape_cast %118 : vector<8x8x128xf32> to vector<64x128xf32>
    %c7_130 = arith.constant 7 : index
    %c0_131 = arith.constant 0 : index
    %c0_132 = arith.constant 0 : index
    %120 = vector.load %arg4[%c7_130, %c0_131, %c0_132] : memref<9x128x128xf32, #tpu.memory_space<vmem>>, vector<1x128x128xf32>
    %121 = vector.shape_cast %120 : vector<1x128x128xf32> to vector<128x128xf32>
    %cst_133 = arith.constant dense<0.000000e+00> : vector<64x128xf32>
    %122 = tpu.matmul %119, %121, %cst_133 {dimension_numbers = #tpu.dot_dimension_numbers<[1], [0], [0], [1], [0, 0, 1, 1], [], []>} : vector<64x128xf32>, vector<128x128xf32>, vector<64x128xf32> -> vector<64x128xf32>
    %123 = arith.addf %117, %122 : vector<64x128xf32>
    %c2_134 = arith.constant 2 : index
    %c2_135 = arith.constant 2 : index
    %c0_136 = arith.constant 0 : index
    %124 = vector.load %arg11[%c2_134, %c2_135, %c0_136] : memref<10x10x128xf32, #tpu.memory_space<vmem>>, vector<8x8x128xf32>
    %125 = vector.shape_cast %124 : vector<8x8x128xf32> to vector<64x128xf32>
    %c8_137 = arith.constant 8 : index
    %c0_138 = arith.constant 0 : index
    %c0_139 = arith.constant 0 : index
    %126 = vector.load %arg4[%c8_137, %c0_138, %c0_139] : memref<9x128x128xf32, #tpu.memory_space<vmem>>, vector<1x128x128xf32>
    %127 = vector.shape_cast %126 : vector<1x128x128xf32> to vector<128x128xf32>
    %cst_140 = arith.constant dense<0.000000e+00> : vector<64x128xf32>
    %128 = tpu.matmul %125, %127, %cst_140 {dimension_numbers = #tpu.dot_dimension_numbers<[1], [0], [0], [1], [0, 0, 1, 1], [], []>} : vector<64x128xf32>, vector<128x128xf32>, vector<64x128xf32> -> vector<64x128xf32>
    %129 = arith.addf %123, %128 : vector<64x128xf32>
    %c0_141 = arith.constant 0 : index
    %c0_142 = arith.constant 0 : index
    %130 = vector.load %arg5[%c0_141, %c0_142] : memref<1x128xf32, #tpu.memory_space<vmem>>, vector<1x128xf32>
    %131 = vector.broadcast %130 : vector<1x128xf32> to vector<64x128xf32>
    %132 = arith.addf %129, %131 : vector<64x128xf32>
    %cst_143 = arith.constant 0.000000e+00 : f32
    %133 = vector.broadcast %cst_143 : f32 to vector<64x128xf32>
    %134 = arith.maximumf %132, %133 : vector<64x128xf32>
    %135 = vector.shape_cast %134 : vector<64x128xf32> to vector<8x8x128xf32>
    %c1_144 = arith.constant 1 : index
    %c1_145 = arith.constant 1 : index
    %c0_146 = arith.constant 0 : index
    %136 = vector.load %arg12[%c1_144, %c1_145, %c0_146] : memref<10x10x128xf32, #tpu.memory_space<vmem>>, vector<8x8x128xf32>
    tpu.vector_store %arg12[%c1_144, %c1_145, %c0_146], %135 {strides = array<i32>} : memref<10x10x128xf32, #tpu.memory_space<vmem>>, vector<8x8x128xf32>,
    %cst_147 = arith.constant 0.000000e+00 : f32
    %137 = vector.broadcast %cst_147 : f32 to vector<64x128xf32>
    %c0_148 = arith.constant 0 : index
    %c0_149 = arith.constant 0 : index
    %c0_150 = arith.constant 0 : index
    %138 = vector.load %arg12[%c0_148, %c0_149, %c0_150] : memref<10x10x128xf32, #tpu.memory_space<vmem>>, vector<8x8x128xf32>
    %139 = vector.shape_cast %138 : vector<8x8x128xf32> to vector<64x128xf32>
    %c0_151 = arith.constant 0 : index
    %c0_152 = arith.constant 0 : index
    %c0_153 = arith.constant 0 : index
    %140 = vector.load %arg6[%c0_151, %c0_152, %c0_153] : memref<9x128x128xf32, #tpu.memory_space<vmem>>, vector<1x128x128xf32>
    %141 = vector.shape_cast %140 : vector<1x128x128xf32> to vector<128x128xf32>
    %cst_154 = arith.constant dense<0.000000e+00> : vector<64x128xf32>
    %142 = tpu.matmul %139, %141, %cst_154 {dimension_numbers = #tpu.dot_dimension_numbers<[1], [0], [0], [1], [0, 0, 1, 1], [], []>} : vector<64x128xf32>, vector<128x128xf32>, vector<64x128xf32> -> vector<64x128xf32>
    %143 = arith.addf %137, %142 : vector<64x128xf32>
    %c0_155 = arith.constant 0 : index
    %c1_156 = arith.constant 1 : index
    %c0_157 = arith.constant 0 : index
    %144 = vector.load %arg12[%c0_155, %c1_156, %c0_157] : memref<10x10x128xf32, #tpu.memory_space<vmem>>, vector<8x8x128xf32>
    %145 = vector.shape_cast %144 : vector<8x8x128xf32> to vector<64x128xf32>
    %c1_158 = arith.constant 1 : index
    %c0_159 = arith.constant 0 : index
    %c0_160 = arith.constant 0 : index
    %146 = vector.load %arg6[%c1_158, %c0_159, %c0_160] : memref<9x128x128xf32, #tpu.memory_space<vmem>>, vector<1x128x128xf32>
    %147 = vector.shape_cast %146 : vector<1x128x128xf32> to vector<128x128xf32>
    %cst_161 = arith.constant dense<0.000000e+00> : vector<64x128xf32>
    %148 = tpu.matmul %145, %147, %cst_161 {dimension_numbers = #tpu.dot_dimension_numbers<[1], [0], [0], [1], [0, 0, 1, 1], [], []>} : vector<64x128xf32>, vector<128x128xf32>, vector<64x128xf32> -> vector<64x128xf32>
    %149 = arith.addf %143, %148 : vector<64x128xf32>
    %c0_162 = arith.constant 0 : index
    %c2_163 = arith.constant 2 : index
    %c0_164 = arith.constant 0 : index
    %150 = vector.load %arg12[%c0_162, %c2_163, %c0_164] : memref<10x10x128xf32, #tpu.memory_space<vmem>>, vector<8x8x128xf32>
    %151 = vector.shape_cast %150 : vector<8x8x128xf32> to vector<64x128xf32>
    %c2_165 = arith.constant 2 : index
    %c0_166 = arith.constant 0 : index
    %c0_167 = arith.constant 0 : index
    %152 = vector.load %arg6[%c2_165, %c0_166, %c0_167] : memref<9x128x128xf32, #tpu.memory_space<vmem>>, vector<1x128x128xf32>
    %153 = vector.shape_cast %152 : vector<1x128x128xf32> to vector<128x128xf32>
    %cst_168 = arith.constant dense<0.000000e+00> : vector<64x128xf32>
    %154 = tpu.matmul %151, %153, %cst_168 {dimension_numbers = #tpu.dot_dimension_numbers<[1], [0], [0], [1], [0, 0, 1, 1], [], []>} : vector<64x128xf32>, vector<128x128xf32>, vector<64x128xf32> -> vector<64x128xf32>
    %155 = arith.addf %149, %154 : vector<64x128xf32>
    %c1_169 = arith.constant 1 : index
    %c0_170 = arith.constant 0 : index
    %c0_171 = arith.constant 0 : index
    %156 = vector.load %arg12[%c1_169, %c0_170, %c0_171] : memref<10x10x128xf32, #tpu.memory_space<vmem>>, vector<8x8x128xf32>
    %157 = vector.shape_cast %156 : vector<8x8x128xf32> to vector<64x128xf32>
    %c3_172 = arith.constant 3 : index
    %c0_173 = arith.constant 0 : index
    %c0_174 = arith.constant 0 : index
    %158 = vector.load %arg6[%c3_172, %c0_173, %c0_174] : memref<9x128x128xf32, #tpu.memory_space<vmem>>, vector<1x128x128xf32>
    %159 = vector.shape_cast %158 : vector<1x128x128xf32> to vector<128x128xf32>
    %cst_175 = arith.constant dense<0.000000e+00> : vector<64x128xf32>
    %160 = tpu.matmul %157, %159, %cst_175 {dimension_numbers = #tpu.dot_dimension_numbers<[1], [0], [0], [1], [0, 0, 1, 1], [], []>} : vector<64x128xf32>, vector<128x128xf32>, vector<64x128xf32> -> vector<64x128xf32>
    %161 = arith.addf %155, %160 : vector<64x128xf32>
    %c1_176 = arith.constant 1 : index
    %c1_177 = arith.constant 1 : index
    %c0_178 = arith.constant 0 : index
    %162 = vector.load %arg12[%c1_176, %c1_177, %c0_178] : memref<10x10x128xf32, #tpu.memory_space<vmem>>, vector<8x8x128xf32>
    %163 = vector.shape_cast %162 : vector<8x8x128xf32> to vector<64x128xf32>
    %c4_179 = arith.constant 4 : index
    %c0_180 = arith.constant 0 : index
    %c0_181 = arith.constant 0 : index
    %164 = vector.load %arg6[%c4_179, %c0_180, %c0_181] : memref<9x128x128xf32, #tpu.memory_space<vmem>>, vector<1x128x128xf32>
    %165 = vector.shape_cast %164 : vector<1x128x128xf32> to vector<128x128xf32>
    %cst_182 = arith.constant dense<0.000000e+00> : vector<64x128xf32>
    %166 = tpu.matmul %163, %165, %cst_182 {dimension_numbers = #tpu.dot_dimension_numbers<[1], [0], [0], [1], [0, 0, 1, 1], [], []>} : vector<64x128xf32>, vector<128x128xf32>, vector<64x128xf32> -> vector<64x128xf32>
    %167 = arith.addf %161, %166 : vector<64x128xf32>
    %c1_183 = arith.constant 1 : index
    %c2_184 = arith.constant 2 : index
    %c0_185 = arith.constant 0 : index
    %168 = vector.load %arg12[%c1_183, %c2_184, %c0_185] : memref<10x10x128xf32, #tpu.memory_space<vmem>>, vector<8x8x128xf32>
    %169 = vector.shape_cast %168 : vector<8x8x128xf32> to vector<64x128xf32>
    %c5_186 = arith.constant 5 : index
    %c0_187 = arith.constant 0 : index
    %c0_188 = arith.constant 0 : index
    %170 = vector.load %arg6[%c5_186, %c0_187, %c0_188] : memref<9x128x128xf32, #tpu.memory_space<vmem>>, vector<1x128x128xf32>
    %171 = vector.shape_cast %170 : vector<1x128x128xf32> to vector<128x128xf32>
    %cst_189 = arith.constant dense<0.000000e+00> : vector<64x128xf32>
    %172 = tpu.matmul %169, %171, %cst_189 {dimension_numbers = #tpu.dot_dimension_numbers<[1], [0], [0], [1], [0, 0, 1, 1], [], []>} : vector<64x128xf32>, vector<128x128xf32>, vector<64x128xf32> -> vector<64x128xf32>
    %173 = arith.addf %167, %172 : vector<64x128xf32>
    %c2_190 = arith.constant 2 : index
    %c0_191 = arith.constant 0 : index
    %c0_192 = arith.constant 0 : index
    %174 = vector.load %arg12[%c2_190, %c0_191, %c0_192] : memref<10x10x128xf32, #tpu.memory_space<vmem>>, vector<8x8x128xf32>
    %175 = vector.shape_cast %174 : vector<8x8x128xf32> to vector<64x128xf32>
    %c6_193 = arith.constant 6 : index
    %c0_194 = arith.constant 0 : index
    %c0_195 = arith.constant 0 : index
    %176 = vector.load %arg6[%c6_193, %c0_194, %c0_195] : memref<9x128x128xf32, #tpu.memory_space<vmem>>, vector<1x128x128xf32>
    %177 = vector.shape_cast %176 : vector<1x128x128xf32> to vector<128x128xf32>
    %cst_196 = arith.constant dense<0.000000e+00> : vector<64x128xf32>
    %178 = tpu.matmul %175, %177, %cst_196 {dimension_numbers = #tpu.dot_dimension_numbers<[1], [0], [0], [1], [0, 0, 1, 1], [], []>} : vector<64x128xf32>, vector<128x128xf32>, vector<64x128xf32> -> vector<64x128xf32>
    %179 = arith.addf %173, %178 : vector<64x128xf32>
    %c2_197 = arith.constant 2 : index
    %c1_198 = arith.constant 1 : index
    %c0_199 = arith.constant 0 : index
    %180 = vector.load %arg12[%c2_197, %c1_198, %c0_199] : memref<10x10x128xf32, #tpu.memory_space<vmem>>, vector<8x8x128xf32>
    %181 = vector.shape_cast %180 : vector<8x8x128xf32> to vector<64x128xf32>
    %c7_200 = arith.constant 7 : index
    %c0_201 = arith.constant 0 : index
    %c0_202 = arith.constant 0 : index
    %182 = vector.load %arg6[%c7_200, %c0_201, %c0_202] : memref<9x128x128xf32, #tpu.memory_space<vmem>>, vector<1x128x128xf32>
    %183 = vector.shape_cast %182 : vector<1x128x128xf32> to vector<128x128xf32>
    %cst_203 = arith.constant dense<0.000000e+00> : vector<64x128xf32>
    %184 = tpu.matmul %181, %183, %cst_203 {dimension_numbers = #tpu.dot_dimension_numbers<[1], [0], [0], [1], [0, 0, 1, 1], [], []>} : vector<64x128xf32>, vector<128x128xf32>, vector<64x128xf32> -> vector<64x128xf32>
    %185 = arith.addf %179, %184 : vector<64x128xf32>
    %c2_204 = arith.constant 2 : index
    %c2_205 = arith.constant 2 : index
    %c0_206 = arith.constant 0 : index
    %186 = vector.load %arg12[%c2_204, %c2_205, %c0_206] : memref<10x10x128xf32, #tpu.memory_space<vmem>>, vector<8x8x128xf32>
    %187 = vector.shape_cast %186 : vector<8x8x128xf32> to vector<64x128xf32>
    %c8_207 = arith.constant 8 : index
    %c0_208 = arith.constant 0 : index
    %c0_209 = arith.constant 0 : index
    %188 = vector.load %arg6[%c8_207, %c0_208, %c0_209] : memref<9x128x128xf32, #tpu.memory_space<vmem>>, vector<1x128x128xf32>
    %189 = vector.shape_cast %188 : vector<1x128x128xf32> to vector<128x128xf32>
    %cst_210 = arith.constant dense<0.000000e+00> : vector<64x128xf32>
    %190 = tpu.matmul %187, %189, %cst_210 {dimension_numbers = #tpu.dot_dimension_numbers<[1], [0], [0], [1], [0, 0, 1, 1], [], []>} : vector<64x128xf32>, vector<128x128xf32>, vector<64x128xf32> -> vector<64x128xf32>
    %191 = arith.addf %185, %190 : vector<64x128xf32>
    %c0_211 = arith.constant 0 : index
    %c0_212 = arith.constant 0 : index
    %192 = vector.load %arg7[%c0_211, %c0_212] : memref<1x128xf32, #tpu.memory_space<vmem>>, vector<1x128xf32>
    %193 = vector.broadcast %192 : vector<1x128xf32> to vector<64x128xf32>
    %194 = arith.addf %191, %193 : vector<64x128xf32>
    %cst_213 = arith.constant 0.000000e+00 : f32
    %195 = vector.broadcast %cst_213 : f32 to vector<64x128xf32>
    %196 = arith.maximumf %194, %195 : vector<64x128xf32>
    %c3_214 = arith.constant 3 : index
    %c0_215 = arith.constant 0 : index
    %c0_216 = arith.constant 0 : index
    %c0_217 = arith.constant 0 : index
    %197 = vector.load %arg1[%c3_214, %c0_215, %c0_216, %c0_217] : memref<4x9x9x128xf32, #tpu.memory_space<vmem>>, vector<1x8x8x128xf32>
    %198 = vector.shape_cast %197 : vector<1x8x8x128xf32> to vector<8x8x128xf32>
    %199 = vector.shape_cast %198 : vector<8x8x128xf32> to vector<64x128xf32>
    %c0_218 = arith.constant 0 : index
    %c0_219 = arith.constant 0 : index
    %200 = vector.load %arg8[%c0_218, %c0_219] : memref<128x128xf32, #tpu.memory_space<vmem>>, vector<128x128xf32>
    %cst_220 = arith.constant dense<0.000000e+00> : vector<64x128xf32>
    %201 = tpu.matmul %199, %200, %cst_220 {dimension_numbers = #tpu.dot_dimension_numbers<[1], [0], [0], [1], [0, 0, 1, 1], [], []>} : vector<64x128xf32>, vector<128x128xf32>, vector<64x128xf32> -> vector<64x128xf32>
    %c0_221 = arith.constant 0 : index
    %c0_222 = arith.constant 0 : index
    %202 = vector.load %arg9[%c0_221, %c0_222] : memref<1x128xf32, #tpu.memory_space<vmem>>, vector<1x128xf32>
    %203 = vector.broadcast %202 : vector<1x128xf32> to vector<64x128xf32>
    %204 = arith.addf %201, %203 : vector<64x128xf32>
    %205 = arith.addf %196, %204 : vector<64x128xf32>
    %cst_223 = arith.constant 0.000000e+00 : f32
    %206 = vector.broadcast %cst_223 : f32 to vector<64x128xf32>
    %207 = arith.maximumf %205, %206 : vector<64x128xf32>
    %208 = vector.shape_cast %207 : vector<64x128xf32> to vector<1x8x8x128xf32>
    %c0_224 = arith.constant 0 : index
    %c0_225 = arith.constant 0 : index
    %c0_226 = arith.constant 0 : index
    %c0_227 = arith.constant 0 : index
    %209 = vector.load %arg10[%c0_224, %c0_225, %c0_226, %c0_227] : memref<1x8x8x128xf32, #tpu.memory_space<vmem>>, vector<1x8x8x128xf32>
    tpu.vector_store %arg10[%c0_224, %c0_225, %c0_226, %c0_227], %208 {strides = array<i32>} : memref<1x8x8x128xf32, #tpu.memory_space<vmem>>, vector<1x8x8x128xf32>,
    return
  }
  func.func @transform_0(%arg0: i32) -> (i32, i32, i32, i32) {
    %c0_i32 = arith.constant 0 : i32
    %c0_i32_0 = arith.constant 0 : i32
    %c0_i32_1 = arith.constant 0 : i32
    %c0_i32_2 = arith.constant 0 : i32
    return %arg0, %c0_i32, %c0_i32_0, %c0_i32_1 : i32, i32, i32, i32
  }
  func.func @transform_1(%arg0: i32) -> (i32, i32, i32) {
    %c0_i32 = arith.constant 0 : i32
    %c0_i32_0 = arith.constant 0 : i32
    %c0_i32_1 = arith.constant 0 : i32
    %c0_i32_2 = arith.constant 0 : i32
    return %c0_i32, %c0_i32_0, %c0_i32_1 : i32, i32, i32
  }
  func.func @transform_2(%arg0: i32) -> (i32, i32) {
    %c0_i32 = arith.constant 0 : i32
    %c0_i32_0 = arith.constant 0 : i32
    %c0_i32_1 = arith.constant 0 : i32
    return %c0_i32, %c0_i32_0 : i32, i32
  }
  func.func @transform_3(%arg0: i32) -> (i32, i32, i32) {
    %c0_i32 = arith.constant 0 : i32
    %c0_i32_0 = arith.constant 0 : i32
    %c0_i32_1 = arith.constant 0 : i32
    %c0_i32_2 = arith.constant 0 : i32
    return %c0_i32, %c0_i32_0, %c0_i32_1 : i32, i32, i32
  }
  func.func @transform_4(%arg0: i32) -> (i32, i32) {
    %c0_i32 = arith.constant 0 : i32
    %c0_i32_0 = arith.constant 0 : i32
    %c0_i32_1 = arith.constant 0 : i32
    return %c0_i32, %c0_i32_0 : i32, i32
  }
  func.func @transform_5(%arg0: i32) -> (i32, i32, i32) {
    %c0_i32 = arith.constant 0 : i32
    %c0_i32_0 = arith.constant 0 : i32
    %c0_i32_1 = arith.constant 0 : i32
    %c0_i32_2 = arith.constant 0 : i32
    return %c0_i32, %c0_i32_0, %c0_i32_1 : i32, i32, i32
  }
  func.func @transform_6(%arg0: i32) -> (i32, i32) {
    %c0_i32 = arith.constant 0 : i32
    %c0_i32_0 = arith.constant 0 : i32
    %c0_i32_1 = arith.constant 0 : i32
    return %c0_i32, %c0_i32_0 : i32, i32
  }
  func.func @transform_7(%arg0: i32) -> (i32, i32) {
    %c0_i32 = arith.constant 0 : i32
    %c0_i32_0 = arith.constant 0 : i32
    %c0_i32_1 = arith.constant 0 : i32
    return %c0_i32, %c0_i32_0 : i32, i32
  }
  func.func @transform_8(%arg0: i32) -> (i32, i32) {
    %c0_i32 = arith.constant 0 : i32
    %c0_i32_0 = arith.constant 0 : i32
    %c0_i32_1 = arith.constant 0 : i32
    return %c0_i32, %c0_i32_0 : i32, i32
  }
  func.func @transform_9(%arg0: i32) -> (i32, i32, i32, i32) {
    %c0_i32 = arith.constant 0 : i32
    %c0_i32_0 = arith.constant 0 : i32
    %c0_i32_1 = arith.constant 0 : i32
    %c0_i32_2 = arith.constant 0 : i32
    return %arg0, %c0_i32, %c0_i32_0, %c0_i32_1 : i32, i32, i32, i32
  }
}

</mosaic_0001>

<bundles_post_ra>
// kernel: tpu_custom_call.1
= control target key start
LH: loop header
LB: loop body
LE: loop exit
PB: predicated region body
PF: predicated region fallthrough
CT: control target
= control target key end

     0   :  { %14 = vsyncpa [#allocation5], 0  ;;  %s9010_s0 = inlined_call_operand.vmem [shape: f32[8,9,9,128], index: 0, kind: input, shape index: {}]   ;;  %s9011_s1 = inlined_call_operand.vmem [shape: f32[9,128,128], index: 1, kind: input, shape index: {}]   ;;  %s9012_s2 = inlined_call_operand.vmem [shape: f32[1,128], index: 2, kind: input, shape index: {}]   ;;  %s9013_s3 = inlined_call_operand.hbm [shape: f32[9,128,128], index: 3, kind: input, shape index: {}]   ;;  %s9014_s4 = inlined_call_operand.vmem [shape: f32[1,128], index: 4, kind: input, shape index: {}]   ;;  %s9015_s5 = inlined_call_operand.hbm [shape: f32[9,128,128], index: 5, kind: input, shape index: {}]   ;;  %s9016_s6 = inlined_call_operand.vmem [shape: f32[1,128], index: 6, kind: input, shape index: {}]   ;;  %s9017_s7 = inlined_call_operand.vmem [shape: f32[128,128], index: 7, kind: input, shape index: {}]   ;;  %s9018_s8 = inlined_call_operand.vmem [shape: f32[1,128], index: 8, kind: input, shape index: {}]   ;;  %s9019_s9 = inlined_call_operand.hbm [shape: f32[2,8,8,128], index: 9, kind: output, shape index: {}]  }
   0x1   :  { %15 = vsyncpa [#allocation8], 0 }
   0x2   :  { %16 = vsyncpa [#allocation6], 0 }
   0x3   :  { %18 = vsyncpa [#allocation6 + $0x1], 0  ;;  %s7891_s30 = smov 0   ;;  %s7893_s10 = smov 0  }
   0x4   :  { %s7895_s11 = smov 0   ;;  %s7897_s12 = smov 0  }
   0x5 LB: > { %9026 = sst [smem:[#allocation13_spill]] %s7827_s11  ;;  %s7912_s13 = sadd.s32 4294967295, %s7831_s12   ;;  %s7831_s12 = sphi %s7897_s12, %s9040_s12   ;;  %s7827_s11 = sphi %s7895_s11, %s9042_s11   ;;  %s7823_s10 = sphi %s7893_s10, %s9044_s10   ;;  %s7819_s30 = sphi %s7891_s30, %s9043_s30  }
   0x6   : > { %s4433_s14 = sadd.s32 4294967294, %s7831_s12   ;;  %s7916_s15 = sadd.s32 1, %s7831_s12  }
   0x7   : > { %9027 = sst [smem:[#allocation14_spill]] %s7916_s15  ;;  %s225_s16 = sadd.s32 1, %s7827_s11 }
   0x8   : > { %s222_s17 = ssub.s32 %s7831_s12, %s7916_s15  ;;  %p235_p0 = scmp.ne.s32.totalorder %s7827_s11, %s7823_s10 }
   0x9   : > { %p223_p1 = scmp.eq.s32.totalorder %s222_s17, 0  ;;  %p236_p2 = scmp.eq.s32.totalorder %s7912_s13, 1 }
   0xa   : > { %p241_p3 = scmp.ne.s32.totalorder %s7823_s10, %s7819_s30  ;;  %p242_p4 = scmp.eq.s32.totalorder %s4433_s14, 1 }
   0xb   : > { %s7927_s18 = scalar_select %p223_p1, %s7827_s11, %s225_s16  }
   0xc   : > { %p7929_p5 = por %p236_p2, %p235_p0  ;;  %p7933_p6 = por %p242_p4, %p241_p3 }
   0xd   : > { %9028 = sst [smem:[#allocation15_spill]] %s7927_s18  ;;  %p4434_p7 = scmp.ge.s32.totalorder %s7831_s12, 1 }
   0xe   : > { %s9029_s19 = scalar_select %p7929_p5, 1, 0 }
   0xf   : > { %s9030_s20 = scalar_select %p7933_p6, 1, 0 }
  0x10   : > { %p249_p8 = scmp.lt.s32.totalorder %s7831_s12, 3  ;;  %p9020_p9 = scmp.eq.s32.totalorder %s7912_s13, 0 }
  0x11   : > { %s7833_s22 = smov [#allocation4]   ;;  %s7834_s25 = smov [#allocation7]  }
  0x12   : > { %p7940_p10 = pnand %p4434_p7, %p249_p8  ;;  %s267_s23 = sshll.u32 %s7833_s22, 4  ;;  %s268_s23 = int_to_ptr.vmem [resolvable:$true] %s267_s23 }
  0x13   : > { %s283_s26 = sshll.u32 %s7834_s25, 4  ;;  %s7705_s29 = scalar_lea.hbm %s9013_s3, 18432  ;;  %s7952_s26 = int_to_ptr.vmem [resolvable:$true] %s283_s26 }
  0x14   : > { %s9031_s21 = scalar_select %p7940_p10, 1, 0 }
  0x15   : > { %p7649_p11 = pneg %p7940_p10  ;;  %p7706_p13 = scmp.ne.s32.totalorder %s9013_s3, %s7705_s29 }
  0x16   : > { %p7712_p3 = scmp.lt.u32.totalorder %s7705_s29, %s9013_s3 }
  0x17   : > { %p7948_p12 = pnand %p9020_p9, %p7649_p11 }
  0x19   : > { %p7707_p0 = pneg %p7948_p12 }
  0x1b   : > { %p7708_p1 = pnand %p7707_p0, %p7706_p13 }
  0x1d   : > { %p7709_p2 = pneg %p7708_p1 }
  0x1f   : > { %p7714_p4 = pnand %p7712_p3, %p7709_p2 }
  0x21   : > { %7717 = shalt.err (!%p7714_p4)
}
  0x22   : > { %s7718_s25 = scalar_lea.vmem %s268_s23, 18432  ;;  %p7726_p9 = scmp.lt.s32.totalorder %s268_s23, %s268_s23 }
  0x23   : > { %p7719_p7 = scmp.ne.s32.totalorder %s268_s23, %s7718_s25  ;;  %p7727_p6 = scmp.lt.s32.totalorder %s7718_s25, %s7718_s25 }
  0x25   : > { %p7721_p8 = pnand %p7719_p7, %p7707_p0  ;;  %p7728_p5 = por %p7727_p6, %p7726_p9 }
  0x27   : > { %p7722_p11 = pneg %p7721_p8 }
  0x29   : > { %p7729_p10 = pnand %p7728_p5, %p7722_p11 }
  0x2b   : > { %7732 = shalt.err (!%p7729_p10)
}
  0x2c   : > { %s7835_s27 = smov 128   ;;  %s7836_s28 = smov 8  }
  0x2d   : > { %7652 = dma.hbm_to_vmem [thread:$0]  (!%p7948_p12), %s9013_s3, 18432, %s268_s23, [#allocation5], %s7835_s27, %s7835_s27, %s7836_s28  }
  0x2e   : > { %s7733_s22 = scalar_lea.hbm %s9015_s5, 18432 }
  0x2f   : > { %p7734_p13 = scmp.ne.s32.totalorder %s9015_s5, %s7733_s22  ;;  %p7740_p9 = scmp.lt.u32.totalorder %s7733_s22, %s9015_s5 }
  0x31   : > { %p7736_p5 = pnand %p7734_p13, %p7707_p0 }
  0x33   : > { %p7737_p6 = pneg %p7736_p5 }
  0x35   : > { %p7742_p10 = pnand %p7740_p9, %p7737_p6 }
  0x37   : > { %7745 = shalt.err (!%p7742_p10)
}
  0x38   : > { %s7746_s23 = scalar_lea.vmem %s7952_s26, 18432  ;;  %p7754_p4 = scmp.lt.s32.totalorder %s7952_s26, %s7952_s26 }
  0x39   : > { %p7747_p1 = scmp.ne.s32.totalorder %s7952_s26, %s7746_s23  ;;  %p7755_p7 = scmp.lt.s32.totalorder %s7746_s23, %s7746_s23 }
  0x3b   : > { %p7749_p2 = pnand %p7747_p1, %p7707_p0  ;;  %p7756_p8 = por %p7755_p7, %p7754_p4 }
  0x3d   : > { %p7750_p3 = pneg %p7749_p2 }
  0x3f   : > { %p7757_p11 = pnand %p7756_p8, %p7750_p3 }
  0x41   : > { %7760 = shalt.err (!%p7757_p11)
}
  0x42   : > { %7655 = dma.hbm_to_vmem [thread:$0]  (!%p7948_p12), %s9015_s5, 18432, %s7952_s26, [#allocation8], %s7835_s27, %s7835_s27, %s7836_s28  }
  0x43   : > { %p9033_p13 = scmp.ne.s32.totalorder %s9031_s21, 0 }
  0x44   : > { %p9034_p5 = scmp.eq.s32.totalorder (!%p9033_p13), %s7912_s13, 0 }
  0x45   : > { %318 = sbr.rel (%p9033_p13) target bundleno = 1441 (0x5a1), region = 56 }
  0x4c   : > { %7806 = dma.done.wait (%p9034_p5), [#allocation5], 18432   ;;  %p9035_p0 = pmov %p9034_p5 }
  0x4e   : > { %7808 = vsyncadd (%p9035_p0), [#allocation5], 4294948864  ;;  %p9036_p6 = pmov %p9035_p0 }
  0x4f   : > { %p9037_p9 = pmov %p9035_p0 }
  0x50   : > { %7810 = dma.done.wait (%p9036_p6), [#allocation8], 18432  }
  0x51   : > { %7812 = vsyncadd (%p9037_p9), [#allocation8], 4294948864  ;;  %s4442_s18 = sshll.u32 %s7912_s13, 2  ;;  %v4452_v0 = vld [vmem:[%s9011_s1 + $0x80] sm:$0xff]  ;;  %v4453_v1 = vld [vmem:[%s9011_s1 + $0x88] sm:$0xff]  ;;  %s356_s17 = sand.u32 1, %s7823_s10  }
  0x52   : > { %p360_p10 = scmp.lt.s32.totalorder %s4442_s18, 7  ;;  %v4516_v2 = vld [vmem:[%s9011_s1 + $0x200] sm:$0xff]  ;;  %v6550_v3 = vpack.c.bf16 %v4453_v1, %v4452_v0  ;;  %v4517_v4 = vld [vmem:[%s9011_s1 + $0x208] sm:$0xff]  ;;  %v4454_v5 = vld [vmem:[%s9011_s1 + $0x90] sm:$0xff]  ;;  %s4441_s22 = sshll.u32 %s356_s17, 6 }
  0x53   : > { %v4455_v6 = vld [vmem:[%s9011_s1 + $0x98] sm:$0xff]  ;;  %v6678_v7 = vpack.c.bf16 %v4517_v4, %v4516_v2  ;;  %v4518_v9 = vld [vmem:[%s9011_s1 + $0x210] sm:$0xff]  ;;  %v4456_v11 = vld [vmem:[%s9011_s1 + $0xa0] sm:$0xff]  ;;  %s8948_s23 = scalar_lea.vmem [#allocation9], %s4441_s22  ;;  %p9038_p1 = scmp.ne.s32.totalorder %s9029_s19, 0 }
  0x54   : > { %s9046_s18 = smov (!%p360_p10, %s4442_s18), 7  ;;  %v6554_v8 = vpack.c.bf16 %v4455_v6, %v4454_v5  ;;  %v4519_v10 = vld [vmem:[%s9011_s1 + $0x218] sm:$0xff]  ;;  %6551 = vmatprep.subr.bf16.mxu1 %v6550_v3  ;;  %v4457_v13 = vld [vmem:[%s9011_s1 + $0xa8] sm:$0xff]  ;;  %v4520_v14 = vld [vmem:[%s9011_s1 + $0x220] sm:$0xff]  ;;  %s4349_s11 = sshll.u32 %s8948_s23, 4  ;;  %s8958_s11 = int_to_ptr.vmem [resolvable:$true] %s4349_s11 }
  0x55   : > { %v6682_v12 = vpack.c.bf16 %v4519_v10, %v4518_v9  ;;  %v4521_v15 = vld [vmem:[%s9011_s1 + $0x228] sm:$0xff]  ;;  %s7638_s25 = smul.u32 144, %s9046_s18  ;;  %6679 = vmatprep.subr.bf16.mxu0 %v6678_v7  ;;  %6553 = vmatpush3.bf16.msra.mxu1 %v6550_v3  ;;  %v6558_v16 = vpack.c.bf16 %v4457_v13, %v4456_v11  ;;  %v4458_v18 = vld [vmem:[%s9011_s1 + $0xb0] sm:$0xff]  ;;  %v4459_v19 = vld [vmem:[%s9011_s1 + $0xb8] sm:$0xff]  ;;  %s7761_s26 = scalar_lea.vmem %s8958_s11, 1024 }
  0x56   : > { %6681 = vmatpush3.bf16.msra.mxu0 %v6678_v7  ;;  %6555 = vmatprep.subr.bf16.mxu1 %v6554_v8  ;;  %v6686_v17 = vpack.c.bf16 %v4521_v15, %v4520_v14  ;;  %v4522_v20 = vld [vmem:[%s9011_s1 + $0x230] sm:$0xff]  ;;  %v4523_v21 = vld [vmem:[%s9011_s1 + $0x238] sm:$0xff]  ;;  %v6562_v22 = vpack.c.bf16 %v4459_v19, %v4458_v18  ;;  %v4460_v24 = vld [vmem:[%s9011_s1 + $0xc0] sm:$0xff]  ;;  %p7762_p12 = scmp.ne.s32.totalorder %s8958_s11, %s7761_s26  ;;  %s7838_s18 = smov [#allocation9]  }
  0x57   : > { %6683 = vmatprep.subr.bf16.mxu0 %v6682_v12  ;;  %s8066_s14 = scalar_lea.vmem %s9010_s0, %s7638_s25  ;;  %v6690_v23 = vpack.c.bf16 %v4523_v21, %v4522_v20  ;;  %v4461_v25 = vld [vmem:[%s9011_s1 + $0xc8] sm:$0xff]  ;;  %v4524_v27 = vld [vmem:[%s9011_s1 + $0x240] sm:$0xff]  ;;  %v4462_v32 = vld [vmem:[%s9011_s1 + $0xd0] sm:$0xff]  ;;  %s4645_s25 = sshll.u32 %s7912_s13, 10 }
  0x58   : > { %v4444_v26 = vld [vmem:[%s8066_s14 + $0x90] sm:$0xff]  ;;  %v4525_v28 = vld [vmem:[%s9011_s1 + $0x248] sm:$0xff]  ;;  %v6566_v30 = vpack.c.bf16 %v4461_v25, %v4460_v24  ;;  %v4463_v33 = vld [vmem:[%s9011_s1 + $0xd8] sm:$0xff]  ;;  %s8963_s21 = scalar_lea.hbm %s9019_s9, %s4645_s25  ;;  %s8969_s13 = scalar_lea.sflag [#allocation6], %s356_s17 }
  0x59   : > { %6557 = vmatpush3.bf16.msra.mxu1 %v6554_v8  ;;  %5350 = vmatprep.mubr.f32.mxu1 %v4444_v26  ;;  %v4508_v29 = vld [vmem:[%s8066_s14 + $0x1b0] sm:$0xff]  ;;  %v6694_v31 = vpack.c.bf16 %v4525_v28, %v4524_v27  ;;  %v4527_v35 = vld [vmem:[%s9011_s1 + $0x258] sm:$0xff]  ;;  %v6570_v36 = vpack.c.bf16 %v4463_v33, %v4462_v32  ;;  %v4464_v38 = vld [vmem:[%s9011_s1 + $0xe0] sm:$0xff]  ;;  %p7763_p2 = pnand %p7762_p12, %p9038_p1  ;;  %s7765_s27 = sshll.u32 %s7838_s18, 4  ;;  %s7766_s27 = int_to_ptr.vmem [resolvable:$false] %s7765_s27 }
  0x5a   : > { %6685 = vmatpush3.bf16.msra.mxu0 %v6682_v12  ;;  %6559 = vmatprep.subr.bf16.mxu1 %v6558_v16  ;;  %v4526_v34 = vld [vmem:[%s9011_s1 + $0x250] sm:$0xff]  ;;  %v4465_v39 = vld [vmem:[%s9011_s1 + $0xe8] sm:$0xff]  ;;  %v4528_v40 = vld [vmem:[%s9011_s1 + $0x260] sm:$0xff]  ;;  %p7768_p4 = scmp.lt.s32.totalorder %s8958_s11, %s7766_s27 }
  0x5b   : > { %6687 = vmatprep.subr.bf16.mxu0 %v6686_v17  ;;  %5526 = vmatprep.mubr.f32.mxu0 %v4508_v29  ;;  %v6698_v37 = vpack.c.bf16 %v4527_v35, %v4526_v34  ;;  %v4529_v41 = vld [vmem:[%s9011_s1 + $0x268] sm:$0xff]  ;;  %v6574_v42 = vpack.c.bf16 %v4465_v39, %v4464_v38  ;;  %v4466_v44 = vld [vmem:[%s9011_s1 + $0xf0] sm:$0xff]  ;;  %v4467_v45 = vld [vmem:[%s9011_s1 + $0xf8] sm:$0xff]  ;;  %p7764_p3 = pneg %p7763_p2 }
  0x5c   : > { %v6702_v43 = vpack.c.bf16 %v4529_v41, %v4528_v40  ;;  %v4530_v46 = vld [vmem:[%s9011_s1 + $0x270] sm:$0xff]  ;;  %v4531_v47 = vld [vmem:[%s9011_s1 + $0x278] sm:$0xff]  ;;  %v6578_v48 = vpack.c.bf16 %v4467_v45, %v4466_v44  ;;  %v414_v50 = vld [vmem:[%s9011_s1] sm:$0xff] }
  0x5d   : > { %6561 = vmatpush3.bf16.msra.mxu1 %v6558_v16  ;;  %v6706_v49 = vpack.c.bf16 %v4531_v47, %v4530_v46  ;;  %v415_v51 = vld [vmem:[%s9011_s1 + $0x8] sm:$0xff]  ;;  %v4540_v52 = vld [vmem:[%s9011_s1 + $0x280] sm:$0xff]  ;;  %v416_v56 = vld [vmem:[%s9011_s1 + $0x10] sm:$0xff] }
  0x5e   : > { %6689 = vmatpush3.bf16.msra.mxu0 %v6686_v17  ;;  %6563 = vmatprep.subr.bf16.mxu1 %v6562_v22  ;;  %v4541_v53 = vld [vmem:[%s9011_s1 + $0x288] sm:$0xff]  ;;  %v6582_v54 = vpack.c.bf16 %v415_v51, %v414_v50  ;;  %v417_v57 = vld [vmem:[%s9011_s1 + $0x18] sm:$0xff]  ;;  %v4542_v58 = vld [vmem:[%s9011_s1 + $0x290] sm:$0xff] }
  0x5f   : > { %6691 = vmatprep.subr.bf16.mxu0 %v6690_v23  ;;  %v6710_v55 = vpack.c.bf16 %v4541_v53, %v4540_v52  ;;  %v4543_v59 = vld [vmem:[%s9011_s1 + $0x298] sm:$0xff]  ;;  %v8143_v60 = vld [vmem:[%s8066_s14 + $0xa0] sm:$0xff]  ;;  %v6586_v62 = vpack.c.bf16 %v417_v57, %v416_v56  ;;  %v419_v1 = vld [vmem:[%s9011_s1 + $0x28] sm:$0xff] }
  0x60   : > { %v4509_v61 = vld [vmem:[%s8066_s14 + $0x1c0] sm:$0xff]  ;;  %v6714_v63 = vpack.c.bf16 %v4543_v59, %v4542_v58  ;;  %v4545_v3 = vld [vmem:[%s9011_s1 + $0x2a8] sm:$0xff]  ;;  %v8160_v4 = vld [vmem:[%s8066_s14 + $0xb0] sm:$0xff] }
  0x61   : > { %6565 = vmatpush3.bf16.msra.mxu1 %v6562_v22  ;;  %v418_v0 = vld [vmem:[%s9011_s1 + $0x20] sm:$0xff]  ;;  %v4510_v5 = vld [vmem:[%s8066_s14 + $0x1d0] sm:$0xff]  ;;  %v421_v11 = vld [vmem:[%s9011_s1 + $0x38] sm:$0xff] }
  0x62   : > { %6693 = vmatpush3.bf16.msra.mxu0 %v6690_v23  ;;  %6567 = vmatprep.subr.bf16.mxu1 %v6566_v30  ;;  %v4544_v2 = vld [vmem:[%s9011_s1 + $0x2a0] sm:$0xff]  ;;  %v6590_v7 = vpack.c.bf16 %v419_v1, %v418_v0  ;;  %v420_v10 = vld [vmem:[%s9011_s1 + $0x30] sm:$0xff]  ;;  %v4547_v13 = vld [vmem:[%s9011_s1 + $0x2b8] sm:$0xff] }
  0x63   : > { %6695 = vmatprep.subr.bf16.mxu0 %v6694_v31  ;;  %v8164_v6 = vld [vmem:[%s8066_s14 + $0xc0] sm:$0xff]  ;;  %v6718_v9 = vpack.c.bf16 %v4545_v3, %v4544_v2  ;;  %v4546_v12 = vld [vmem:[%s9011_s1 + $0x2b0] sm:$0xff]  ;;  %v6594_v17 = vpack.c.bf16 %v421_v11, %v420_v10  ;;  %v423_v21 = vld [vmem:[%s9011_s1 + $0x48] sm:$0xff] }
  0x64   : > { %v4511_v8 = vld [vmem:[%s8066_s14 + $0x1e0] sm:$0xff]  ;;  %v8182_v14 = vld [vmem:[%s8066_s14 + $0xd0] sm:$0xff]  ;;  %v6722_v19 = vpack.c.bf16 %v4547_v13, %v4546_v12  ;;  %v4549_v23 = vld [vmem:[%s9011_s1 + $0x2c8] sm:$0xff] }
  0x65   : > { %6569 = vmatpush3.bf16.msra.mxu1 %v6566_v30  ;;  %v4512_v15 = vld [vmem:[%s8066_s14 + $0x1f0] sm:$0xff]  ;;  %v8186_v16 = vld [vmem:[%s8066_s14 + $0xe0] sm:$0xff]  ;;  %v4551_v33 = vld [vmem:[%s9011_s1 + $0x2d8] sm:$0xff] }
  0x66   : > { %6697 = vmatpush3.bf16.msra.mxu0 %v6694_v31  ;;  %6571 = vmatprep.subr.bf16.mxu1 %v6570_v36  ;;  %v4513_v18 = vld [vmem:[%s8066_s14 + $0x200] sm:$0xff]  ;;  %v8204_v24 = vld [vmem:[%s8066_s14 + $0xf0] sm:$0xff]  ;;  %v425_v31 = vld [vmem:[%s9011_s1 + $0x58] sm:$0xff] }
  0x67   : > { %6699 = vmatprep.subr.bf16.mxu0 %v6698_v37  ;;  %v422_v20 = vld [vmem:[%s9011_s1 + $0x40] sm:$0xff]  ;;  %v4514_v25 = vld [vmem:[%s8066_s14 + $0x210] sm:$0xff]  ;;  %v427_v39 = vld [vmem:[%s9011_s1 + $0x68] sm:$0xff] }
  0x68   : > { %v4548_v22 = vld [vmem:[%s9011_s1 + $0x2c0] sm:$0xff]  ;;  %v6598_v27 = vpack.c.bf16 %v423_v21, %v422_v20  ;;  %v424_v30 = vld [vmem:[%s9011_s1 + $0x50] sm:$0xff]  ;;  %v4553_v41 = vld [vmem:[%s9011_s1 + $0x2e8] sm:$0xff] }
  0x69   : > { %6573 = vmatpush3.bf16.msra.mxu1 %v6570_v36  ;;  %v8208_v26 = vld [vmem:[%s8066_s14 + $0x100] sm:$0xff]  ;;  %v6726_v29 = vpack.c.bf16 %v4549_v23, %v4548_v22  ;;  %v4550_v32 = vld [vmem:[%s9011_s1 + $0x2d0] sm:$0xff]  ;;  %v6602_v36 = vpack.c.bf16 %v425_v31, %v424_v30  ;;  %v429_v45 = vld [vmem:[%s9011_s1 + $0x78] sm:$0xff] }
  0x6a   : > { %6701 = vmatpush3.bf16.msra.mxu0 %v6698_v37  ;;  %6575 = vmatprep.subr.bf16.mxu1 %v6574_v42  ;;  %v4515_v28 = vld [vmem:[%s8066_s14 + $0x220] sm:$0xff]  ;;  %v6730_v37 = vpack.c.bf16 %v4551_v33, %v4550_v32  ;;  %v428_v44 = vld [vmem:[%s9011_s1 + $0x70] sm:$0xff]  ;;  %v4555_v47 = vld [vmem:[%s9011_s1 + $0x2f8] sm:$0xff] }
  0x6b   : > { %6703 = vmatprep.subr.bf16.mxu0 %v6702_v43  ;;  %v406_v34 = vld [vmem:[%s8066_s14] sm:$0xff]  ;;  %v4554_v46 = vld [vmem:[%s9011_s1 + $0x2f0] sm:$0xff]  ;;  %v4469_v51 = vld [vmem:[%s9011_s1 + $0x108] sm:$0xff] }
  0x6c   : > { %v4532_v35 = vld [vmem:[%s8066_s14 + $0x121] sm:$0xff]  ;;  %v4470_v56 = vld [vmem:[%s9011_s1 + $0x110] sm:$0xff]  ;;  %v4471_v57 = vld [vmem:[%s9011_s1 + $0x118] sm:$0xff] }
  0x6d   : > { %6577 = vmatpush3.bf16.msra.mxu1 %v6574_v42  ;;  %v426_v38 = vld [vmem:[%s9011_s1 + $0x60] sm:$0xff]  ;;  %v4565_v53 = vld [vmem:[%s9011_s1 + $0x308] sm:$0xff]  ;;  %v4566_v58 = vld [vmem:[%s9011_s1 + $0x310] sm:$0xff] }
  0x6e   : > { %6705 = vmatpush3.bf16.msra.mxu0 %v6702_v43  ;;  %6579 = vmatprep.subr.bf16.mxu1 %v6578_v48  ;;  %v4552_v40 = vld [vmem:[%s9011_s1 + $0x2e0] sm:$0xff]  ;;  %v6606_v42 = vpack.c.bf16 %v427_v39, %v426_v38  ;;  %v4567_v59 = vld [vmem:[%s9011_s1 + $0x318] sm:$0xff]  ;;  %v4473_v2 = vld [vmem:[%s9011_s1 + $0x128] sm:$0xff] }
  0x6f   : > { %6707 = vmatprep.subr.bf16.mxu0 %v6706_v49  ;;  %v6734_v43 = vpack.c.bf16 %v4553_v41, %v4552_v40  ;;  %v4468_v50 = vld [vmem:[%s9011_s1 + $0x100] sm:$0xff]  ;;  %v6746_v0 = vpack.c.bf16 %v4567_v59, %v4566_v58  ;;  %v4535_v11 = vld [vmem:[%s8066_s14 + $0x151] sm:$0xff]  ;;  %v4573_v30 = vld [vmem:[%s9011_s1 + $0x348] sm:$0xff] }
  0x70   : > { %v4564_v52 = vld [vmem:[%s9011_s1 + $0x300] sm:$0xff]  ;;  %v4474_v13 = vld [vmem:[%s9011_s1 + $0x130] sm:$0xff]  ;;  %v4479_v38 = vld [vmem:[%s9011_s1 + $0x158] sm:$0xff] }
  0x71   : > { %6581 = vmatpush3.bf16.msra.mxu1 %v6578_v48  ;;  %v6610_v48 = vpack.c.bf16 %v429_v45, %v428_v44  ;;  %v4472_v1 = vld [vmem:[%s9011_s1 + $0x120] sm:$0xff]  ;;  %v8319_v21 = vld [vmem:[%s8066_s14 + $0x50] sm:$0xff]  ;;  %v4575_v40 = vld [vmem:[%s9011_s1 + $0x358] sm:$0xff] }
  0x72   : > { %6709 = vmatpush3.bf16.msra.mxu0 %v6706_v49  ;;  %6583 = vmatprep.subr.bf16.mxu1 %v6582_v54  ;;  %v6738_v49 = vpack.c.bf16 %v4555_v47, %v4554_v46  ;;  %v4568_v3 = vld [vmem:[%s9011_s1 + $0x320] sm:$0xff]  ;;  %v6622_v10 = vpack.c.bf16 %v4473_v2, %v4472_v1  ;;  %v4537_v23 = vld [vmem:[%s8066_s14 + $0x171] sm:$0xff]  ;;  %v4481_v45 = vld [vmem:[%s9011_s1 + $0x168] sm:$0xff] }
  0x73   : > { %6711 = vmatprep.subr.bf16.mxu0 %v6710_v55  ;;  %v4536_v20 = vld [vmem:[%s8066_s14 + $0x161] sm:$0xff]  ;;  %v8341_v33 = vld [vmem:[%s8066_s14 + $0x70] sm:$0xff]  ;;  %v4591_v2 = vld [vmem:[%s9011_s1 + $0x398] sm:$0xff] }
  0x74   : > { %5351 = vmatmul.mubr.f32.vlgmr.msra.gmra.mrb[0].mxu1 %v8143_v60  ;;  %v8337_v31 = vld [vmem:[%s8066_s14 + $0x60] sm:$0xff]  ;;  %v4574_v39 = vld [vmem:[%s9011_s1 + $0x350] sm:$0xff]  ;;  %v4577_v47 = vld [vmem:[%s9011_s1 + $0x368] sm:$0xff] }
  0x75   : > { %6585 = vmatpush3.bf16.msra.mxu1 %v6582_v54  ;;  %5527 = vmatmul.mubr.f32.vlgmr.msra.gmra.mrb[0].mxu0 %v4509_v61  ;;  %v6614_v54 = vpack.c.bf16 %v4469_v51, %v4468_v50  ;;  %v8276_v61 = vld [vmem:[%s8066_s14 + $0x10] sm:$0xff]  ;;  %v4538_v32 = vld [vmem:[%s8066_s14 + $0x181] sm:$0xff]  ;;  %v4483_v51 = vld [vmem:[%s9011_s1 + $0x178] sm:$0xff] }
  0x76   : > { %6713 = vmatpush3.bf16.msra.mxu0 %v6710_v55  ;;  %6587 = vmatprep.subr.bf16.mxu1 %v6586_v62  ;;  %v6742_v55 = vpack.c.bf16 %v4565_v53, %v4564_v52  ;;  %v666_v41 = vld [vmem:[%s8066_s14 + $0x1] sm:$0xff]  ;;  %v4482_v50 = vld [vmem:[%s9011_s1 + $0x170] sm:$0xff]  ;;  %v4579_v53 = vld [vmem:[%s9011_s1 + $0x378] sm:$0xff] }
  0x77   : > { %6715 = vmatprep.subr.bf16.mxu0 %v6714_v63  ;;  %5353 = vmatprep.mubr.f32.mxu1 %v8160_v4  ;;  %v4480_v44 = vld [vmem:[%s9011_s1 + $0x160] sm:$0xff]  ;;  %v4578_v52 = vld [vmem:[%s9011_s1 + $0x370] sm:$0xff]  ;;  %v4589_v59 = vld [vmem:[%s9011_s1 + $0x388] sm:$0xff] }
  0x78   : > { %5529 = vmatprep.mubr.f32.mxu0 %v4510_v5  ;;  %5354 = vmatmul.mubr.f32.gmra.mrb[2].mxu1 %v8164_v6  ;;  %v4569_v5 = vld [vmem:[%s9011_s1 + $0x328] sm:$0xff]  ;;  %v4576_v46 = vld [vmem:[%s9011_s1 + $0x360] sm:$0xff]  ;;  %v4590_v1 = vld [vmem:[%s9011_s1 + $0x390] sm:$0xff] }
  0x79   : > { %6589 = vmatpush3.bf16.msra.mxu1 %v6586_v62  ;;  %5530 = vmatmul.mubr.f32.gmra.mrb[2].mxu0 %v4511_v8  ;;  %v4533_v62 = vld [vmem:[%s8066_s14 + $0x131] sm:$0xff]  ;;  %v4534_v8 = vld [vmem:[%s8066_s14 + $0x141] sm:$0xff]  ;;  %v6750_v12 = vpack.c.bf16 %v4569_v5, %v4568_v3 }
  0x7a   : > { %6717 = vmatpush3.bf16.msra.mxu0 %v6714_v63  ;;  %6591 = vmatprep.subr.bf16.mxu1 %v6590_v7  ;;  %v6618_v63 = vpack.c.bf16 %v4471_v57, %v4470_v56  ;;  %v4492_v56 = vld [vmem:[%s9011_s1 + $0x180] sm:$0xff]  ;;  %v4493_v57 = vld [vmem:[%s9011_s1 + $0x188] sm:$0xff]  ;;  %v8409_v3 = vld [vmem:[%s8066_s14 + $0x11] sm:$0xff] }
  0x7b   : > { %6719 = vmatprep.subr.bf16.mxu0 %v6718_v9  ;;  %5356 = vmatprep.mubr.f32.mxu1 %v8182_v14  ;;  %v4588_v58 = vld [vmem:[%s9011_s1 + $0x380] sm:$0xff] }
  0x7c   : > { %5532 = vmatprep.mubr.f32.mxu0 %v4512_v15  ;;  %5357 = vmatmul.mubr.f32.gmra.mrb[4].mxu1 %v8186_v16  ;;  %v4475_v15 = vld [vmem:[%s9011_s1 + $0x138] sm:$0xff] }
  0x7d   : > { %6593 = vmatpush3.bf16.msra.mxu1 %v6590_v7  ;;  %5533 = vmatmul.mubr.f32.gmra.mrb[4].mxu0 %v4513_v18  ;;  %v8293_v7 = vld [vmem:[%s8066_s14 + $0x20] sm:$0xff]  ;;  %v4571_v18 = vld [vmem:[%s9011_s1 + $0x338] sm:$0xff]  ;;  %v6626_v22 = vpack.c.bf16 %v4475_v15, %v4474_v13  ;;  %v4593_v13 = vld [vmem:[%s9011_s1 + $0x3a8] sm:$0xff] }
  0x7e   : > { %6721 = vmatpush3.bf16.msra.mxu0 %v6718_v9  ;;  %6595 = vmatprep.subr.bf16.mxu1 %v6594_v17  ;;  %v8297_v9 = vld [vmem:[%s8066_s14 + $0x30] sm:$0xff]  ;;  %v8425_v15 = vld [vmem:[%s8066_s14 + $0x21] sm:$0xff] }
  0x7f   : > { %6723 = vmatprep.subr.bf16.mxu0 %v6722_v19  ;;  %5359 = vmatprep.mubr.f32.mxu1 %v8204_v24 }
  0x80   : > { %5535 = vmatprep.mubr.f32.mxu0 %v4514_v25  ;;  %5360 = vmatmul.mubr.f32.gmra.mrb[6].mxu1 %v8208_v26 }
  0x81   : > { %6597 = vmatpush3.bf16.msra.mxu1 %v6594_v17  ;;  %5536 = vmatmul.mubr.f32.gmra.mrb[6].mxu0 %v4515_v28  ;;  %v4570_v17 = vld [vmem:[%s9011_s1 + $0x330] sm:$0xff]  ;;  %v4477_v28 = vld [vmem:[%s9011_s1 + $0x148] sm:$0xff] }
  0x82   : > { %6725 = vmatpush3.bf16.msra.mxu0 %v6722_v19  ;;  %6599 = vmatprep.subr.bf16.mxu1 %v6598_v27  ;;  %v8315_v19 = vld [vmem:[%s8066_s14 + $0x40] sm:$0xff]  ;;  %v6754_v25 = vpack.c.bf16 %v4571_v18, %v4570_v17  ;;  %v8429_v17 = vld [vmem:[%s8066_s14 + $0x31] sm:$0xff] }
  0x83   : > { %6727 = vmatprep.subr.bf16.mxu0 %v6726_v29  ;;  %5394 = vmatprep.mubr.f32.mxu1 %v406_v34 }
  0x84   : > { %5570 = vmatprep.mubr.f32.mxu0 %v4532_v35  ;;  %v4539_v35 = vld [vmem:[%s8066_s14 + $0x191] sm:$0xff] }
  0x85   : > { %6601 = vmatpush3.bf16.msra.mxu1 %v6598_v27  ;;  %v4476_v27 = vld [vmem:[%s9011_s1 + $0x140] sm:$0xff] }
  0x86   : > { %6729 = vmatpush3.bf16.msra.mxu0 %v6726_v29  ;;  %6603 = vmatprep.subr.bf16.mxu1 %v6602_v36  ;;  %v4572_v29 = vld [vmem:[%s9011_s1 + $0x340] sm:$0xff]  ;;  %v6630_v34 = vpack.c.bf16 %v4477_v28, %v4476_v27  ;;  %v8451_v28 = vld [vmem:[%s8066_s14 + $0x51] sm:$0xff] }
  0x87   : > { %6731 = vmatprep.subr.bf16.mxu0 %v6730_v37  ;;  %v8447_v27 = vld [vmem:[%s8066_s14 + $0x41] sm:$0xff] }
  0x89   : > { %6605 = vmatpush3.bf16.msra.mxu1 %v6602_v36  ;;  %v6758_v36 = vpack.c.bf16 %v4573_v30, %v4572_v29 }
  0x8a   : > { %6733 = vmatpush3.bf16.msra.mxu0 %v6730_v37  ;;  %6607 = vmatprep.subr.bf16.mxu1 %v6606_v42  ;;  %v4478_v37 = vld [vmem:[%s9011_s1 + $0x150] sm:$0xff] }
  0x8b   : > { %6735 = vmatprep.subr.bf16.mxu0 %v6734_v43 }
  0x8d   : > { %6609 = vmatpush3.bf16.msra.mxu1 %v6606_v42  ;;  %v6634_v42 = vpack.c.bf16 %v4479_v38, %v4478_v37  ;;  %v4563_v38 = vld [vmem:[%s8066_s14 + $0x80] sm:$0xff] }
  0x8e   : > { %6737 = vmatpush3.bf16.msra.mxu0 %v6734_v43  ;;  %6611 = vmatprep.subr.bf16.mxu1 %v6610_v48  ;;  %v6762_v43 = vpack.c.bf16 %v4575_v40, %v4574_v39  ;;  %v4502_v40 = vld [vmem:[%s9011_s1 + $0x1d0] sm:$0xff] }
  0x8f   : > { %6739 = vmatprep.subr.bf16.mxu0 %v6738_v49 }
  0x91   : > { %6613 = vmatpush3.bf16.msra.mxu1 %v6610_v48  ;;  %v6638_v48 = vpack.c.bf16 %v4481_v45, %v4480_v44  ;;  %v4504_v45 = vld [vmem:[%s9011_s1 + $0x1e0] sm:$0xff] }
  0x92   : > { %6741 = vmatpush3.bf16.msra.mxu0 %v6738_v49  ;;  %6615 = vmatprep.subr.bf16.mxu1 %v6614_v54  ;;  %v6766_v49 = vpack.c.bf16 %v4577_v47, %v4576_v46  ;;  %v4505_v46 = vld [vmem:[%s9011_s1 + $0x1e8] sm:$0xff] }
  0x93   : > { %6743 = vmatprep.subr.bf16.mxu0 %v6742_v55  ;;  %v4601_v47 = vld [vmem:[%s9011_s1 + $0x3e8] sm:$0xff] }
  0x94   : > { %5395 = vmatmul.mubr.f32.vlgmr.msra.gmra.mrb[0].mxu1 %v8276_v61 }
  0x95   : > { %6617 = vmatpush3.bf16.msra.mxu1 %v6614_v54  ;;  %5571 = vmatmul.mubr.f32.vlgmr.msra.gmra.mrb[0].mxu0 %v4533_v62  ;;  %v6642_v54 = vpack.c.bf16 %v4483_v51, %v4482_v50  ;;  %v6774_v62 = vpack.c.bf16 %v4589_v59, %v4588_v58  ;;  %v4506_v50 = vld [vmem:[%s9011_s1 + $0x1f0] sm:$0xff]  ;;  %v4507_v51 = vld [vmem:[%s9011_s1 + $0x1f8] sm:$0xff] }
  0x96   : > { %6745 = vmatpush3.bf16.msra.mxu0 %v6742_v55  ;;  %6619 = vmatprep.subr.bf16.mxu1 %v6618_v63  ;;  %v6770_v55 = vpack.c.bf16 %v4579_v53, %v4578_v52  ;;  %v4602_v52 = vld [vmem:[%s9011_s1 + $0x3f0] sm:$0xff]  ;;  %v6674_v53 = vpack.c.bf16 %v4507_v51, %v4506_v50  ;;  %v4615_v59 = vld [vmem:[%s9011_s1 + $0x418] sm:$0xff]  ;;  %v1676_v50 = vld [vmem:[#allocation4] sm:$0xff] }
  0x97   : > { %6747 = vmatprep.subr.bf16.mxu0 %v6746_v0  ;;  %5397 = vmatprep.mubr.f32.mxu1 %v8293_v7  ;;  %v4614_v58 = vld [vmem:[%s9011_s1 + $0x410] sm:$0xff]  ;;  %v1677_v51 = vld [vmem:[#allocation4 + $0x8] sm:$0xff] }
  0x98   : > { %5573 = vmatprep.mubr.f32.mxu0 %v4534_v8  ;;  %5398 = vmatmul.mubr.f32.gmra.mrb[2].mxu1 %v8297_v9  ;;  %v6778_v8 = vpack.c.bf16 %v4591_v2, %v4590_v1  ;;  %v4617_v1 = vld [vmem:[%s9011_s1 + $0x428] sm:$0xff]  ;;  %v4487_v2 = vld [vmem:[%s8066_s14 + $0x150] sm:$0xff] }
  0x99   : > { %6621 = vmatpush3.bf16.msra.mxu1 %v6618_v63  ;;  %5574 = vmatmul.mubr.f32.gmra.mrb[2].mxu0 %v4535_v11  ;;  %v4494_v63 = vld [vmem:[%s9011_s1 + $0x190] sm:$0xff]  ;;  %v4497_v11 = vld [vmem:[%s9011_s1 + $0x1a8] sm:$0xff] }
  0x9a   : > { %6749 = vmatpush3.bf16.msra.mxu0 %v6746_v0  ;;  %6623 = vmatprep.subr.bf16.mxu1 %v6622_v10  ;;  %v4495_v0 = vld [vmem:[%s9011_s1 + $0x198] sm:$0xff] }
  0x9b   : > { %6751 = vmatprep.subr.bf16.mxu0 %v6750_v12  ;;  %5400 = vmatprep.mubr.f32.mxu1 %v8315_v19  ;;  %v6650_v5 = vpack.c.bf16 %v4495_v0, %v4494_v63  ;;  %v6810_v63 = vpack.c.bf16 %v4615_v59, %v4614_v58  ;;  %v4616_v0 = vld [vmem:[%s9011_s1 + $0x420] sm:$0xff] }
  0x9c   : > { %5576 = vmatprep.mubr.f32.mxu0 %v4536_v20  ;;  %5401 = vmatmul.mubr.f32.gmra.mrb[4].mxu1 %v8319_v21 }
  0x9d   : > { %6625 = vmatpush3.bf16.msra.mxu1 %v6622_v10  ;;  %5577 = vmatmul.mubr.f32.gmra.mrb[4].mxu0 %v4537_v23  ;;  %v4496_v10 = vld [vmem:[%s9011_s1 + $0x1a0] sm:$0xff]  ;;  %v4499_v23 = vld [vmem:[%s9011_s1 + $0x1b8] sm:$0xff] }
  0x9e   : > { %6753 = vmatpush3.bf16.msra.mxu0 %v6750_v12  ;;  %6627 = vmatprep.subr.bf16.mxu1 %v6626_v22  ;;  %v4592_v12 = vld [vmem:[%s9011_s1 + $0x3a0] sm:$0xff]  ;;  %v6654_v18 = vpack.c.bf16 %v4497_v11, %v4496_v10  ;;  %v4618_v10 = vld [vmem:[%s9011_s1 + $0x430] sm:$0xff]  ;;  %v4619_v11 = vld [vmem:[%s9011_s1 + $0x438] sm:$0xff] }
  0x9f   : > { %6755 = vmatprep.subr.bf16.mxu0 %v6754_v25  ;;  %5403 = vmatprep.mubr.f32.mxu1 %v8337_v31  ;;  %v6782_v20 = vpack.c.bf16 %v4593_v13, %v4592_v12  ;;  %v4490_v12 = vld [vmem:[%s8066_s14 + $0x180] sm:$0xff] }
  0xa0   : > { %5579 = vmatprep.mubr.f32.mxu0 %v4538_v32  ;;  %5404 = vmatmul.mubr.f32.gmra.mrb[6].mxu1 %v8341_v33  ;;  %v4500_v32 = vld [vmem:[%s9011_s1 + $0x1c0] sm:$0xff] }
  0xa1   : > { %6629 = vmatpush3.bf16.msra.mxu1 %v6626_v22  ;;  %5580 = vmatmul.mubr.f32.gmra.mrb[6].mxu0 %v4539_v35  ;;  %v4498_v22 = vld [vmem:[%s9011_s1 + $0x1b0] sm:$0xff]  ;;  %v8469_v35 = vld [vmem:[%s8066_s14 + $0x61] sm:$0xff] }
  0xa2   : > { %6757 = vmatpush3.bf16.msra.mxu0 %v6754_v25  ;;  %6631 = vmatprep.subr.bf16.mxu1 %v6630_v34  ;;  %v4595_v25 = vld [vmem:[%s9011_s1 + $0x3b8] sm:$0xff]  ;;  %v6658_v29 = vpack.c.bf16 %v4499_v23, %v4498_v22  ;;  %v4620_v13 = vld [vmem:[%s9011_s1 + $0x440] sm:$0xff]  ;;  %v4622_v22 = vld [vmem:[%s9011_s1 + $0x450] sm:$0xff] }
  0xa3   : > { %6759 = vmatprep.subr.bf16.mxu0 %v6758_v36  ;;  %5438 = vmatprep.mubr.f32.mxu1 %v666_v41  ;;  %v4599_v41 = vld [vmem:[%s9011_s1 + $0x3d8] sm:$0xff] }
  0xa4   : > { %5614 = vmatprep.mubr.f32.mxu0 %v8276_v61  ;;  %v6646_v61 = vpack.c.bf16 %v4493_v57, %v4492_v56  ;;  %v4613_v56 = vld [vmem:[%s9011_s1 + $0x408] sm:$0xff]  ;;  %v4623_v23 = vld [vmem:[%s9011_s1 + $0x458] sm:$0xff] }
  0xa5   : > { %6633 = vmatpush3.bf16.msra.mxu1 %v6630_v34  ;;  %v4597_v34 = vld [vmem:[%s9011_s1 + $0x3c8] sm:$0xff] }
  0xa6   : > { %6761 = vmatpush3.bf16.msra.mxu0 %v6758_v36  ;;  %6635 = vmatprep.subr.bf16.mxu1 %v6634_v42  ;;  %v8473_v36 = vld [vmem:[%s8066_s14 + $0x71] sm:$0xff] }
  0xa7   : > { %6763 = vmatprep.subr.bf16.mxu0 %v6762_v43 }
  0xa9   : > { %6637 = vmatpush3.bf16.msra.mxu1 %v6634_v42  ;;  %v4484_v42 = vld [vmem:[%s8066_s14 + $0x120] sm:$0xff] }
  0xaa   : > { %6765 = vmatpush3.bf16.msra.mxu0 %v6762_v43  ;;  %6639 = vmatprep.subr.bf16.mxu1 %v6638_v48 }
  0xab   : > { %6767 = vmatprep.subr.bf16.mxu0 %v6766_v49 }
  0xad   : > { %6641 = vmatpush3.bf16.msra.mxu1 %v6638_v48  ;;  %v6670_v48 = vpack.c.bf16 %v4505_v46, %v4504_v45  ;;  %v1713_v45 = vld [vmem:[#allocation4 + $0xe0] sm:$0xff]  ;;  %v1714_v46 = vld [vmem:[#allocation4 + $0xe8] sm:$0xff] }
  0xae   : > { %6769 = vmatpush3.bf16.msra.mxu0 %v6766_v49  ;;  %6643 = vmatprep.subr.bf16.mxu1 %v6642_v54 }
  0xaf   : > { %6771 = vmatprep.subr.bf16.mxu0 %v6770_v55 }
  0xb1   : > { %6645 = vmatpush3.bf16.msra.mxu1 %v6642_v54 }
  0xb2   : > { %6773 = vmatpush3.bf16.msra.mxu0 %v6770_v55  ;;  %6647 = vmatprep.subr.bf16.mxu1 %v6646_v61  ;;  %v4612_v55 = vld [vmem:[%s9011_s1 + $0x400] sm:$0xff] }
  0xb3   : > { %6775 = vmatprep.subr.bf16.mxu0 %v6774_v62  ;;  %v6806_v57 = vpack.c.bf16 %v4613_v56, %v4612_v55 }
  0xb4   : > { %5439 = vmatmul.mubr.f32.vlgmr.msra.gmra.mrb[0].mxu1 %v8409_v3 }
  0xb5   : > { %6649 = vmatpush3.bf16.msra.mxu1 %v6646_v61  ;;  %5615 = vmatmul.mubr.f32.vlgmr.msra.gmra.mrb[0].mxu0 %v8293_v7  ;;  %v4594_v7 = vld [vmem:[%s9011_s1 + $0x3b0] sm:$0xff] }
  0xb6   : > { %6777 = vmatpush3.bf16.msra.mxu0 %v6774_v62  ;;  %6651 = vmatprep.subr.bf16.mxu1 %v6650_v5  ;;  %v6786_v30 = vpack.c.bf16 %v4595_v25, %v4594_v7  ;;  %v4485_v61 = vld [vmem:[%s8066_s14 + $0x130] sm:$0xff]  ;;  %v4486_v62 = vld [vmem:[%s8066_s14 + $0x140] sm:$0xff]  ;;  %v4625_v7 = vld [vmem:[%s9011_s1 + $0x468] sm:$0xff] }
  0xb7   : > { %6779 = vmatprep.subr.bf16.mxu0 %v6778_v8  ;;  %5441 = vmatprep.mubr.f32.mxu1 %v8425_v15 }
  0xb8   : > { %5442 = vmatmul.mubr.f32.gmra.mrb[2].mxu1 %v8429_v17  ;;  %5617 = vmatprep.mubr.f32.mxu0 %v8297_v9  ;;  %v4501_v9 = vld [vmem:[%s9011_s1 + $0x1c8] sm:$0xff] }
  0xb9   : > { %6653 = vmatpush3.bf16.msra.mxu1 %v6650_v5  ;;  %5618 = vmatmul.mubr.f32.gmra.mrb[2].mxu0 %v8315_v19  ;;  %v4596_v19 = vld [vmem:[%s9011_s1 + $0x3c0] sm:$0xff]  ;;  %v6662_v37 = vpack.c.bf16 %v4501_v9, %v4500_v32 }
  0xba   : > { %6781 = vmatpush3.bf16.msra.mxu0 %v6778_v8  ;;  %6655 = vmatprep.subr.bf16.mxu1 %v6654_v18  ;;  %v6790_v39 = vpack.c.bf16 %v4597_v34, %v4596_v19  ;;  %v4488_v5 = vld [vmem:[%s8066_s14 + $0x160] sm:$0xff]  ;;  %v6814_v8 = vpack.c.bf16 %v4617_v1, %v4616_v0  ;;  %v1702_v19 = vld [vmem:[#allocation4 + $0x88] sm:$0xff] }
  0xbb   : > { %6783 = vmatprep.subr.bf16.mxu0 %v6782_v20  ;;  %5444 = vmatprep.mubr.f32.mxu1 %v8447_v27  ;;  %v4611_v32 = vld [vmem:[%s8066_s14 + $0x81] sm:$0xff] }
  0xbc   : > { %5445 = vmatmul.mubr.f32.gmra.mrb[4].mxu1 %v8451_v28  ;;  %5620 = vmatprep.mubr.f32.mxu0 %v8319_v21  ;;  %v4503_v21 = vld [vmem:[%s9011_s1 + $0x1d8] sm:$0xff]  ;;  %v1701_v9 = vld [vmem:[#allocation4 + $0x80] sm:$0xff] }
  0xbd   : > { %6657 = vmatpush3.bf16.msra.mxu1 %v6654_v18  ;;  %5621 = vmatmul.mubr.f32.gmra.mrb[4].mxu0 %v8337_v31  ;;  %v4598_v31 = vld [vmem:[%s9011_s1 + $0x3d0] sm:$0xff]  ;;  %v6666_v43 = vpack.c.bf16 %v4503_v21, %v4502_v40  ;;  %v4621_v18 = vld [vmem:[%s9011_s1 + $0x448] sm:$0xff]  ;;  %v6838_v34 = vpack.c.bf16 %v1702_v19, %v1701_v9  ;;  %v1708_v40 = vld [vmem:[#allocation4 + $0xb8] sm:$0xff] }
  0xbe   : > { %6785 = vmatpush3.bf16.msra.mxu0 %v6782_v20  ;;  %6659 = vmatprep.subr.bf16.mxu1 %v6658_v29  ;;  %v6794_v44 = vpack.c.bf16 %v4599_v41, %v4598_v31  ;;  %v4491_v20 = vld [vmem:[%s8066_s14 + $0x190] sm:$0xff]  ;;  %v1709_v21 = vld [vmem:[#allocation4 + $0xc0] sm:$0xff]  ;;  %v1710_v31 = vld [vmem:[#allocation4 + $0xc8] sm:$0xff] }
  0xbf   : > { %6787 = vmatprep.subr.bf16.mxu0 %v6786_v30  ;;  %5447 = vmatprep.mubr.f32.mxu1 %v8469_v35  ;;  %v6854_v41 = vpack.c.bf16 %v1710_v31, %v1709_v21  ;;  %v1682_v19 = vld [vmem:[#allocation4 + $0x30] sm:$0xff]  ;;  %v1684_v21 = vld [vmem:[#allocation4 + $0x40] sm:$0xff]  ;;  %v1685_v31 = vld [vmem:[#allocation4 + $0x48] sm:$0xff] }
  0xc0   : > { %5448 = vmatmul.mubr.f32.gmra.mrb[6].mxu1 %v8473_v36  ;;  %5623 = vmatprep.mubr.f32.mxu0 %v8341_v33  ;;  %v4600_v33 = vld [vmem:[%s9011_s1 + $0x3e0] sm:$0xff] }
  0xc1   : > { %6661 = vmatpush3.bf16.msra.mxu1 %v6658_v29  ;;  %5624 = vmatmul.mubr.f32.gmra.mrb[6].mxu0 %v4563_v38  ;;  %v6798_v49 = vpack.c.bf16 %v4601_v47, %v4600_v33  ;;  %v4626_v29 = vld [vmem:[%s9011_s1 + $0x470] sm:$0xff]  ;;  %v1704_v38 = vld [vmem:[#allocation4 + $0x98] sm:$0xff]  ;;  %v6862_v33 = vpack.c.bf16 %v1714_v46, %v1713_v45 }
  0xc2   : > { %6789 = vmatpush3.bf16.msra.mxu0 %v6786_v30  ;;  %6663 = vmatprep.subr.bf16.mxu1 %v6662_v37  ;;  %v1715_v47 = vld [vmem:[#allocation4 + $0xf0] sm:$0xff]  ;;  %v1687_v46 = vld [vmem:[#allocation4 + $0x58] sm:$0xff] }
  0xc3   : > { %6791 = vmatprep.subr.bf16.mxu0 %v6790_v39  ;;  %5482 = vmatprep.mubr.f32.mxu1 %v4484_v42  ;;  %v1711_v42 = vld [vmem:[#allocation4 + $0xd0] sm:$0xff] }
  0xc4   : > { %5658 = vmatprep.mubr.f32.mxu0 %v8143_v60  ;;  %v4603_v60 = vld [vmem:[%s9011_s1 + $0x3f8] sm:$0xff]  ;;  %v1686_v45 = vld [vmem:[#allocation4 + $0x50] sm:$0xff] }
  0xc5   : > { %6665 = vmatpush3.bf16.msra.mxu1 %v6662_v37  ;;  %v6802_v54 = vpack.c.bf16 %v4603_v60, %v4602_v52  ;;  %v1703_v37 = vld [vmem:[#allocation4 + $0x90] sm:$0xff]  ;;  %v6870_v52 = vpack.c.bf16 %v1677_v51, %v1676_v50  ;;  %v1691_v51 = vld [vmem:[#allocation4 + $0x78] sm:$0xff] }
  0xc6   : > { %6793 = vmatpush3.bf16.msra.mxu0 %v6790_v39  ;;  %6667 = vmatprep.subr.bf16.mxu1 %v6666_v43  ;;  %v1707_v39 = vld [vmem:[#allocation4 + $0xb0] sm:$0xff] }
  0xc7   : > { %6795 = vmatprep.subr.bf16.mxu0 %v6794_v44  ;;  %v1690_v50 = vld [vmem:[#allocation4 + $0x70] sm:$0xff] }
  0xc9   : > { %6669 = vmatpush3.bf16.msra.mxu1 %v6666_v43  ;;  %v1712_v43 = vld [vmem:[#allocation4 + $0xd8] sm:$0xff] }
  0xca   : > { %6797 = vmatpush3.bf16.msra.mxu0 %v6794_v44  ;;  %6671 = vmatprep.subr.bf16.mxu1 %v6670_v48  ;;  %v6858_v44 = vpack.c.bf16 %v1712_v43, %v1711_v42 }
  0xcb   : > { %6799 = vmatprep.subr.bf16.mxu0 %v6798_v49 }
  0xcd   : > { %6673 = vmatpush3.bf16.msra.mxu1 %v6670_v48  ;;  %v1716_v48 = vld [vmem:[#allocation4 + $0xf8] sm:$0xff] }
  0xce   : > { %6801 = vmatpush3.bf16.msra.mxu0 %v6798_v49  ;;  %6675 = vmatprep.subr.bf16.mxu1 %v6674_v53  ;;  %v6866_v49 = vpack.c.bf16 %v1716_v48, %v1715_v47  ;;  %v1688_v47 = vld [vmem:[#allocation4 + $0x60] sm:$0xff]  ;;  %v1689_v48 = vld [vmem:[#allocation4 + $0x68] sm:$0xff] }
  0xcf   : > { %6803 = vmatprep.subr.bf16.mxu0 %v6802_v54 }
  0xd1   : > { %6677 = vmatpush3.bf16.msra.mxu1 %v6674_v53 }
  0xd2   : > { %6805 = vmatpush3.bf16.msra.mxu0 %v6802_v54  ;;  %6839 = vmatprep.subr.bf16.mxu1 %v6838_v34 }
  0xd3   : > { %6807 = vmatprep.subr.bf16.mxu0 %v6806_v57 }
  0xd4   : > { %5483 = vmatmul.mubr.f32.vlgmr.msra.gmra.mrb[0].mxu1 %v4485_v61 }
  0xd5   : > { %5659 = vmatmul.mubr.f32.vlgmr.msra.gmra.mrb[0].mxu0 %v8160_v4  ;;  %5485 = vmatprep.mubr.f32.mxu1 %v4486_v62  ;;  %v4489_v4 = vld [vmem:[%s8066_s14 + $0x170] sm:$0xff] }
  0xd6   : > { %6809 = vmatpush3.bf16.msra.mxu0 %v6806_v57  ;;  %5661 = vmatprep.mubr.f32.mxu0 %v8164_v6  ;;  %v6818_v6 = vpack.c.bf16 %v4619_v11, %v4618_v10  ;;  %v1679_v10 = vld [vmem:[#allocation4 + $0x18] sm:$0xff] }
  0xd7   : > { %6811 = vmatprep.subr.bf16.mxu0 %v6810_v63  ;;  %6841 = vmatpush3.bf16.msra.mxu1 %v6838_v34  ;;  %v1683_v34 = vld [vmem:[#allocation4 + $0x38] sm:$0xff] }
  0xd8   : > { %5486 = vmatmul.mubr.f32.gmra.mrb[2].mxu1 %v4487_v2 }
  0xd9   : > { %5488 = vmatprep.mubr.f32.mxu1 %v4488_v5  ;;  %5662 = vmatmul.mubr.f32.gmra.mrb[2].mxu0 %v8182_v14  ;;  %v4587_v14 = vld [vmem:[%s8066_s14 + $0x110] sm:$0xff] }
  0xda   : > { %6813 = vmatpush3.bf16.msra.mxu0 %v6810_v63  ;;  %5664 = vmatprep.mubr.f32.mxu0 %v8186_v16  ;;  %v6822_v16 = vpack.c.bf16 %v4621_v18, %v4620_v13  ;;  %v4628_v63 = vld [vmem:[%s9012_s2] ss:$0 sm:$0xff] }
  0xdb   : > { %6815 = vmatprep.subr.bf16.mxu0 %v6814_v8 }
  0xdc   : > { %5489 = vmatmul.mubr.f32.gmra.mrb[4].mxu1 %v4489_v4 }
  0xdd   : > { %5491 = vmatprep.mubr.f32.mxu1 %v4490_v12  ;;  %5665 = vmatmul.mubr.f32.gmra.mrb[4].mxu0 %v8204_v24  ;;  %v6826_v24 = vpack.c.bf16 %v4623_v23, %v4622_v22  ;;  %v1680_v22 = vld [vmem:[#allocation4 + $0x20] sm:$0xff]  ;;  %v1681_v23 = vld [vmem:[#allocation4 + $0x28] sm:$0xff] }
  0xde   : > { %6817 = vmatpush3.bf16.msra.mxu0 %v6814_v8  ;;  %5667 = vmatprep.mubr.f32.mxu0 %v8208_v26  ;;  %v4624_v26 = vld [vmem:[%s9011_s1 + $0x460] sm:$0xff]  ;;  %v1678_v8 = vld [vmem:[#allocation4 + $0x10] sm:$0xff] }
  0xdf   : > { %6819 = vmatprep.subr.bf16.mxu0 %v6818_v6  ;;  %v6830_v25 = vpack.c.bf16 %v4625_v7, %v4624_v26 }
  0xe0   : > { %5492 = vmatmul.mubr.f32.gmra.mrb[6].mxu1 %v4491_v20 }
  0xe1   : > { %5668 = vmatmul.mubr.f32.gmra.mrb[6].mxu0 %v4587_v14  ;;  %v6874_v14 = vpack.c.bf16 %v1679_v10, %v1678_v8 }
  0xe2   : > { %6821 = vmatpush3.bf16.msra.mxu0 %v6818_v6  ;;  %5702 = vmatprep.mubr.f32.mxu0 %v8409_v3  ;;  %v4627_v3 = vld [vmem:[%s9011_s1 + $0x478] sm:$0xff] }
  0xe3   : > { %6823 = vmatprep.subr.bf16.mxu0 %v6822_v16  ;;  %v6834_v30 = vpack.c.bf16 %v4627_v3, %v4626_v29 }
  0xe6   : > { %6825 = vmatpush3.bf16.msra.mxu0 %v6822_v16 }
  0xe7   : > { %6827 = vmatprep.subr.bf16.mxu0 %v6826_v24 }
  0xea   : > { %6829 = vmatpush3.bf16.msra.mxu0 %v6826_v24 }
  0xeb   : > { %6831 = vmatprep.subr.bf16.mxu0 %v6830_v25 }
  0xee   : > { %6833 = vmatpush3.bf16.msra.mxu0 %v6830_v25 }
  0xef   : > { %6835 = vmatprep.subr.bf16.mxu0 %v6834_v30 }
  0xf2   : > { %6837 = vmatpush3.bf16.msra.mxu0 %v6834_v30 }
  0xf5   : > { %5703 = vmatmul.mubr.f32.vlgmr.msra.gmra.mrb[0].mxu0 %v8425_v15  ;;  %v6842_v15 = vpack.c.bf16 %v1704_v38, %v1703_v37 }
  0xf6   : > { %5705 = vmatprep.mubr.f32.mxu0 %v8429_v17  ;;  %v1705_v17 = vld [vmem:[#allocation4 + $0xa0] sm:$0xff] }
  0xf7   : > { %6843 = vmatprep.subr.bf16.mxu1 %v6842_v15 }
  0xf8   : > { %6845 = vmatpush3.bf16.msra.mxu1 %v6842_v15 }
  0xf9   : > { %5706 = vmatmul.mubr.f32.gmra.mrb[2].mxu0 %v8447_v27  ;;  %v1706_v27 = vld [vmem:[#allocation4 + $0xa8] sm:$0xff] }
  0xfa   : > { %5708 = vmatprep.mubr.f32.mxu0 %v8451_v28  ;;  %v6846_v28 = vpack.c.bf16 %v1706_v27, %v1705_v17 }
  0xfc   : > { %6847 = vmatprep.subr.bf16.mxu1 %v6846_v28 }
  0xfd   : > { %5709 = vmatmul.mubr.f32.gmra.mrb[4].mxu0 %v8469_v35  ;;  %v7837_v35 = vmov 0.0   ;;  %6849 = vmatpush3.bf16.msra.mxu1 %v6846_v28 }
  0xfe   : > { %5711 = vmatprep.mubr.f32.mxu0 %v8473_v36  ;;  %370 = vst [vmem:[#allocation2 + $0x20] sm:$0xff] %v7837_v35  ;;  %371 = vst [vmem:[#allocation2 + $0x28] sm:$0x3] %v7837_v35  ;;  %v6850_v36 = vpack.c.bf16 %v1708_v40, %v1707_v39  ;;  %v6882_v40 = vpack.c.bf16 %v1683_v34, %v1682_v19  ;;  %v2075_v19 = vld [vmem:[#allocation4 + $0x188] sm:$0xff] }
  0xff   : > { %366 = vst [vmem:[#allocation2] sm:$0xff] %v7837_v35  ;;  %367 = vst [vmem:[#allocation2 + $0x8] sm:$0x3] %v7837_v35 }
 0x100   : > { %368 = vst [vmem:[#allocation2 + $0x10] sm:$0xff] %v7837_v35  ;;  %369 = vst [vmem:[#allocation2 + $0x18] sm:$0x3] %v7837_v35  ;;  %6851 = vmatprep.subr.bf16.mxu1 %v6850_v36 }
 0x101   : > { %5712 = vmatmul.mubr.f32.gmra.mrb[6].mxu0 %v4611_v32  ;;  %372 = vst [vmem:[#allocation2 + $0x30] sm:$0xff] %v7837_v35  ;;  %373 = vst [vmem:[#allocation2 + $0x38] sm:$0x3] %v7837_v35  ;;  %6853 = vmatpush3.bf16.msra.mxu1 %v6850_v36  ;;  %v6878_v32 = vpack.c.bf16 %v1681_v23, %v1680_v22  ;;  %v1947_v22 = vld [vmem:[#allocation4 + $0x158] sm:$0xff] }
 0x102   : > { %374 = vst [vmem:[#allocation2 + $0x40] sm:$0xff] %v7837_v35  ;;  %375 = vst [vmem:[#allocation2 + $0x48] sm:$0x3] %v7837_v35  ;;  %6855 = vmatprep.subr.bf16.mxu1 %v6854_v41 }
 0x103   : > { %376 = vst [vmem:[#allocation2 + $0x50] sm:$0xff] %v7837_v35  ;;  %377 = vst [vmem:[#allocation2 + $0x58] sm:$0x3] %v7837_v35 }
 0x104   : > { %378 = vst [vmem:[#allocation2 + $0x60] sm:$0xff] %v7837_v35  ;;  %379 = vst [vmem:[#allocation2 + $0x68] sm:$0x3] %v7837_v35 }
 0x105   : > { %380 = vst [vmem:[#allocation2 + $0x70] sm:$0xff] %v7837_v35  ;;  %381 = vst [vmem:[#allocation2 + $0x78] sm:$0x3] %v7837_v35  ;;  %6857 = vmatpush3.bf16.msra.mxu1 %v6854_v41 }
 0x106   : > { %382 = vst [vmem:[#allocation2 + $0x80] sm:$0xff] %v7837_v35  ;;  %383 = vst [vmem:[#allocation2 + $0x88] sm:$0x3] %v7837_v35  ;;  %6859 = vmatprep.subr.bf16.mxu1 %v6858_v44  ;;  %v1692_v60 = vld [vmem:[#allocation2 + $0x1] sm:$0xff] }
 0x107   : > { %384 = vst [vmem:[#allocation2 + $0x90] sm:$0xff] %v7837_v35  ;;  %385 = vst [vmem:[#allocation2 + $0x98] sm:$0x3] %v7837_v35  ;;  %5746 = vmatprep.mubr.f32.mxu1 %v1692_v60  ;;  %v1936_v60 = vld [vmem:[#allocation4 + $0x100] sm:$0xff] }
 0x108   : > { %386 = vst [vmem:[#allocation3] sm:$0xff] %v7837_v35  ;;  %387 = vst [vmem:[#allocation3 + $0x8] sm:$0x3] %v7837_v35 }
 0x109   : > { %388 = vst [vmem:[#allocation3 + $0x10] sm:$0xff] %v7837_v35  ;;  %389 = vst [vmem:[#allocation3 + $0x18] sm:$0x3] %v7837_v35  ;;  %6861 = vmatpush3.bf16.msra.mxu1 %v6858_v44  ;;  %v6886_v44 = vpack.c.bf16 %v1685_v31, %v1684_v21 }
 0x10a   : > { %390 = vst [vmem:[#allocation3 + $0x20] sm:$0xff] %v7837_v35  ;;  %391 = vst [vmem:[#allocation3 + $0x28] sm:$0x3] %v7837_v35  ;;  %6863 = vmatprep.subr.bf16.mxu1 %v6862_v33 }
 0x10b   : > { %392 = vst [vmem:[#allocation3 + $0x30] sm:$0xff] %v7837_v35  ;;  %393 = vst [vmem:[#allocation3 + $0x38] sm:$0x3] %v7837_v35 }
 0x10c   : > { %394 = vst [vmem:[#allocation3 + $0x40] sm:$0xff] %v7837_v35  ;;  %395 = vst [vmem:[#allocation3 + $0x48] sm:$0x3] %v7837_v35 }
 0x10d   : > { %396 = vst [vmem:[#allocation3 + $0x50] sm:$0xff] %v7837_v35  ;;  %397 = vst [vmem:[#allocation3 + $0x58] sm:$0x3] %v7837_v35  ;;  %6865 = vmatpush3.bf16.msra.mxu1 %v6862_v33  ;;  %v6890_v33 = vpack.c.bf16 %v1687_v46, %v1686_v45 }
 0x10e   : > { %398 = vst [vmem:[#allocation3 + $0x60] sm:$0xff] %v7837_v35  ;;  %399 = vst [vmem:[#allocation3 + $0x68] sm:$0x3] %v7837_v35  ;;  %6867 = vmatprep.subr.bf16.mxu1 %v6866_v49 }
 0x10f   : > { %400 = vst [vmem:[#allocation3 + $0x70] sm:$0xff] %v7837_v35  ;;  %401 = vst [vmem:[#allocation3 + $0x78] sm:$0x3] %v7837_v35 }
 0x110   : > { %402 = vst [vmem:[#allocation3 + $0x80] sm:$0xff] %v7837_v35  ;;  %403 = vst [vmem:[#allocation3 + $0x88] sm:$0x3] %v7837_v35 }
 0x111   : > { %404 = vst [vmem:[#allocation3 + $0x90] sm:$0xff] %v7837_v35  ;;  %405 = vst [vmem:[#allocation3 + $0x98] sm:$0x3] %v7837_v35  ;;  %6869 = vmatpush3.bf16.msra.mxu1 %v6866_v49  ;;  %v6894_v49 = vpack.c.bf16 %v1689_v48, %v1688_v47  ;;  %v2082_v47 = vld [vmem:[#allocation4 + $0x1c0] sm:$0xff]  ;;  %v2083_v48 = vld [vmem:[#allocation4 + $0x1c8] sm:$0xff] }
 0x112   : > { %6871 = vmatprep.subr.bf16.mxu1 %v6870_v52 }
 0x1a7   : > { %v5484_v53 = vpop.f32.mrb[0].mxu1 }
 0x1a8   : > { %v896_v54 = vpop.f32.mrb[1].mxu1 }
 0x1ab   : > { %v5487_v55 = vpop.f32.mrb[2].mxu1 }
 0x1ac   : > { %v906_v56 = vpop.f32.mrb[3].mxu1 }
 0x1af   : > { %v5490_v57 = vpop.f32.mrb[4].mxu1 }
 0x1b0   : > { %v916_v58 = vpop.f32.mrb[5].mxu1 }
 0x1b3   : > { %v5493_v59 = vpop.f32.mrb[6].mxu1 }
 0x1b4   : > { %v926_v61 = vpop.f32.mrb[7].mxu1 }
 0x1c8   : > { %v5704_v62 = vpop.f32.mrb[0].mxu0 }
 0x1c9   : > { %v7446_v0 = vadd.f32 %v5704_v62, %v5484_v53  ;;  %v1589_v1 = vpop.f32.mrb[1].mxu0  ;;  %v1937_v53 = vld [vmem:[#allocation4 + $0x108] sm:$0xff] }
 0x1ca   : > { %v7447_v2 = vadd.f32 %v1589_v1, %v896_v54  ;;  %v6902_v54 = vpack.c.bf16 %v1937_v53, %v1936_v60  ;;  %v1942_v1 = vld [vmem:[#allocation4 + $0x130] sm:$0xff]  ;;  %v2085_v60 = vld [vmem:[#allocation4 + $0x1d8] sm:$0xff] }
 0x1cb   : > { %v1644_v5 = vadd.f32 %v7446_v0, %v4628_v63 }
 0x1cc   : > { %v1643_v11 = vadd.f32 %v7447_v2, %v4628_v63  ;;  %v5707_v4 = vpop.f32.mrb[2].mxu0  ;;  %v1943_v2 = vld [vmem:[#allocation4 + $0x138] sm:$0xff] }
 0x1cd   : > { %v8630_v12 = vmax.f32 %v1644_v5, 0.0  ;;  %v7448_v6 = vadd.f32 %v5707_v4, %v5487_v55  ;;  %v1599_v13 = vpop.f32.mrb[3].mxu0  ;;  %v1938_v55 = vld [vmem:[#allocation4 + $0x110] sm:$0xff]  ;;  %v6914_v8 = vpack.c.bf16 %v1943_v2, %v1942_v1  ;;  %v1945_v4 = vld [vmem:[#allocation4 + $0x148] sm:$0xff] }
 0x1ce   : > { %v8632_v18 = vmax.f32 %v1643_v11, 0.0  ;;  %v7449_v20 = vadd.f32 %v1599_v13, %v906_v56  ;;  %v1939_v56 = vld [vmem:[#allocation4 + $0x118] sm:$0xff]  ;;  %v1944_v11 = vld [vmem:[#allocation4 + $0x140] sm:$0xff]  ;;  %v2213_v1 = vld [vmem:[#allocation4 + $0x208] sm:$0xff] }
 0x1cf   : > { %1661 = vst [vmem:[#allocation2 + $0x21] sm:$0xff] %v8630_v12  ;;  %v1646_v16 = vadd.f32 %v7448_v6, %v4628_v63  ;;  %v6918_v13 = vpack.c.bf16 %v1945_v4, %v1944_v11  ;;  %v2215_v11 = vld [vmem:[#allocation4 + $0x218] sm:$0xff]  ;;  %v2216_v4 = vld [vmem:[#allocation4 + $0x220] sm:$0xff] }
 0x1d0   : > { %1660 = vst [vmem:[#allocation2 + $0x11] sm:$0xff] %v8632_v18  ;;  %v1645_v24 = vadd.f32 %v7449_v20, %v4628_v63  ;;  %v5710_v26 = vpop.f32.mrb[4].mxu0  ;;  %5747 = vmatmul.mubr.f32.vlgmr.msra.gmra.mrb[8].mxu1 %v8632_v18  ;;  %v1927_v20 = vld [vmem:[#allocation2 + $0x2] sm:$0xff] }
 0x1d1   : > { %v8637_v7 = vmax.f32 %v1646_v16, 0.0  ;;  %v7450_v25 = vadd.f32 %v5710_v26, %v5490_v57  ;;  %v1609_v29 = vpop.f32.mrb[5].mxu0  ;;  %6873 = vmatpush3.bf16.msra.mxu1 %v6870_v52  ;;  %5749 = vmatprep.mubr.f32.mxu1 %v8630_v12  ;;  %v6898_v52 = vpack.c.bf16 %v1691_v51, %v1690_v50  ;;  %v6906_v57 = vpack.c.bf16 %v1939_v56, %v1938_v55  ;;  %v1946_v16 = vld [vmem:[#allocation4 + $0x150] sm:$0xff]  ;;  %v1949_v26 = vld [vmem:[#allocation4 + $0x168] sm:$0xff] }
 0x1d2   : > { %v8640_v3 = vmax.f32 %v1645_v24, 0.0  ;;  %v7451_v30 = vadd.f32 %v1609_v29, %v916_v58  ;;  %6875 = vmatprep.subr.bf16.mxu1 %v6874_v14  ;;  %v6922_v23 = vpack.c.bf16 %v1947_v22, %v1946_v16  ;;  %v1948_v24 = vld [vmem:[#allocation4 + $0x160] sm:$0xff]  ;;  %v1950_v29 = vld [vmem:[#allocation4 + $0x170] sm:$0xff]  ;;  %v6950_v50 = vpack.c.bf16 %v2083_v48, %v2082_v47  ;;  %v2087_v55 = vld [vmem:[#allocation4 + $0x1e8] sm:$0xff] }
 0x1d3   : > { %1663 = vst [vmem:[#allocation2 + $0x41] sm:$0xff] %v8637_v7  ;;  %v1648_v9 = vadd.f32 %v7450_v25, %v4628_v63  ;;  %v6926_v25 = vpack.c.bf16 %v1949_v26, %v1948_v24  ;;  %v2218_v16 = vld [vmem:[#allocation4 + $0x230] sm:$0xff]  ;;  %v2219_v22 = vld [vmem:[#allocation4 + $0x238] sm:$0xff]  ;;  %v2220_v24 = vld [vmem:[#allocation4 + $0x240] sm:$0xff] }
 0x1d4   : > { %1662 = vst [vmem:[#allocation2 + $0x31] sm:$0xff] %v8640_v3  ;;  %v1647_v37 = vadd.f32 %v7451_v30, %v4628_v63  ;;  %v5713_v38 = vpop.f32.mrb[6].mxu0  ;;  %5750 = vmatmul.mubr.f32.gmra.mrb[10].mxu1 %v8640_v3  ;;  %v1951_v30 = vld [vmem:[#allocation4 + $0x178] sm:$0xff]  ;;  %v2221_v26 = vld [vmem:[#allocation4 + $0x248] sm:$0xff]  ;;  %v2354_v47 = vld [vmem:[#allocation4 + $0x2a0] sm:$0xff] }
 0x1d5   : > { %v8645_v15 = vmax.f32 %v1648_v9, 0.0  ;;  %v7452_v17 = vadd.f32 %v5713_v38, %v5493_v59  ;;  %v1619_v27 = vpop.f32.mrb[7].mxu0  ;;  %6877 = vmatpush3.bf16.msra.mxu1 %v6874_v14  ;;  %5752 = vmatprep.mubr.f32.mxu1 %v8637_v7  ;;  %v1940_v59 = vld [vmem:[#allocation4 + $0x120] sm:$0xff]  ;;  %v2077_v38 = vld [vmem:[#allocation4 + $0x198] sm:$0xff]  ;;  %v2355_v48 = vld [vmem:[#allocation4 + $0x2a8] sm:$0xff] }
 0x1d6   : > { %v8648_v39 = vmax.f32 %v1647_v37, 0.0  ;;  %v7453_v28 = vadd.f32 %v1619_v27, %v926_v61  ;;  %6879 = vmatprep.subr.bf16.mxu1 %v6878_v32  ;;  %v1941_v61 = vld [vmem:[#allocation4 + $0x128] sm:$0xff]  ;;  %v8665_v62 = vld [vmem:[#allocation2 + $0x20] sm:$0xff]  ;;  %v2076_v37 = vld [vmem:[#allocation4 + $0x190] sm:$0xff] }
 0x1d7   : > { %1665 = vst [vmem:[#allocation2 + $0x61] sm:$0xff] %v8645_v15  ;;  %v1650_v36 = vadd.f32 %v7452_v17, %v4628_v63  ;;  %v8662_v58 = vld [vmem:[#allocation2 + $0x10] sm:$0xff]  ;;  %v2074_v9 = vld [vmem:[#allocation4 + $0x180] sm:$0xff]  ;;  %v6938_v17 = vpack.c.bf16 %v2077_v38, %v2076_v37 }
 0x1d8   : > { %1664 = vst [vmem:[#allocation2 + $0x51] sm:$0xff] %v8648_v39  ;;  %v1649_v41 = vadd.f32 %v7453_v28, %v4628_v63  ;;  %5753 = vmatmul.mubr.f32.gmra.mrb[12].mxu1 %v8648_v39  ;;  %v6910_v63 = vpack.c.bf16 %v1941_v61, %v1940_v59  ;;  %v6934_v34 = vpack.c.bf16 %v2075_v19, %v2074_v9  ;;  %v8683_v27 = vld [vmem:[#allocation2 + $0x12] sm:$0xff]  ;;  %v2078_v28 = vld [vmem:[#allocation4 + $0x1a0] sm:$0xff] }
 0x1d9   : > { %v8653_v42 = vmax.f32 %v1650_v36, 0.0  ;;  %6881 = vmatpush3.bf16.msra.mxu1 %v6878_v32  ;;  %5755 = vmatprep.mubr.f32.mxu1 %v8645_v15  ;;  %v6930_v32 = vpack.c.bf16 %v1951_v30, %v1950_v29  ;;  %v8686_v36 = vld [vmem:[#allocation2 + $0x22] sm:$0xff]  ;;  %v2089_v59 = vld [vmem:[#allocation4 + $0x1f8] sm:$0xff]  ;;  %v2222_v30 = vld [vmem:[#allocation4 + $0x250] sm:$0xff] }
 0x1da   : > { %v8656_v43 = vmax.f32 %v1649_v41, 0.0  ;;  %6883 = vmatprep.subr.bf16.mxu1 %v6882_v40  ;;  %v8671_v5 = vld [vmem:[#allocation2 + $0x40] sm:$0xff]  ;;  %v2080_v41 = vld [vmem:[#allocation4 + $0x1b0] sm:$0xff] }
 0x1db   : > { %1667 = vst [vmem:[#allocation2 + $0x81] sm:$0xff] %v8653_v42  ;;  %v8668_v0 = vld [vmem:[#allocation2 + $0x30] sm:$0xff]  ;;  %v8692_v45 = vld [vmem:[#allocation2 + $0x42] sm:$0xff] }
 0x1dc   : > { %1666 = vst [vmem:[#allocation2 + $0x71] sm:$0xff] %v8656_v43  ;;  %5756 = vmatmul.mubr.f32.gmra.mrb[14].mxu1 %v8656_v43  ;;  %v8689_v31 = vld [vmem:[#allocation2 + $0x32] sm:$0xff]  ;;  %v2224_v19 = vld [vmem:[#allocation4 + $0x260] sm:$0xff] }
 0x1dd   : > { %6885 = vmatpush3.bf16.msra.mxu1 %v6882_v40  ;;  %5790 = vmatprep.mubr.f32.mxu1 %v7837_v35  ;;  %v2079_v40 = vld [vmem:[#allocation4 + $0x1a8] sm:$0xff]  ;;  %v2226_v38 = vld [vmem:[#allocation4 + $0x270] sm:$0xff] }
 0x1de   : > { %6887 = vmatprep.subr.bf16.mxu1 %v6886_v44  ;;  %v8677_v6 = vld [vmem:[#allocation2 + $0x60] sm:$0xff]  ;;  %v6942_v21 = vpack.c.bf16 %v2079_v40, %v2078_v28 }
 0x1df   : > { %v8674_v10 = vld [vmem:[#allocation2 + $0x50] sm:$0xff]  ;;  %v2350_v40 = vld [vmem:[#allocation4 + $0x280] sm:$0xff] }
 0x1e1   : > { %6889 = vmatpush3.bf16.msra.mxu1 %v6886_v44  ;;  %v2081_v44 = vld [vmem:[#allocation4 + $0x1b8] sm:$0xff] }
 0x1e2   : > { %6891 = vmatprep.subr.bf16.mxu1 %v6890_v33  ;;  %v6946_v46 = vpack.c.bf16 %v2081_v44, %v2080_v41  ;;  %v8711_v29 = vld [vmem:[#allocation2 + $0x80] sm:$0xff]  ;;  %v2352_v44 = vld [vmem:[#allocation4 + $0x290] sm:$0xff] }
 0x1e3   : > { %v8680_v14 = vld [vmem:[#allocation2 + $0x70] sm:$0xff] }
 0x1e4   : > { %v8701_v51 = vld [vmem:[#allocation2 + $0x72] sm:$0xff] }
 0x1e5   : > { %6893 = vmatpush3.bf16.msra.mxu1 %v6890_v33  ;;  %v8695_v33 = vld [vmem:[#allocation2 + $0x52] sm:$0xff] }
 0x1e6   : > { %6895 = vmatprep.subr.bf16.mxu1 %v6894_v49 }
 0x1e9   : > { %6897 = vmatpush3.bf16.msra.mxu1 %v6894_v49  ;;  %v8698_v49 = vld [vmem:[#allocation2 + $0x62] sm:$0xff] }
 0x1ea   : > { %6899 = vmatprep.subr.bf16.mxu1 %v6898_v52 }
 0x1ed   : > { %6901 = vmatpush3.bf16.msra.mxu1 %v6898_v52  ;;  %v2084_v52 = vld [vmem:[#allocation4 + $0x1d0] sm:$0xff] }
 0x1ee   : > { %6903 = vmatprep.subr.bf16.mxu1 %v6902_v54  ;;  %v6954_v53 = vpack.c.bf16 %v2085_v60, %v2084_v52  ;;  %v2356_v52 = vld [vmem:[#allocation4 + $0x2b0] sm:$0xff]  ;;  %v2357_v60 = vld [vmem:[#allocation4 + $0x2b8] sm:$0xff] }
 0x1f0   : > { %5791 = vmatmul.mubr.f32.vlgmr.msra.gmra.mrb[8].mxu1 %v8662_v58 }
 0x1f1   : > { %5793 = vmatprep.mubr.f32.mxu1 %v8665_v62  ;;  %6905 = vmatpush3.bf16.msra.mxu1 %v6902_v54  ;;  %v2086_v54 = vld [vmem:[#allocation4 + $0x1e0] sm:$0xff] }
 0x1f2   : > { %6907 = vmatprep.subr.bf16.mxu1 %v6906_v57  ;;  %v6958_v56 = vpack.c.bf16 %v2087_v55, %v2086_v54  ;;  %v2358_v54 = vld [vmem:[#allocation4 + $0x2c0] sm:$0xff]  ;;  %v2359_v55 = vld [vmem:[#allocation4 + $0x2c8] sm:$0xff] }
 0x1f4   : > { %5794 = vmatmul.mubr.f32.gmra.mrb[10].mxu1 %v8668_v0 }
 0x1f5   : > { %5796 = vmatprep.mubr.f32.mxu1 %v8671_v5  ;;  %6909 = vmatpush3.bf16.msra.mxu1 %v6906_v57  ;;  %v2088_v57 = vld [vmem:[#allocation4 + $0x1f0] sm:$0xff] }
 0x1f6   : > { %6911 = vmatprep.subr.bf16.mxu1 %v6910_v63  ;;  %v6962_v61 = vpack.c.bf16 %v2089_v59, %v2088_v57  ;;  %v2360_v57 = vld [vmem:[#allocation4 + $0x2d0] sm:$0xff]  ;;  %v2361_v59 = vld [vmem:[#allocation4 + $0x2d8] sm:$0xff] }
 0x1f8   : > { %5797 = vmatmul.mubr.f32.gmra.mrb[12].mxu1 %v8674_v10 }
 0x1f9   : > { %5799 = vmatprep.mubr.f32.mxu1 %v8677_v6  ;;  %6913 = vmatpush3.bf16.msra.mxu1 %v6910_v63  ;;  %v2212_v63 = vld [vmem:[#allocation4 + $0x200] sm:$0xff] }
 0x1fa   : > { %6915 = vmatprep.subr.bf16.mxu1 %v6914_v8  ;;  %v6966_v2 = vpack.c.bf16 %v2213_v1, %v2212_v63  ;;  %v2960_v63 = vld [vmem:[#allocation7 + $0x88] sm:$0xff]  ;;  %v2961_v1 = vld [vmem:[#allocation7 + $0x90] sm:$0xff] }
 0x1fc   : > { %5800 = vmatmul.mubr.f32.gmra.mrb[14].mxu1 %v8680_v14 }
 0x1fd   : > { %6917 = vmatpush3.bf16.msra.mxu1 %v6914_v8  ;;  %5834 = vmatprep.mubr.f32.mxu1 %v1927_v20  ;;  %v2214_v8 = vld [vmem:[#allocation4 + $0x210] sm:$0xff] }
 0x1fe   : > { %6919 = vmatprep.subr.bf16.mxu1 %v6918_v13 }
 0x201   : > { %6921 = vmatpush3.bf16.msra.mxu1 %v6918_v13  ;;  %v2217_v13 = vld [vmem:[#allocation4 + $0x228] sm:$0xff] }
 0x202   : > { %6923 = vmatprep.subr.bf16.mxu1 %v6922_v23  ;;  %v6974_v20 = vpack.c.bf16 %v2217_v13, %v2216_v4  ;;  %v2963_v4 = vld [vmem:[#allocation7 + $0xa0] sm:$0xff]  ;;  %v2964_v13 = vld [vmem:[#allocation7 + $0xa8] sm:$0xff] }
 0x205   : > { %6925 = vmatpush3.bf16.msra.mxu1 %v6922_v23  ;;  %v6978_v23 = vpack.c.bf16 %v2219_v22, %v2218_v16  ;;  %v2363_v16 = vld [vmem:[#allocation4 + $0x2e8] sm:$0xff]  ;;  %v7134_v22 = vpack.c.bf16 %v2964_v13, %v2963_v4  ;;  %v2629_v4 = vld [vmem:[#allocation4 + $0x390] sm:$0xff]  ;;  %v2630_v13 = vld [vmem:[#allocation4 + $0x398] sm:$0xff] }
 0x206   : > { %6927 = vmatprep.subr.bf16.mxu1 %v6926_v25 }
 0x209   : > { %6929 = vmatpush3.bf16.msra.mxu1 %v6926_v25  ;;  %v6982_v25 = vpack.c.bf16 %v2221_v26, %v2220_v24  ;;  %v2965_v24 = vld [vmem:[#allocation7 + $0xb0] sm:$0xff]  ;;  %v2966_v26 = vld [vmem:[#allocation7 + $0xb8] sm:$0xff] }
 0x20a   : > { %6931 = vmatprep.subr.bf16.mxu1 %v6930_v32 }
 0x20d   : > { %6933 = vmatpush3.bf16.msra.mxu1 %v6930_v32  ;;  %v2223_v32 = vld [vmem:[#allocation4 + $0x258] sm:$0xff] }
 0x20e   : > { %6935 = vmatprep.subr.bf16.mxu1 %v6934_v34  ;;  %v6986_v9 = vpack.c.bf16 %v2223_v32, %v2222_v30  ;;  %v7138_v30 = vpack.c.bf16 %v2966_v26, %v2965_v24  ;;  %v2634_v24 = vld [vmem:[#allocation4 + $0x3b8] sm:$0xff] }
 0x210   : > { %5835 = vmatmul.mubr.f32.vlgmr.msra.gmra.mrb[8].mxu1 %v8683_v27 }
 0x211   : > { %5837 = vmatprep.mubr.f32.mxu1 %v8686_v36  ;;  %6937 = vmatpush3.bf16.msra.mxu1 %v6934_v34  ;;  %v2225_v34 = vld [vmem:[#allocation4 + $0x268] sm:$0xff] }
 0x212   : > { %6939 = vmatprep.subr.bf16.mxu1 %v6938_v17  ;;  %v6990_v37 = vpack.c.bf16 %v2225_v34, %v2224_v19  ;;  %v2968_v19 = vld [vmem:[#allocation7 + $0xc8] sm:$0xff]  ;;  %v2489_v34 = vld [vmem:[#allocation4 + $0x300] sm:$0xff] }
 0x214   : > { %5838 = vmatmul.mubr.f32.gmra.mrb[10].mxu1 %v8689_v31 }
 0x215   : > { %5840 = vmatprep.mubr.f32.mxu1 %v8692_v45  ;;  %6941 = vmatpush3.bf16.msra.mxu1 %v6938_v17  ;;  %v2227_v17 = vld [vmem:[#allocation4 + $0x278] sm:$0xff] }
 0x216   : > { %6943 = vmatprep.subr.bf16.mxu1 %v6942_v21  ;;  %v6994_v28 = vpack.c.bf16 %v2227_v17, %v2226_v38 }
 0x218   : > { %5841 = vmatmul.mubr.f32.gmra.mrb[12].mxu1 %v8695_v33 }
 0x219   : > { %5843 = vmatprep.mubr.f32.mxu1 %v8698_v49  ;;  %6945 = vmatpush3.bf16.msra.mxu1 %v6942_v21  ;;  %v2351_v21 = vld [vmem:[#allocation4 + $0x288] sm:$0xff] }
 0x21a   : > { %6947 = vmatprep.subr.bf16.mxu1 %v6946_v46  ;;  %v6998_v41 = vpack.c.bf16 %v2351_v21, %v2350_v40  ;;  %v2492_v40 = vld [vmem:[#allocation4 + $0x318] sm:$0xff] }
 0x21c   : > { %5844 = vmatmul.mubr.f32.gmra.mrb[14].mxu1 %v8701_v51 }
 0x21d   : > { %6949 = vmatpush3.bf16.msra.mxu1 %v6946_v46  ;;  %5878 = vmatprep.mubr.f32.mxu1 %v8662_v58  ;;  %v6970_v58 = vpack.c.bf16 %v2215_v11, %v2214_v8  ;;  %v2353_v46 = vld [vmem:[#allocation4 + $0x298] sm:$0xff]  ;;  %v7018_v11 = vpack.c.bf16 %v2361_v59, %v2360_v57  ;;  %v2501_v57 = vld [vmem:[#allocation4 + $0x360] sm:$0xff]  ;;  %v2502_v59 = vld [vmem:[#allocation4 + $0x368] sm:$0xff] }
 0x21e   : > { %6951 = vmatprep.subr.bf16.mxu1 %v6950_v50  ;;  %v2962_v8 = vld [vmem:[#allocation7 + $0x98] sm:$0xff] }
 0x221   : > { %6953 = vmatpush3.bf16.msra.mxu1 %v6950_v50  ;;  %v7006_v50 = vpack.c.bf16 %v2355_v48, %v2354_v47  ;;  %v2496_v47 = vld [vmem:[#allocation4 + $0x338] sm:$0xff] }
 0x222   : > { %6955 = vmatprep.subr.bf16.mxu1 %v6954_v53 }
 0x225   : > { %6957 = vmatpush3.bf16.msra.mxu1 %v6954_v53  ;;  %v7010_v53 = vpack.c.bf16 %v2357_v60, %v2356_v52  ;;  %v2498_v52 = vld [vmem:[#allocation4 + $0x348] sm:$0xff] }
 0x226   : > { %6959 = vmatprep.subr.bf16.mxu1 %v6958_v56 }
 0x229   : > { %6961 = vmatpush3.bf16.msra.mxu1 %v6958_v56  ;;  %v7014_v56 = vpack.c.bf16 %v2359_v55, %v2358_v54  ;;  %v2499_v54 = vld [vmem:[#allocation4 + $0x350] sm:$0xff]  ;;  %v2500_v55 = vld [vmem:[#allocation4 + $0x358] sm:$0xff] }
 0x22a   : > { %6963 = vmatprep.subr.bf16.mxu1 %v6962_v61 }
 0x22d   : > { %6965 = vmatpush3.bf16.msra.mxu1 %v6962_v61  ;;  %v2959_v61 = vld [vmem:[#allocation7 + $0x80] sm:$0xff] }
 0x22e   : > { %6967 = vmatprep.subr.bf16.mxu1 %v6966_v2 }
 0x230   : > { %5879 = vmatmul.mubr.f32.vlgmr.msra.gmra.mrb[8].mxu1 %v8665_v62 }
 0x231   : > { %5881 = vmatprep.mubr.f32.mxu1 %v8668_v0  ;;  %6969 = vmatpush3.bf16.msra.mxu1 %v6966_v2  ;;  %v7126_v2 = vpack.c.bf16 %v2960_v63, %v2959_v61  ;;  %v7054_v61 = vpack.c.bf16 %v2502_v59, %v2501_v57  ;;  %v2503_v63 = vld [vmem:[#allocation4 + $0x370] sm:$0xff]  ;;  %v2971_v59 = vld [vmem:[#allocation7 + $0xe0] sm:$0xff] }
 0x232   : > { %6971 = vmatprep.subr.bf16.mxu1 %v6970_v58 }
 0x233   : > { %7127 = vmatprep.subr.bf16.mxu0 %v7126_v2 }
 0x234   : > { %5882 = vmatmul.mubr.f32.gmra.mrb[10].mxu1 %v8671_v5  ;;  %7129 = vmatpush3.bf16.msra.mxu0 %v7126_v2 }
 0x235   : > { %5884 = vmatprep.mubr.f32.mxu1 %v8674_v10  ;;  %6973 = vmatpush3.bf16.msra.mxu1 %v6970_v58  ;;  %v7130_v58 = vpack.c.bf16 %v2962_v8, %v2961_v1  ;;  %v2504_v1 = vld [vmem:[#allocation4 + $0x378] sm:$0xff]  ;;  %v2627_v8 = vld [vmem:[#allocation4 + $0x380] sm:$0xff] }
 0x236   : > { %6975 = vmatprep.subr.bf16.mxu1 %v6974_v20  ;;  %v7058_v2 = vpack.c.bf16 %v2504_v1, %v2503_v63  ;;  %v2950_v1 = vld [vmem:[#allocation3 + $0x1] sm:$0xff] }
 0x237   : > { %7131 = vmatprep.subr.bf16.mxu0 %v7130_v58  ;;  %6142 = vmatprep.mubr.f32.mxu0 %v2950_v1 }
 0x238   : > { %5885 = vmatmul.mubr.f32.gmra.mrb[12].mxu1 %v8677_v6  ;;  %7133 = vmatpush3.bf16.msra.mxu0 %v7130_v58 }
 0x239   : > { %5887 = vmatprep.mubr.f32.mxu1 %v8680_v14  ;;  %6977 = vmatpush3.bf16.msra.mxu1 %v6974_v20  ;;  %v2362_v20 = vld [vmem:[#allocation4 + $0x2e0] sm:$0xff] }
 0x23a   : > { %6979 = vmatprep.subr.bf16.mxu1 %v6978_v23  ;;  %7135 = vmatprep.subr.bf16.mxu0 %v7134_v22 }
 0x23c   : > { %5888 = vmatmul.mubr.f32.gmra.mrb[14].mxu1 %v8711_v29  ;;  %7137 = vmatpush3.bf16.msra.mxu0 %v7134_v22 }
 0x23d   : > { %6981 = vmatpush3.bf16.msra.mxu1 %v6978_v23  ;;  %5922 = vmatprep.mubr.f32.mxu1 %v8632_v18  ;;  %v7002_v18 = vpack.c.bf16 %v2353_v46, %v2352_v44  ;;  %v7022_v23 = vpack.c.bf16 %v2363_v16, %v2362_v20  ;;  %v2494_v44 = vld [vmem:[#allocation4 + $0x328] sm:$0xff]  ;;  %v2631_v20 = vld [vmem:[#allocation4 + $0x3a0] sm:$0xff] }
 0x23e   : > { %6983 = vmatprep.subr.bf16.mxu1 %v6982_v25  ;;  %7139 = vmatprep.subr.bf16.mxu0 %v7138_v30  ;;  %v2632_v16 = vld [vmem:[#allocation4 + $0x3a8] sm:$0xff] }
 0x23f   : > { %v7070_v22 = vpack.c.bf16 %v2632_v16, %v2631_v20 }
 0x240   : > { %7141 = vmatpush3.bf16.msra.mxu0 %v7138_v30  ;;  %v2638_v30 = vld [vmem:[#allocation4 + $0x3d8] sm:$0xff] }
 0x241   : > { %6985 = vmatpush3.bf16.msra.mxu1 %v6982_v25  ;;  %v2364_v25 = vld [vmem:[#allocation4 + $0x2f0] sm:$0xff] }
 0x242   : > { %6987 = vmatprep.subr.bf16.mxu1 %v6986_v9 }
 0x245   : > { %6989 = vmatpush3.bf16.msra.mxu1 %v6986_v9  ;;  %v2967_v9 = vld [vmem:[#allocation7 + $0xc0] sm:$0xff] }
 0x246   : > { %6991 = vmatprep.subr.bf16.mxu1 %v6990_v37  ;;  %v7142_v38 = vpack.c.bf16 %v2968_v19, %v2967_v9  ;;  %v2642_v19 = vld [vmem:[#allocation4 + $0x3f8] sm:$0xff] }
 0x248   : > { %7143 = vmatprep.subr.bf16.mxu0 %v7142_v38 }
 0x249   : > { %6993 = vmatpush3.bf16.msra.mxu1 %v6990_v37  ;;  %v2490_v37 = vld [vmem:[#allocation4 + $0x308] sm:$0xff]  ;;  %7145 = vmatpush3.bf16.msra.mxu0 %v7142_v38  ;;  %v2767_v38 = vld [vmem:[#allocation4 + $0x410] sm:$0xff] }
 0x24a   : > { %6995 = vmatprep.subr.bf16.mxu1 %v6994_v28  ;;  %v7030_v17 = vpack.c.bf16 %v2490_v37, %v2489_v34  ;;  %v2765_v34 = vld [vmem:[#allocation4 + $0x400] sm:$0xff]  ;;  %v2766_v37 = vld [vmem:[#allocation4 + $0x408] sm:$0xff] }
 0x24d   : > { %6997 = vmatpush3.bf16.msra.mxu1 %v6994_v28  ;;  %v2491_v28 = vld [vmem:[#allocation4 + $0x310] sm:$0xff] }
 0x24e   : > { %6999 = vmatprep.subr.bf16.mxu1 %v6998_v41  ;;  %v7034_v21 = vpack.c.bf16 %v2492_v40, %v2491_v28  ;;  %v2769_v28 = vld [vmem:[#allocation4 + $0x420] sm:$0xff]  ;;  %v2770_v40 = vld [vmem:[#allocation4 + $0x428] sm:$0xff] }
 0x250   : > { %5923 = vmatmul.mubr.f32.vlgmr.msra.gmra.mrb[8].mxu1 %v8630_v12 }
 0x251   : > { %5925 = vmatprep.mubr.f32.mxu1 %v8640_v3  ;;  %7001 = vmatpush3.bf16.msra.mxu1 %v6998_v41  ;;  %v2493_v41 = vld [vmem:[#allocation4 + $0x320] sm:$0xff] }
 0x252   : > { %7003 = vmatprep.subr.bf16.mxu1 %v7002_v18  ;;  %v7038_v46 = vpack.c.bf16 %v2494_v44, %v2493_v41  ;;  %v2771_v41 = vld [vmem:[#allocation4 + $0x430] sm:$0xff]  ;;  %v2772_v44 = vld [vmem:[#allocation4 + $0x438] sm:$0xff] }
 0x254   : > { %5926 = vmatmul.mubr.f32.gmra.mrb[10].mxu1 %v8637_v7 }
 0x255   : > { %5928 = vmatprep.mubr.f32.mxu1 %v8648_v39  ;;  %7005 = vmatpush3.bf16.msra.mxu1 %v7002_v18  ;;  %v2495_v18 = vld [vmem:[#allocation4 + $0x330] sm:$0xff] }
 0x256   : > { %7007 = vmatprep.subr.bf16.mxu1 %v7006_v50  ;;  %v7042_v48 = vpack.c.bf16 %v2496_v47, %v2495_v18  ;;  %v2773_v18 = vld [vmem:[#allocation4 + $0x440] sm:$0xff]  ;;  %v2774_v47 = vld [vmem:[#allocation4 + $0x448] sm:$0xff] }
 0x258   : > { %5929 = vmatmul.mubr.f32.gmra.mrb[12].mxu1 %v8645_v15 }
 0x259   : > { %5931 = vmatprep.mubr.f32.mxu1 %v8656_v43  ;;  %7009 = vmatpush3.bf16.msra.mxu1 %v7006_v50  ;;  %v2497_v50 = vld [vmem:[#allocation4 + $0x340] sm:$0xff] }
 0x25a   : > { %7011 = vmatprep.subr.bf16.mxu1 %v7010_v53  ;;  %v7046_v60 = vpack.c.bf16 %v2498_v52, %v2497_v50  ;;  %v2776_v50 = vld [vmem:[#allocation4 + $0x458] sm:$0xff]  ;;  %v2778_v52 = vld [vmem:[#allocation4 + $0x468] sm:$0xff] }
 0x25c   : > { %5932 = vmatmul.mubr.f32.gmra.mrb[14].mxu1 %v8653_v42 }
 0x25d   : > { %7013 = vmatpush3.bf16.msra.mxu1 %v7010_v53  ;;  %5966 = vmatprep.mubr.f32.mxu1 %v8683_v27  ;;  %v2365_v27 = vld [vmem:[#allocation4 + $0x2f8] sm:$0xff]  ;;  %v8729_v53 = vld [vmem:[#allocation2 + $0x82] sm:$0xff] }
 0x25e   : > { %7015 = vmatprep.subr.bf16.mxu1 %v7014_v56  ;;  %v7026_v32 = vpack.c.bf16 %v2365_v27, %v2364_v25  ;;  %v2635_v25 = vld [vmem:[#allocation4 + $0x3c0] sm:$0xff]  ;;  %v2636_v27 = vld [vmem:[#allocation4 + $0x3c8] sm:$0xff] }
 0x261   : > { %7017 = vmatpush3.bf16.msra.mxu1 %v7014_v56  ;;  %v7050_v56 = vpack.c.bf16 %v2500_v55, %v2499_v54  ;;  %v2780_v54 = vld [vmem:[#allocation4 + $0x478] sm:$0xff]  ;;  %v2969_v55 = vld [vmem:[#allocation7 + $0xd0] sm:$0xff] }
 0x262   : > { %7019 = vmatprep.subr.bf16.mxu1 %v7018_v11 }
 0x265   : > { %7021 = vmatpush3.bf16.msra.mxu1 %v7018_v11  ;;  %v2628_v11 = vld [vmem:[#allocation4 + $0x388] sm:$0xff] }
 0x266   : > { %7023 = vmatprep.subr.bf16.mxu1 %v7022_v23  ;;  %v7062_v58 = vpack.c.bf16 %v2628_v11, %v2627_v8 }
 0x269   : > { %7025 = vmatpush3.bf16.msra.mxu1 %v7022_v23  ;;  %v2633_v23 = vld [vmem:[#allocation4 + $0x3b0] sm:$0xff] }
 0x26a   : > { %7027 = vmatprep.subr.bf16.mxu1 %v7026_v32  ;;  %v7074_v26 = vpack.c.bf16 %v2634_v24, %v2633_v23 }
 0x26d   : > { %7029 = vmatpush3.bf16.msra.mxu1 %v7026_v32  ;;  %v2640_v32 = vld [vmem:[#allocation4 + $0x3e8] sm:$0xff] }
 0x26e   : > { %7031 = vmatprep.subr.bf16.mxu1 %v7030_v17 }
 0x270   : > { %5967 = vmatmul.mubr.f32.vlgmr.msra.gmra.mrb[8].mxu1 %v8686_v36 }
 0x271   : > { %5969 = vmatprep.mubr.f32.mxu1 %v8689_v31  ;;  %7033 = vmatpush3.bf16.msra.mxu1 %v7030_v17  ;;  %v2768_v17 = vld [vmem:[#allocation4 + $0x418] sm:$0xff] }
 0x272   : > { %7035 = vmatprep.subr.bf16.mxu1 %v7034_v21 }
 0x274   : > { %5970 = vmatmul.mubr.f32.gmra.mrb[10].mxu1 %v8692_v45 }
 0x275   : > { %5972 = vmatprep.mubr.f32.mxu1 %v8695_v33  ;;  %7037 = vmatpush3.bf16.msra.mxu1 %v7034_v21  ;;  %v7102_v21 = vpack.c.bf16 %v2770_v40, %v2769_v28  ;;  %v2942_v28 = vld [vmem:[#allocation7 + $0x40] sm:$0xff]  ;;  %v2943_v40 = vld [vmem:[#allocation7 + $0x48] sm:$0xff] }
 0x276   : > { %7039 = vmatprep.subr.bf16.mxu1 %v7038_v46 }
 0x278   : > { %5973 = vmatmul.mubr.f32.gmra.mrb[12].mxu1 %v8698_v49 }
 0x279   : > { %5975 = vmatprep.mubr.f32.mxu1 %v8701_v51  ;;  %7041 = vmatpush3.bf16.msra.mxu1 %v7038_v46  ;;  %v7106_v46 = vpack.c.bf16 %v2772_v44, %v2771_v41 }
 0x27a   : > { %7043 = vmatprep.subr.bf16.mxu1 %v7042_v48 }
 0x27c   : > { %5976 = vmatmul.mubr.f32.gmra.mrb[14].mxu1 %v8729_v53 }
 0x27d   : > { %7045 = vmatpush3.bf16.msra.mxu1 %v7042_v48  ;;  %6010 = vmatprep.mubr.f32.mxu1 %v8665_v62  ;;  %v7066_v62 = vpack.c.bf16 %v2630_v13, %v2629_v4  ;;  %v2775_v48 = vld [vmem:[#allocation4 + $0x450] sm:$0xff]  ;;  %v2937_v13 = vld [vmem:[#allocation7 + $0x18] sm:$0xff] }
 0x27e   : > { %7047 = vmatprep.subr.bf16.mxu1 %v7046_v60  ;;  %v2936_v4 = vld [vmem:[#allocation7 + $0x10] sm:$0xff] }
 0x27f   : > { %v7162_v23 = vpack.c.bf16 %v2937_v13, %v2936_v4  ;;  %v3185_v4 = vld [vmem:[#allocation3 + $0x2] sm:$0xff] }
 0x281   : > { %7049 = vmatpush3.bf16.msra.mxu1 %v7046_v60 }
 0x282   : > { %7051 = vmatprep.subr.bf16.mxu1 %v7050_v56 }
 0x285   : > { %7053 = vmatpush3.bf16.msra.mxu1 %v7050_v56  ;;  %v2970_v56 = vld [vmem:[#allocation7 + $0xd8] sm:$0xff] }
 0x286   : > { %7055 = vmatprep.subr.bf16.mxu1 %v7054_v61  ;;  %v7146_v57 = vpack.c.bf16 %v2970_v56, %v2969_v55  ;;  %v3197_v55 = vld [vmem:[#allocation7 + $0x118] sm:$0xff] }
 0x288   : > { %7147 = vmatprep.subr.bf16.mxu0 %v7146_v57 }
 0x289   : > { %7057 = vmatpush3.bf16.msra.mxu1 %v7054_v61  ;;  %7149 = vmatpush3.bf16.msra.mxu0 %v7146_v57  ;;  %v2972_v61 = vld [vmem:[#allocation7 + $0xe8] sm:$0xff] }
 0x28a   : > { %7059 = vmatprep.subr.bf16.mxu1 %v7058_v2 }
 0x28d   : > { %7061 = vmatpush3.bf16.msra.mxu1 %v7058_v2  ;;  %v4629_v2 = vld [vmem:[%s9014_s4] ss:$0 sm:$0xff] }
 0x28e   : > { %7063 = vmatprep.subr.bf16.mxu1 %v7062_v58 }
 0x290   : > { %6011 = vmatmul.mubr.f32.vlgmr.msra.gmra.mrb[8].mxu1 %v8668_v0  ;;  %v7078_v0 = vpack.c.bf16 %v2636_v27, %v2635_v25  ;;  %v2938_v25 = vld [vmem:[#allocation7 + $0x20] sm:$0xff]  ;;  %v2939_v27 = vld [vmem:[#allocation7 + $0x28] sm:$0xff] }
 0x291   : > { %6013 = vmatprep.mubr.f32.mxu1 %v8671_v5  ;;  %7065 = vmatpush3.bf16.msra.mxu1 %v7062_v58  ;;  %v2637_v5 = vld [vmem:[#allocation4 + $0x3d0] sm:$0xff] }
 0x292   : > { %7067 = vmatprep.subr.bf16.mxu1 %v7066_v62 }
 0x294   : > { %6014 = vmatmul.mubr.f32.gmra.mrb[10].mxu1 %v8674_v10  ;;  %v7082_v10 = vpack.c.bf16 %v2638_v30, %v2637_v5 }
 0x295   : > { %6016 = vmatprep.mubr.f32.mxu1 %v8677_v6  ;;  %7069 = vmatpush3.bf16.msra.mxu1 %v7066_v62  ;;  %v2639_v6 = vld [vmem:[#allocation4 + $0x3e0] sm:$0xff] }
 0x296   : > { %7071 = vmatprep.subr.bf16.mxu1 %v7070_v22  ;;  %v7086_v9 = vpack.c.bf16 %v2640_v32, %v2639_v6  ;;  %v7166_v6 = vpack.c.bf16 %v2939_v27, %v2938_v25  ;;  %v3208_v27 = vld [vmem:[#allocation7 + $0x170] sm:$0xff] }
 0x298   : > { %6017 = vmatmul.mubr.f32.gmra.mrb[12].mxu1 %v8680_v14  ;;  %v2641_v14 = vld [vmem:[#allocation4 + $0x3f0] sm:$0xff] }
 0x299   : > { %6019 = vmatprep.mubr.f32.mxu1 %v8711_v29  ;;  %7073 = vmatpush3.bf16.msra.mxu1 %v7070_v22  ;;  %v7090_v29 = vpack.c.bf16 %v2642_v19, %v2641_v14  ;;  %v2940_v14 = vld [vmem:[#allocation7 + $0x30] sm:$0xff]  ;;  %v2941_v19 = vld [vmem:[#allocation7 + $0x38] sm:$0xff] }
 0x29a   : > { %7075 = vmatprep.subr.bf16.mxu1 %v7074_v26 }
 0x29c   : > { %6020 = vmatmul.mubr.f32.gmra.mrb[14].mxu1 %v7837_v35  ;;  %v7094_v35 = vpack.c.bf16 %v2766_v37, %v2765_v34 }
 0x29d   : > { %7077 = vmatpush3.bf16.msra.mxu1 %v7074_v26  ;;  %6054 = vmatprep.mubr.f32.mxu1 %v8630_v12  ;;  %v7098_v12 = vpack.c.bf16 %v2768_v17, %v2767_v38  ;;  %v7170_v38 = vpack.c.bf16 %v2941_v19, %v2940_v14  ;;  %v3334_v14 = vld [vmem:[#allocation7 + $0x190] sm:$0xff]  ;;  %v3335_v19 = vld [vmem:[#allocation7 + $0x198] sm:$0xff] }
 0x29e   : > { %7079 = vmatprep.subr.bf16.mxu1 %v7078_v0 }
 0x2a1   : > { %7081 = vmatpush3.bf16.msra.mxu1 %v7078_v0 }
 0x2a2   : > { %7083 = vmatprep.subr.bf16.mxu1 %v7082_v10 }
 0x2a5   : > { %7085 = vmatpush3.bf16.msra.mxu1 %v7082_v10 }
 0x2a6   : > { %7087 = vmatprep.subr.bf16.mxu1 %v7086_v9 }
 0x2a9   : > { %7089 = vmatpush3.bf16.msra.mxu1 %v7086_v9 }
 0x2aa   : > { %7091 = vmatprep.subr.bf16.mxu1 %v7090_v29 }
 0x2ad   : > { %7093 = vmatpush3.bf16.msra.mxu1 %v7090_v29 }
 0x2ae   : > { %7095 = vmatprep.subr.bf16.mxu1 %v7094_v35 }
 0x2b0   : > { %6055 = vmatmul.mubr.f32.vlgmr.msra.gmra.mrb[8].mxu1 %v8640_v3  ;;  %v7110_v3 = vpack.c.bf16 %v2774_v47, %v2773_v18  ;;  %v2944_v18 = vld [vmem:[#allocation7 + $0x50] sm:$0xff]  ;;  %v2945_v47 = vld [vmem:[#allocation7 + $0x58] sm:$0xff] }
 0x2b1   : > { %6057 = vmatprep.mubr.f32.mxu1 %v8637_v7  ;;  %7097 = vmatpush3.bf16.msra.mxu1 %v7094_v35  ;;  %v2625_v7 = vld [vmem:[#allocation2 + $0x91] sm:$0xff] }
 0x2b2   : > { %7099 = vmatprep.subr.bf16.mxu1 %v7098_v12 }
 0x2b4   : > { %6058 = vmatmul.mubr.f32.gmra.mrb[10].mxu1 %v8648_v39  ;;  %v2777_v39 = vld [vmem:[#allocation4 + $0x460] sm:$0xff] }
 0x2b5   : > { %6060 = vmatprep.mubr.f32.mxu1 %v8645_v15  ;;  %7101 = vmatpush3.bf16.msra.mxu1 %v7098_v12  ;;  %v7114_v15 = vpack.c.bf16 %v2776_v50, %v2775_v48  ;;  %v7118_v60 = vpack.c.bf16 %v2778_v52, %v2777_v39  ;;  %v2946_v48 = vld [vmem:[#allocation7 + $0x60] sm:$0xff]  ;;  %v2947_v50 = vld [vmem:[#allocation7 + $0x68] sm:$0xff]  ;;  %v2948_v39 = vld [vmem:[#allocation7 + $0x70] sm:$0xff] }
 0x2b6   : > { %7103 = vmatprep.subr.bf16.mxu1 %v7102_v21  ;;  %v2949_v52 = vld [vmem:[#allocation7 + $0x78] sm:$0xff] }
 0x2b8   : > { %6061 = vmatmul.mubr.f32.gmra.mrb[12].mxu1 %v8656_v43  ;;  %v2779_v43 = vld [vmem:[#allocation4 + $0x470] sm:$0xff] }
 0x2b9   : > { %6063 = vmatprep.mubr.f32.mxu1 %v8653_v42  ;;  %7105 = vmatpush3.bf16.msra.mxu1 %v7102_v21  ;;  %v7122_v42 = vpack.c.bf16 %v2780_v54, %v2779_v43  ;;  %v3194_v43 = vld [vmem:[#allocation7 + $0x100] sm:$0xff]  ;;  %v3195_v54 = vld [vmem:[#allocation7 + $0x108] sm:$0xff] }
 0x2ba   : > { %7107 = vmatprep.subr.bf16.mxu1 %v7106_v46 }
 0x2bc   : > { %6064 = vmatmul.mubr.f32.gmra.mrb[14].mxu1 %v2625_v7  ;;  %v8788_v7 = vld [vmem:[#allocation2] sm:$0xff] }
 0x2bd   : > { %7109 = vmatpush3.bf16.msra.mxu1 %v7106_v46  ;;  %6098 = vmatprep.mubr.f32.mxu1 %v8686_v36  ;;  %v2763_v36 = vld [vmem:[#allocation2 + $0x92] sm:$0xff]  ;;  %v7174_v46 = vpack.c.bf16 %v2943_v40, %v2942_v28 }
 0x2be   : > { %7111 = vmatprep.subr.bf16.mxu1 %v7110_v3 }
 0x2c1   : > { %7113 = vmatpush3.bf16.msra.mxu1 %v7110_v3  ;;  %v7178_v3 = vpack.c.bf16 %v2945_v47, %v2944_v18 }
 0x2c2   : > { %7115 = vmatprep.subr.bf16.mxu1 %v7114_v15 }
 0x2c5   : > { %7117 = vmatpush3.bf16.msra.mxu1 %v7114_v15  ;;  %v7182_v15 = vpack.c.bf16 %v2947_v50, %v2946_v48  ;;  %v3340_v48 = vld [vmem:[#allocation7 + $0x1c0] sm:$0xff]  ;;  %v3341_v50 = vld [vmem:[#allocation7 + $0x1c8] sm:$0xff] }
 0x2c6   : > { %7119 = vmatprep.subr.bf16.mxu1 %v7118_v60 }
 0x2c9   : > { %7121 = vmatpush3.bf16.msra.mxu1 %v7118_v60  ;;  %v7186_v60 = vpack.c.bf16 %v2949_v52, %v2948_v39  ;;  %v7238_v39 = vpack.c.bf16 %v3341_v50, %v3340_v48  ;;  %v4191_v50 = vld [vmem:[%s9017_s7 + $0x40] sm:$0xff] }
 0x2ca   : > { %7123 = vmatprep.subr.bf16.mxu1 %v7122_v42 }
 0x2cd   : > { %7125 = vmatpush3.bf16.msra.mxu1 %v7122_v42  ;;  %v7190_v42 = vpack.c.bf16 %v3195_v54, %v3194_v43  ;;  %v3343_v43 = vld [vmem:[#allocation7 + $0x1d8] sm:$0xff] }
 0x2d0   : > { %6099 = vmatmul.mubr.f32.vlgmr.msra.gmra.mrb[8].mxu1 %v8689_v31  ;;  %v7150_v31 = vpack.c.bf16 %v2972_v61, %v2971_v59  ;;  %v3198_v59 = vld [vmem:[#allocation7 + $0x120] sm:$0xff]  ;;  %v3199_v61 = vld [vmem:[#allocation7 + $0x128] sm:$0xff] }
 0x2d1   : > { %6101 = vmatprep.mubr.f32.mxu1 %v8692_v45  ;;  %v2973_v45 = vld [vmem:[#allocation7 + $0xf0] sm:$0xff] }
 0x2d2   : > { %7151 = vmatprep.subr.bf16.mxu0 %v7150_v31 }
 0x2d3   : > { %7153 = vmatpush3.bf16.msra.mxu0 %v7150_v31 }
 0x2d4   : > { %6102 = vmatmul.mubr.f32.gmra.mrb[10].mxu1 %v8695_v33  ;;  %v2974_v33 = vld [vmem:[#allocation7 + $0xf8] sm:$0xff] }
 0x2d5   : > { %6104 = vmatprep.mubr.f32.mxu1 %v8698_v49  ;;  %v7154_v63 = vpack.c.bf16 %v2974_v33, %v2973_v45  ;;  %v2934_v49 = vld [vmem:[#allocation7] sm:$0xff]  ;;  %v7198_v45 = vpack.c.bf16 %v3199_v61, %v3198_v59  ;;  %v3347_v59 = vld [vmem:[#allocation7 + $0x1f8] sm:$0xff] }
 0x2d7   : > { %7155 = vmatprep.subr.bf16.mxu0 %v7154_v63 }
 0x2d8   : > { %6105 = vmatmul.mubr.f32.gmra.mrb[12].mxu1 %v8701_v51  ;;  %7157 = vmatpush3.bf16.msra.mxu0 %v7154_v63  ;;  %v2935_v51 = vld [vmem:[#allocation7 + $0x8] sm:$0xff]  ;;  %v3200_v63 = vld [vmem:[#allocation7 + $0x130] sm:$0xff] }
 0x2d9   : > { %6107 = vmatprep.mubr.f32.mxu1 %v8729_v53  ;;  %v7158_v53 = vpack.c.bf16 %v2935_v51, %v2934_v49  ;;  %v3201_v49 = vld [vmem:[#allocation7 + $0x138] sm:$0xff] }
 0x2db   : > { %7159 = vmatprep.subr.bf16.mxu0 %v7158_v53 }
 0x2dc   : > { %6108 = vmatmul.mubr.f32.gmra.mrb[14].mxu1 %v2763_v36  ;;  %v3196_v36 = vld [vmem:[#allocation7 + $0x110] sm:$0xff] }
 0x2dd   : > { %v7194_v56 = vpack.c.bf16 %v3197_v55, %v3196_v36  ;;  %v3345_v36 = vld [vmem:[#allocation7 + $0x1e8] sm:$0xff] }
 0x3a3   : > { %v6100_v8 = vpop.f32.mrb[8].mxu1 }
 0x3a4   : > { %v2902_v11 = vadd.f32 %v6100_v8, %v4629_v2  ;;  %v2847_v58 = vpop.f32.mrb[9].mxu1  ;;  %v3203_v8 = vld [vmem:[#allocation7 + $0x148] sm:$0xff] }
 0x3a5   : > { %v2901_v62 = vadd.f32 %v4629_v2, %v2847_v58 }
 0x3a6   : > { %v8757_v20 = vmax.f32 %v2902_v11, 0.0 }
 0x3a7   : > { %v8759_v16 = vmax.f32 %v2901_v62, 0.0  ;;  %v6103_v22 = vpop.f32.mrb[10].mxu1  ;;  %v3204_v62 = vld [vmem:[#allocation7 + $0x150] sm:$0xff] }
 0x3a8   : > { %2919 = vst [vmem:[#allocation3 + $0x21] sm:$0xff] %v8757_v20  ;;  %v2904_v24 = vadd.f32 %v6103_v22, %v4629_v2  ;;  %v2857_v26 = vpop.f32.mrb[11].mxu1  ;;  %v3205_v22 = vld [vmem:[#allocation7 + $0x158] sm:$0xff] }
 0x3a9   : > { %2918 = vst [vmem:[#allocation3 + $0x11] sm:$0xff] %v8759_v16  ;;  %v2903_v0 = vadd.f32 %v4629_v2, %v2857_v26  ;;  %6143 = vmatmul.mubr.f32.vlgmr.msra.gmra.mrb[8].mxu0 %v8759_v16  ;;  %v3207_v26 = vld [vmem:[#allocation7 + $0x168] sm:$0xff] }
 0x3aa   : > { %v8764_v5 = vmax.f32 %v2904_v24, 0.0  ;;  %7161 = vmatpush3.bf16.msra.mxu0 %v7158_v53  ;;  %6145 = vmatprep.mubr.f32.mxu0 %v8757_v20  ;;  %v7202_v53 = vpack.c.bf16 %v3201_v49, %v3200_v63  ;;  %v3206_v24 = vld [vmem:[#allocation7 + $0x160] sm:$0xff]  ;;  %v3471_v63 = vld [vmem:[#allocation7 + $0x208] sm:$0xff] }
 0x3ab   : > { %v8767_v30 = vmax.f32 %v2903_v0, 0.0  ;;  %v6106_v10 = vpop.f32.mrb[12].mxu1  ;;  %7163 = vmatprep.subr.bf16.mxu0 %v7162_v23  ;;  %v7214_v25 = vpack.c.bf16 %v3207_v26, %v3206_v24  ;;  %v3209_v0 = vld [vmem:[#allocation7 + $0x178] sm:$0xff]  ;;  %v4185_v24 = vld [vmem:[%s9017_s7 + $0x10] sm:$0xff] }
 0x3ac   : > { %2921 = vst [vmem:[#allocation3 + $0x41] sm:$0xff] %v8764_v5  ;;  %v2906_v32 = vadd.f32 %v6106_v10, %v4629_v2  ;;  %v2867_v9 = vpop.f32.mrb[13].mxu1  ;;  %v7218_v10 = vpack.c.bf16 %v3209_v0, %v3208_v27  ;;  %v4186_v26 = vld [vmem:[%s9017_s7 + $0x18] sm:$0xff] }
 0x3ad   : > { %2920 = vst [vmem:[#allocation3 + $0x31] sm:$0xff] %v8767_v30  ;;  %v2905_v29 = vadd.f32 %v4629_v2, %v2867_v9  ;;  %6146 = vmatmul.mubr.f32.gmra.mrb[10].mxu0 %v8767_v30  ;;  %v3477_v27 = vld [vmem:[#allocation7 + $0x238] sm:$0xff]  ;;  %v7418_v0 = vpack.c.bf16 %v4186_v26, %v4185_v24  ;;  %v3612_v24 = vld [vmem:[#allocation7 + $0x2a0] sm:$0xff]  ;;  %v3613_v26 = vld [vmem:[#allocation7 + $0x2a8] sm:$0xff] }
 0x3ae   : > { %v8772_v34 = vmax.f32 %v2906_v32, 0.0  ;;  %7165 = vmatpush3.bf16.msra.mxu0 %v7162_v23  ;;  %6148 = vmatprep.mubr.f32.mxu0 %v8764_v5  ;;  %v7210_v23 = vpack.c.bf16 %v3205_v22, %v3204_v62  ;;  %v3333_v32 = vld [vmem:[#allocation7 + $0x188] sm:$0xff] }
 0x3af   : > { %v8775_v37 = vmax.f32 %v2905_v29, 0.0  ;;  %v6109_v35 = vpop.f32.mrb[14].mxu1  ;;  %7167 = vmatprep.subr.bf16.mxu0 %v7166_v6  ;;  %v8794_v31 = vld [vmem:[#allocation3 + $0x20] sm:$0xff]  ;;  %v7226_v29 = vpack.c.bf16 %v3335_v19, %v3334_v14  ;;  %v3475_v62 = vld [vmem:[#allocation7 + $0x228] sm:$0xff] }
 0x3b0   : > { %2923 = vst [vmem:[#allocation3 + $0x61] sm:$0xff] %v8772_v34  ;;  %v2908_v17 = vadd.f32 %v6109_v35, %v4629_v2  ;;  %v2877_v12 = vpop.f32.mrb[15].mxu1  ;;  %v8791_v57 = vld [vmem:[#allocation3 + $0x10] sm:$0xff]  ;;  %v3479_v14 = vld [vmem:[#allocation7 + $0x248] sm:$0xff] }
 0x3b1   : > { %2922 = vst [vmem:[#allocation3 + $0x51] sm:$0xff] %v8775_v37  ;;  %v2907_v21 = vadd.f32 %v4629_v2, %v2877_v12  ;;  %6149 = vmatmul.mubr.f32.gmra.mrb[12].mxu0 %v8775_v37  ;;  %v3202_v2 = vld [vmem:[#allocation7 + $0x140] sm:$0xff]  ;;  %v8812_v35 = vld [vmem:[#allocation3 + $0x12] sm:$0xff] }
 0x3b2   : > { %v8780_v41 = vmax.f32 %v2908_v17, 0.0  ;;  %7169 = vmatpush3.bf16.msra.mxu0 %v7166_v6  ;;  %6151 = vmatprep.mubr.f32.mxu0 %v8772_v34  ;;  %v7206_v58 = vpack.c.bf16 %v3203_v8, %v3202_v2  ;;  %v3332_v6 = vld [vmem:[#allocation7 + $0x180] sm:$0xff]  ;;  %v3337_v17 = vld [vmem:[#allocation7 + $0x1a8] sm:$0xff]  ;;  %v3473_v2 = vld [vmem:[#allocation7 + $0x218] sm:$0xff] }
 0x3b3   : > { %v8783_v44 = vmax.f32 %v2907_v21, 0.0  ;;  %7171 = vmatprep.subr.bf16.mxu0 %v7170_v38  ;;  %v8800_v51 = vld [vmem:[#allocation3 + $0x40] sm:$0xff]  ;;  %v7222_v9 = vpack.c.bf16 %v3333_v32, %v3332_v6  ;;  %v3338_v21 = vld [vmem:[#allocation7 + $0x1b0] sm:$0xff]  ;;  %v4188_v32 = vld [vmem:[%s9017_s7 + $0x28] sm:$0xff] }
 0x3b4   : > { %2925 = vst [vmem:[#allocation3 + $0x81] sm:$0xff] %v8780_v41  ;;  %v8797_v33 = vld [vmem:[#allocation3 + $0x30] sm:$0xff]  ;;  %v8815_v12 = vld [vmem:[#allocation3 + $0x22] sm:$0xff] }
 0x3b5   : > { %2924 = vst [vmem:[#allocation3 + $0x71] sm:$0xff] %v8783_v44  ;;  %6152 = vmatmul.mubr.f32.gmra.mrb[14].mxu0 %v8783_v44  ;;  %v8818_v40 = vld [vmem:[#allocation3 + $0x32] sm:$0xff]  ;;  %v8821_v18 = vld [vmem:[#allocation3 + $0x42] sm:$0xff] }
 0x3b6   : > { %7173 = vmatpush3.bf16.msra.mxu0 %v7170_v38  ;;  %6186 = vmatprep.mubr.f32.mxu0 %v8788_v7  ;;  %v3336_v38 = vld [vmem:[#allocation7 + $0x1a0] sm:$0xff] }
 0x3b7   : > { %7175 = vmatprep.subr.bf16.mxu0 %v7174_v46  ;;  %v8806_v11 = vld [vmem:[#allocation3 + $0x60] sm:$0xff]  ;;  %v7230_v28 = vpack.c.bf16 %v3337_v17, %v3336_v38  ;;  %v4189_v38 = vld [vmem:[%s9017_s7 + $0x30] sm:$0xff]  ;;  %v4190_v17 = vld [vmem:[%s9017_s7 + $0x38] sm:$0xff] }
 0x3b8   : > { %v8803_v1 = vld [vmem:[#allocation3 + $0x50] sm:$0xff]  ;;  %v4183_v8 = vld [vmem:[%s9017_s7] sm:$0xff] }
 0x3b9   : > { %v4187_v6 = vld [vmem:[%s9017_s7 + $0x20] sm:$0xff] }
 0x3ba   : > { %7177 = vmatpush3.bf16.msra.mxu0 %v7174_v46  ;;  %v3339_v46 = vld [vmem:[#allocation7 + $0x1b8] sm:$0xff]  ;;  %v7422_v19 = vpack.c.bf16 %v4188_v32, %v4187_v6  ;;  %v4633_v32 = vld [vmem:[%s8066_s14 + $0x1d0] sm:$0xff] }
 0x3bb   : > { %7179 = vmatprep.subr.bf16.mxu0 %v7178_v3  ;;  %v7234_v47 = vpack.c.bf16 %v3339_v46, %v3338_v21  ;;  %v3480_v21 = vld [vmem:[#allocation7 + $0x250] sm:$0xff]  ;;  %v3481_v46 = vld [vmem:[#allocation7 + $0x258] sm:$0xff] }
 0x3bc   : > { %v8809_v13 = vld [vmem:[#allocation3 + $0x70] sm:$0xff]  ;;  %v7274_v48 = vpack.c.bf16 %v3481_v46, %v3480_v21  ;;  %v3615_v6 = vld [vmem:[#allocation7 + $0x2b8] sm:$0xff] }
 0x3bd   : > { %v8830_v52 = vld [vmem:[#allocation3 + $0x72] sm:$0xff] }
 0x3be   : > { %7181 = vmatpush3.bf16.msra.mxu0 %v7178_v3  ;;  %v8824_v3 = vld [vmem:[#allocation3 + $0x52] sm:$0xff] }
 0x3bf   : > { %7183 = vmatprep.subr.bf16.mxu0 %v7182_v15  ;;  %v3618_v46 = vld [vmem:[#allocation7 + $0x2d0] sm:$0xff] }
 0x3c2   : > { %7185 = vmatpush3.bf16.msra.mxu0 %v7182_v15  ;;  %v8827_v15 = vld [vmem:[#allocation3 + $0x62] sm:$0xff] }
 0x3c3   : > { %7187 = vmatprep.subr.bf16.mxu0 %v7186_v60 }
 0x3c6   : > { %7189 = vmatpush3.bf16.msra.mxu0 %v7186_v60  ;;  %v3342_v60 = vld [vmem:[#allocation7 + $0x1d0] sm:$0xff] }
 0x3c7   : > { %7191 = vmatprep.subr.bf16.mxu0 %v7190_v42  ;;  %v7242_v54 = vpack.c.bf16 %v3343_v43, %v3342_v60  ;;  %v3482_v60 = vld [vmem:[#allocation7 + $0x260] sm:$0xff]  ;;  %v3483_v43 = vld [vmem:[#allocation7 + $0x268] sm:$0xff] }
 0x3c9   : > { %6187 = vmatmul.mubr.f32.vlgmr.msra.gmra.mrb[8].mxu0 %v8791_v57 }
 0x3ca   : > { %6189 = vmatprep.mubr.f32.mxu0 %v8794_v31  ;;  %7193 = vmatpush3.bf16.msra.mxu0 %v7190_v42  ;;  %v3344_v42 = vld [vmem:[#allocation7 + $0x1e0] sm:$0xff] }
 0x3cb   : > { %7195 = vmatprep.subr.bf16.mxu0 %v7194_v56  ;;  %v7246_v55 = vpack.c.bf16 %v3345_v36, %v3344_v42  ;;  %v7278_v42 = vpack.c.bf16 %v3483_v43, %v3482_v60  ;;  %v4194_v36 = vld [vmem:[%s9017_s7 + $0x58] sm:$0xff]  ;;  %v3620_v60 = vld [vmem:[#allocation7 + $0x2e0] sm:$0xff]  ;;  %v3621_v43 = vld [vmem:[#allocation7 + $0x2e8] sm:$0xff] }
 0x3cd   : > { %6190 = vmatmul.mubr.f32.gmra.mrb[10].mxu0 %v8797_v33 }
 0x3ce   : > { %6192 = vmatprep.mubr.f32.mxu0 %v8800_v51  ;;  %7197 = vmatpush3.bf16.msra.mxu0 %v7194_v56  ;;  %v3346_v56 = vld [vmem:[#allocation7 + $0x1f0] sm:$0xff] }
 0x3cf   : > { %7199 = vmatprep.subr.bf16.mxu0 %v7198_v45  ;;  %v7250_v61 = vpack.c.bf16 %v3347_v59, %v3346_v56  ;;  %v3485_v56 = vld [vmem:[#allocation7 + $0x278] sm:$0xff] }
 0x3d1   : > { %6193 = vmatmul.mubr.f32.gmra.mrb[12].mxu0 %v8803_v1 }
 0x3d2   : > { %6195 = vmatprep.mubr.f32.mxu0 %v8806_v11  ;;  %7201 = vmatpush3.bf16.msra.mxu0 %v7198_v45  ;;  %v3470_v45 = vld [vmem:[#allocation7 + $0x200] sm:$0xff] }
 0x3d3   : > { %7203 = vmatprep.subr.bf16.mxu0 %v7202_v53  ;;  %v7254_v49 = vpack.c.bf16 %v3471_v63, %v3470_v45  ;;  %v4195_v45 = vld [vmem:[%s9017_s7 + $0x60] sm:$0xff]  ;;  %v4196_v63 = vld [vmem:[%s9017_s7 + $0x68] sm:$0xff] }
 0x3d5   : > { %6196 = vmatmul.mubr.f32.gmra.mrb[14].mxu0 %v8809_v13 }
 0x3d6   : > { %7205 = vmatpush3.bf16.msra.mxu0 %v7202_v53  ;;  %6230 = vmatprep.mubr.f32.mxu0 %v3185_v4  ;;  %v3472_v53 = vld [vmem:[#allocation7 + $0x210] sm:$0xff]  ;;  %v3474_v4 = vld [vmem:[#allocation7 + $0x220] sm:$0xff] }
 0x3d7   : > { %7207 = vmatprep.subr.bf16.mxu0 %v7206_v58 }
 0x3da   : > { %7209 = vmatpush3.bf16.msra.mxu0 %v7206_v58  ;;  %v4184_v58 = vld [vmem:[%s9017_s7 + $0x8] sm:$0xff] }
 0x3db   : > { %7211 = vmatprep.subr.bf16.mxu0 %v7210_v23  ;;  %v7414_v22 = vpack.c.bf16 %v4184_v58, %v4183_v8  ;;  %v4197_v8 = vld [vmem:[%s9017_s7 + $0x70] sm:$0xff]  ;;  %v4198_v58 = vld [vmem:[%s9017_s7 + $0x78] sm:$0xff] }
 0x3dd   : > { %7415 = vmatprep.subr.bf16.mxu1 %v7414_v22 }
 0x3de   : > { %7213 = vmatpush3.bf16.msra.mxu0 %v7210_v23  ;;  %v7262_v23 = vpack.c.bf16 %v3475_v62, %v3474_v4  ;;  %7417 = vmatpush3.bf16.msra.mxu1 %v7414_v22  ;;  %v3610_v4 = vld [vmem:[#allocation7 + $0x290] sm:$0xff]  ;;  %v3611_v62 = vld [vmem:[#allocation7 + $0x298] sm:$0xff]  ;;  %v7442_v22 = vpack.c.bf16 %v4198_v58, %v4197_v8  ;;  %v3755_v58 = vld [vmem:[#allocation7 + $0x340] sm:$0xff] }
 0x3df   : > { %7215 = vmatprep.subr.bf16.mxu0 %v7214_v25  ;;  %7419 = vmatprep.subr.bf16.mxu1 %v7418_v0 }
 0x3e2   : > { %7217 = vmatpush3.bf16.msra.mxu0 %v7214_v25  ;;  %v3476_v25 = vld [vmem:[#allocation7 + $0x230] sm:$0xff]  ;;  %7421 = vmatpush3.bf16.msra.mxu1 %v7418_v0  ;;  %v7294_v0 = vpack.c.bf16 %v3613_v26, %v3612_v24  ;;  %v3758_v24 = vld [vmem:[#allocation7 + $0x358] sm:$0xff] }
 0x3e3   : > { %7219 = vmatprep.subr.bf16.mxu0 %v7218_v10  ;;  %7423 = vmatprep.subr.bf16.mxu1 %v7422_v19 }
 0x3e6   : > { %7221 = vmatpush3.bf16.msra.mxu0 %v7218_v10  ;;  %v7266_v10 = vpack.c.bf16 %v3477_v27, %v3476_v25  ;;  %7425 = vmatpush3.bf16.msra.mxu1 %v7422_v19  ;;  %v4631_v25 = vld [vmem:[%s8066_s14 + $0x1b0] sm:$0xff]  ;;  %v4632_v27 = vld [vmem:[%s8066_s14 + $0x1c0] sm:$0xff] }
 0x3e7   : > { %7223 = vmatprep.subr.bf16.mxu0 %v7222_v9  ;;  %6538 = vmatprep.mubr.f32.mxu1 %v4631_v25  ;;  %v3616_v19 = vld [vmem:[#allocation7 + $0x2c0] sm:$0xff] }
 0x3e8   : > { %v3759_v25 = vld [vmem:[#allocation7 + $0x360] sm:$0xff] }
 0x3e9   : > { %6231 = vmatmul.mubr.f32.vlgmr.msra.gmra.mrb[8].mxu0 %v8812_v35 }
 0x3ea   : > { %6233 = vmatprep.mubr.f32.mxu0 %v8815_v12  ;;  %7225 = vmatpush3.bf16.msra.mxu0 %v7222_v9  ;;  %v3478_v9 = vld [vmem:[#allocation7 + $0x240] sm:$0xff] }
 0x3eb   : > { %7227 = vmatprep.subr.bf16.mxu0 %v7226_v29 }
 0x3ed   : > { %6234 = vmatmul.mubr.f32.gmra.mrb[10].mxu0 %v8818_v40 }
 0x3ee   : > { %6236 = vmatprep.mubr.f32.mxu0 %v8821_v18  ;;  %7229 = vmatpush3.bf16.msra.mxu0 %v7226_v29  ;;  %v7270_v29 = vpack.c.bf16 %v3479_v14, %v3478_v9  ;;  %v4634_v9 = vld [vmem:[%s8066_s14 + $0x1e0] sm:$0xff] }
 0x3ef   : > { %7231 = vmatprep.subr.bf16.mxu0 %v7230_v28 }
 0x3f1   : > { %6237 = vmatmul.mubr.f32.gmra.mrb[12].mxu0 %v8824_v3 }
 0x3f2   : > { %6239 = vmatprep.mubr.f32.mxu0 %v8827_v15  ;;  %7233 = vmatpush3.bf16.msra.mxu0 %v7230_v28  ;;  %v8864_v28 = vld [vmem:[#allocation3 + $0x80] sm:$0xff] }
 0x3f3   : > { %7235 = vmatprep.subr.bf16.mxu0 %v7234_v47 }
 0x3f5   : > { %6240 = vmatmul.mubr.f32.gmra.mrb[14].mxu0 %v8830_v52 }
 0x3f6   : > { %7237 = vmatpush3.bf16.msra.mxu0 %v7234_v47  ;;  %6274 = vmatprep.mubr.f32.mxu0 %v8791_v57  ;;  %v7258_v57 = vpack.c.bf16 %v3473_v2, %v3472_v53  ;;  %v7426_v47 = vpack.c.bf16 %v4190_v17, %v4189_v38  ;;  %v3609_v53 = vld [vmem:[#allocation7 + $0x288] sm:$0xff]  ;;  %v7438_v2 = vpack.c.bf16 %v4196_v63, %v4195_v45  ;;  %v4635_v38 = vld [vmem:[%s8066_s14 + $0x1f0] sm:$0xff]  ;;  %v4636_v17 = vld [vmem:[%s8066_s14 + $0x200] sm:$0xff] }
 0x3f7   : > { %7239 = vmatprep.subr.bf16.mxu0 %v7238_v39  ;;  %v3751_v63 = vld [vmem:[#allocation7 + $0x320] sm:$0xff] }
 0x3f8   : > { %7427 = vmatprep.subr.bf16.mxu1 %v7426_v47 }
 0x3f9   : > { %7429 = vmatpush3.bf16.msra.mxu1 %v7426_v47  ;;  %v3619_v47 = vld [vmem:[#allocation7 + $0x2d8] sm:$0xff] }
 0x3fa   : > { %7241 = vmatpush3.bf16.msra.mxu0 %v7238_v39  ;;  %v4192_v39 = vld [vmem:[%s9017_s7 + $0x48] sm:$0xff] }
 0x3fb   : > { %7243 = vmatprep.subr.bf16.mxu0 %v7242_v54 }
 0x3fe   : > { %7245 = vmatpush3.bf16.msra.mxu0 %v7242_v54  ;;  %v7430_v54 = vpack.c.bf16 %v4192_v39, %v4191_v50  ;;  %v4638_v50 = vld [vmem:[%s8066_s14 + $0x220] sm:$0xff]  ;;  %v7306_v39 = vpack.c.bf16 %v3619_v47, %v3618_v46  ;;  %v3891_v47 = vld [vmem:[#allocation7 + $0x3b0] sm:$0xff] }
 0x3ff   : > { %7247 = vmatprep.subr.bf16.mxu0 %v7246_v55 }
 0x400   : > { %7431 = vmatprep.subr.bf16.mxu1 %v7430_v54 }
 0x401   : > { %7433 = vmatpush3.bf16.msra.mxu1 %v7430_v54  ;;  %v7310_v54 = vpack.c.bf16 %v3621_v43, %v3620_v60  ;;  %v3894_v60 = vld [vmem:[#allocation7 + $0x3c8] sm:$0xff]  ;;  %v3896_v43 = vld [vmem:[#allocation7 + $0x3d8] sm:$0xff] }
 0x402   : > { %7249 = vmatpush3.bf16.msra.mxu0 %v7246_v55  ;;  %v3484_v55 = vld [vmem:[#allocation7 + $0x270] sm:$0xff] }
 0x403   : > { %7251 = vmatprep.subr.bf16.mxu0 %v7250_v61 }
 0x406   : > { %7253 = vmatpush3.bf16.msra.mxu0 %v7250_v61  ;;  %v7282_v61 = vpack.c.bf16 %v3485_v56, %v3484_v55  ;;  %v3747_v55 = vld [vmem:[#allocation7 + $0x300] sm:$0xff]  ;;  %v3748_v56 = vld [vmem:[#allocation7 + $0x308] sm:$0xff] }
 0x407   : > { %7255 = vmatprep.subr.bf16.mxu0 %v7254_v49 }
 0x409   : > { %6275 = vmatmul.mubr.f32.vlgmr.msra.gmra.mrb[8].mxu0 %v8794_v31 }
 0x40a   : > { %6277 = vmatprep.mubr.f32.mxu0 %v8797_v33  ;;  %7257 = vmatpush3.bf16.msra.mxu0 %v7254_v49  ;;  %v3608_v49 = vld [vmem:[#allocation7 + $0x280] sm:$0xff] }
 0x40b   : > { %7259 = vmatprep.subr.bf16.mxu0 %v7258_v57 }
 0x40d   : > { %6278 = vmatmul.mubr.f32.gmra.mrb[10].mxu0 %v8800_v51 }
 0x40e   : > { %6280 = vmatprep.mubr.f32.mxu0 %v8803_v1  ;;  %7261 = vmatpush3.bf16.msra.mxu0 %v7258_v57  ;;  %v7286_v57 = vpack.c.bf16 %v3609_v53, %v3608_v49  ;;  %v3752_v49 = vld [vmem:[#allocation7 + $0x328] sm:$0xff] }
 0x40f   : > { %7263 = vmatprep.subr.bf16.mxu0 %v7262_v23  ;;  %v7326_v53 = vpack.c.bf16 %v3752_v49, %v3751_v63  ;;  %v4029_v63 = vld [vmem:[#allocation7 + $0x430] sm:$0xff]  ;;  %v4030_v49 = vld [vmem:[#allocation7 + $0x438] sm:$0xff] }
 0x411   : > { %6281 = vmatmul.mubr.f32.gmra.mrb[12].mxu0 %v8806_v11 }
 0x412   : > { %6283 = vmatprep.mubr.f32.mxu0 %v8809_v13  ;;  %7265 = vmatpush3.bf16.msra.mxu0 %v7262_v23  ;;  %v7290_v23 = vpack.c.bf16 %v3611_v62, %v3610_v4  ;;  %v3756_v4 = vld [vmem:[#allocation7 + $0x348] sm:$0xff] }
 0x413   : > { %7267 = vmatprep.subr.bf16.mxu0 %v7266_v10  ;;  %v7334_v62 = vpack.c.bf16 %v3756_v4, %v3755_v58  ;;  %v4034_v58 = vld [vmem:[#allocation7 + $0x458] sm:$0xff]  ;;  %v4036_v4 = vld [vmem:[#allocation7 + $0x468] sm:$0xff] }
 0x415   : > { %6284 = vmatmul.mubr.f32.gmra.mrb[14].mxu0 %v8864_v28 }
 0x416   : > { %7269 = vmatpush3.bf16.msra.mxu0 %v7266_v10  ;;  %6318 = vmatprep.mubr.f32.mxu0 %v8759_v16  ;;  %v4193_v16 = vld [vmem:[%s9017_s7 + $0x50] sm:$0xff] }
 0x417   : > { %7271 = vmatprep.subr.bf16.mxu0 %v7270_v29  ;;  %v7434_v59 = vpack.c.bf16 %v4194_v36, %v4193_v16  ;;  %v3614_v10 = vld [vmem:[#allocation7 + $0x2b0] sm:$0xff]  ;;  %v3623_v16 = vld [vmem:[#allocation7 + $0x2f8] sm:$0xff] }
 0x418   : > { %v7298_v14 = vpack.c.bf16 %v3615_v6, %v3614_v10  ;;  %v3761_v10 = vld [vmem:[#allocation7 + $0x370] sm:$0xff]  ;;  %v3762_v6 = vld [vmem:[#allocation7 + $0x378] sm:$0xff] }
 0x419   : > { %7435 = vmatprep.subr.bf16.mxu1 %v7434_v59 }
 0x41a   : > { %7273 = vmatpush3.bf16.msra.mxu0 %v7270_v29  ;;  %7437 = vmatpush3.bf16.msra.mxu1 %v7434_v59  ;;  %v3617_v29 = vld [vmem:[#allocation7 + $0x2c8] sm:$0xff]  ;;  %v7318_v59 = vpack.c.bf16 %v3748_v56, %v3747_v55  ;;  %v4025_v56 = vld [vmem:[#allocation7 + $0x410] sm:$0xff] }
 0x41b   : > { %7275 = vmatprep.subr.bf16.mxu0 %v7274_v48  ;;  %7439 = vmatprep.subr.bf16.mxu1 %v7438_v2  ;;  %v7302_v21 = vpack.c.bf16 %v3617_v29, %v3616_v19  ;;  %v3887_v29 = vld [vmem:[#allocation7 + $0x390] sm:$0xff]  ;;  %v4024_v55 = vld [vmem:[#allocation7 + $0x408] sm:$0xff] }
 0x41e   : > { %7277 = vmatpush3.bf16.msra.mxu0 %v7274_v48  ;;  %7441 = vmatpush3.bf16.msra.mxu1 %v7438_v2  ;;  %v4637_v48 = vld [vmem:[%s8066_s14 + $0x210] sm:$0xff]  ;;  %s7767_s14 = scalar_lea.vmem %s7766_s27, 2048 }
 0x41f   : > { %7279 = vmatprep.subr.bf16.mxu0 %v7278_v42  ;;  %7443 = vmatprep.subr.bf16.mxu1 %v7442_v22  ;;  %v3753_v2 = vld [vmem:[#allocation7 + $0x330] sm:$0xff]  ;;  %p7769_p7 = scmp.lt.s32.totalorder %s7767_s14, %s7761_s26 }
 0x421   : > { %p7770_p8 = por %p7769_p7, %p7768_p4 }
 0x422   : > { %7281 = vmatpush3.bf16.msra.mxu0 %v7278_v42  ;;  %7445 = vmatpush3.bf16.msra.mxu1 %v7442_v22  ;;  %v3622_v42 = vld [vmem:[#allocation7 + $0x2f0] sm:$0xff]  ;;  %v8914_v22 = vld [vmem:[#allocation3 + $0x82] sm:$0xff] }
 0x423   : > { %7283 = vmatprep.subr.bf16.mxu0 %v7282_v61  ;;  %v7314_v36 = vpack.c.bf16 %v3623_v16, %v3622_v42  ;;  %v3900_v16 = vld [vmem:[#allocation7 + $0x3f8] sm:$0xff]  ;;  %p7771_p11 = pnand %p7770_p8, %p7764_p3 }
 0x425   : > { %6539 = vmatmul.mubr.f32.vlgmr.msra.gmra.mrb[16].mxu1 %v4632_v27  ;;  %v3760_v27 = vld [vmem:[#allocation7 + $0x368] sm:$0xff] }
 0x426   : > { %7285 = vmatpush3.bf16.msra.mxu0 %v7282_v61  ;;  %6541 = vmatprep.mubr.f32.mxu1 %v4633_v32  ;;  %v3749_v61 = vld [vmem:[#allocation7 + $0x310] sm:$0xff]  ;;  %v7346_v32 = vpack.c.bf16 %v3762_v6, %v3761_v10 }
 0x427   : > { %7287 = vmatprep.subr.bf16.mxu0 %v7286_v57 }
 0x429   : > { %6319 = vmatmul.mubr.f32.vlgmr.msra.gmra.mrb[8].mxu0 %v8757_v20  ;;  %6542 = vmatmul.mubr.f32.gmra.mrb[18].mxu1 %v4634_v9  ;;  %v3885_v9 = vld [vmem:[#allocation7 + $0x380] sm:$0xff] }
 0x42a   : > { %6321 = vmatprep.mubr.f32.mxu0 %v8767_v30  ;;  %7289 = vmatpush3.bf16.msra.mxu0 %v7286_v57  ;;  %v3754_v57 = vld [vmem:[#allocation7 + $0x338] sm:$0xff] }
 0x42b   : > { %7291 = vmatprep.subr.bf16.mxu0 %v7290_v23  ;;  %6544 = vmatprep.mubr.f32.mxu1 %v4635_v38  ;;  %v7330_v8 = vpack.c.bf16 %v3754_v57, %v3753_v2  ;;  %v3888_v38 = vld [vmem:[#allocation7 + $0x398] sm:$0xff]  ;;  %v4031_v2 = vld [vmem:[#allocation7 + $0x440] sm:$0xff]  ;;  %v4032_v57 = vld [vmem:[#allocation7 + $0x448] sm:$0xff] }
 0x42d   : > { %6322 = vmatmul.mubr.f32.gmra.mrb[10].mxu0 %v8764_v5  ;;  %6545 = vmatmul.mubr.f32.gmra.mrb[20].mxu1 %v4636_v17  ;;  %v3889_v17 = vld [vmem:[#allocation7 + $0x3a0] sm:$0xff] }
 0x42e   : > { %6324 = vmatprep.mubr.f32.mxu0 %v8775_v37  ;;  %7293 = vmatpush3.bf16.msra.mxu0 %v7290_v23  ;;  %v3757_v23 = vld [vmem:[#allocation7 + $0x350] sm:$0xff] }
 0x42f   : > { %7295 = vmatprep.subr.bf16.mxu0 %v7294_v0  ;;  %6547 = vmatprep.mubr.f32.mxu1 %v4637_v48  ;;  %v7338_v26 = vpack.c.bf16 %v3758_v24, %v3757_v23  ;;  %v3892_v48 = vld [vmem:[#allocation7 + $0x3b8] sm:$0xff] }
 0x430   : > { %v4038_v23 = vld [vmem:[#allocation7 + $0x478] sm:$0xff] }
 0x431   : > { %6325 = vmatmul.mubr.f32.gmra.mrb[12].mxu0 %v8772_v34  ;;  %6548 = vmatmul.mubr.f32.gmra.mrb[22].mxu1 %v4638_v50  ;;  %v7362_v50 = vpack.c.bf16 %v3892_v48, %v3891_v47 }
 0x432   : > { %6327 = vmatprep.mubr.f32.mxu0 %v8783_v44  ;;  %7297 = vmatpush3.bf16.msra.mxu0 %v7294_v0  ;;  %v7342_v0 = vpack.c.bf16 %v3760_v27, %v3759_v25 }
 0x433   : > { %7299 = vmatprep.subr.bf16.mxu0 %v7298_v14 }
 0x435   : > { %6328 = vmatmul.mubr.f32.gmra.mrb[14].mxu0 %v8780_v41 }
 0x436   : > { %7301 = vmatpush3.bf16.msra.mxu0 %v7298_v14  ;;  %6362 = vmatprep.mubr.f32.mxu0 %v8812_v35  ;;  %v3750_v35 = vld [vmem:[#allocation7 + $0x318] sm:$0xff]  ;;  %v3886_v14 = vld [vmem:[#allocation7 + $0x388] sm:$0xff] }
 0x437   : > { %7303 = vmatprep.subr.bf16.mxu0 %v7302_v21  ;;  %v7322_v45 = vpack.c.bf16 %v3750_v35, %v3749_v61  ;;  %v7350_v19 = vpack.c.bf16 %v3886_v14, %v3885_v9  ;;  %v4027_v61 = vld [vmem:[#allocation7 + $0x420] sm:$0xff]  ;;  %v4028_v35 = vld [vmem:[#allocation7 + $0x428] sm:$0xff] }
 0x43a   : > { %7305 = vmatpush3.bf16.msra.mxu0 %v7302_v21  ;;  %v3890_v21 = vld [vmem:[#allocation7 + $0x3a8] sm:$0xff] }
 0x43b   : > { %7307 = vmatprep.subr.bf16.mxu0 %v7306_v39  ;;  %v7358_v46 = vpack.c.bf16 %v3890_v21, %v3889_v17 }
 0x43e   : > { %7309 = vmatpush3.bf16.msra.mxu0 %v7306_v39  ;;  %v3893_v39 = vld [vmem:[#allocation7 + $0x3c0] sm:$0xff] }
 0x43f   : > { %7311 = vmatprep.subr.bf16.mxu0 %v7310_v54 }
 0x442   : > { %7313 = vmatpush3.bf16.msra.mxu0 %v7310_v54  ;;  %v3898_v54 = vld [vmem:[#allocation7 + $0x3e8] sm:$0xff] }
 0x443   : > { %7315 = vmatprep.subr.bf16.mxu0 %v7314_v36 }
 0x446   : > { %7317 = vmatpush3.bf16.msra.mxu0 %v7314_v36  ;;  %v4023_v36 = vld [vmem:[#allocation7 + $0x400] sm:$0xff] }
 0x447   : > { %7319 = vmatprep.subr.bf16.mxu0 %v7318_v59 }
 0x449   : > { %6363 = vmatmul.mubr.f32.vlgmr.msra.gmra.mrb[8].mxu0 %v8815_v12 }
 0x44a   : > { %6365 = vmatprep.mubr.f32.mxu0 %v8818_v40  ;;  %7321 = vmatpush3.bf16.msra.mxu0 %v7318_v59  ;;  %v4026_v59 = vld [vmem:[#allocation7 + $0x418] sm:$0xff] }
 0x44b   : > { %7323 = vmatprep.subr.bf16.mxu0 %v7322_v45 }
 0x44d   : > { %6366 = vmatmul.mubr.f32.gmra.mrb[10].mxu0 %v8821_v18 }
 0x44e   : > { %6368 = vmatprep.mubr.f32.mxu0 %v8824_v3  ;;  %7325 = vmatpush3.bf16.msra.mxu0 %v7322_v45  ;;  %v7390_v45 = vpack.c.bf16 %v4028_v35, %v4027_v61 }
 0x44f   : > { %7327 = vmatprep.subr.bf16.mxu0 %v7326_v53 }
 0x451   : > { %6369 = vmatmul.mubr.f32.gmra.mrb[12].mxu0 %v8827_v15 }
 0x452   : > { %6371 = vmatprep.mubr.f32.mxu0 %v8830_v52  ;;  %7329 = vmatpush3.bf16.msra.mxu0 %v7326_v53  ;;  %v7394_v53 = vpack.c.bf16 %v4030_v49, %v4029_v63 }
 0x453   : > { %7331 = vmatprep.subr.bf16.mxu0 %v7330_v8 }
 0x455   : > { %6372 = vmatmul.mubr.f32.gmra.mrb[14].mxu0 %v8914_v22 }
 0x456   : > { %7333 = vmatpush3.bf16.msra.mxu0 %v7330_v8  ;;  %6406 = vmatprep.mubr.f32.mxu0 %v8794_v31  ;;  %v7354_v31 = vpack.c.bf16 %v3888_v38, %v3887_v29  ;;  %v4033_v8 = vld [vmem:[#allocation7 + $0x450] sm:$0xff] }
 0x457   : > { %7335 = vmatprep.subr.bf16.mxu0 %v7334_v62 }
 0x45a   : > { %7337 = vmatpush3.bf16.msra.mxu0 %v7334_v62 }
 0x45b   : > { %7339 = vmatprep.subr.bf16.mxu0 %v7338_v26 }
 0x45e   : > { %7341 = vmatpush3.bf16.msra.mxu0 %v7338_v26 }
 0x45f   : > { %7343 = vmatprep.subr.bf16.mxu0 %v7342_v0 }
 0x462   : > { %7345 = vmatpush3.bf16.msra.mxu0 %v7342_v0 }
 0x463   : > { %7347 = vmatprep.subr.bf16.mxu0 %v7346_v32 }
 0x466   : > { %7349 = vmatpush3.bf16.msra.mxu0 %v7346_v32 }
 0x467   : > { %7351 = vmatprep.subr.bf16.mxu0 %v7350_v19 }
 0x469   : > { %6407 = vmatmul.mubr.f32.vlgmr.msra.gmra.mrb[8].mxu0 %v8797_v33  ;;  %v7366_v33 = vpack.c.bf16 %v3894_v60, %v3893_v39 }
 0x46a   : > { %6409 = vmatprep.mubr.f32.mxu0 %v8800_v51  ;;  %7353 = vmatpush3.bf16.msra.mxu0 %v7350_v19  ;;  %v3895_v51 = vld [vmem:[#allocation7 + $0x3d0] sm:$0xff] }
 0x46b   : > { %7355 = vmatprep.subr.bf16.mxu0 %v7354_v31 }
 0x46d   : > { %6410 = vmatmul.mubr.f32.gmra.mrb[10].mxu0 %v8803_v1  ;;  %v7370_v1 = vpack.c.bf16 %v3896_v43, %v3895_v51 }
 0x46e   : > { %6412 = vmatprep.mubr.f32.mxu0 %v8806_v11  ;;  %7357 = vmatpush3.bf16.msra.mxu0 %v7354_v31  ;;  %v3897_v11 = vld [vmem:[#allocation7 + $0x3e0] sm:$0xff] }
 0x46f   : > { %7359 = vmatprep.subr.bf16.mxu0 %v7358_v46  ;;  %v7374_v42 = vpack.c.bf16 %v3898_v54, %v3897_v11 }
 0x471   : > { %6413 = vmatmul.mubr.f32.gmra.mrb[12].mxu0 %v8809_v13  ;;  %v3899_v13 = vld [vmem:[#allocation7 + $0x3f0] sm:$0xff] }
 0x472   : > { %6415 = vmatprep.mubr.f32.mxu0 %v8864_v28  ;;  %7361 = vmatpush3.bf16.msra.mxu0 %v7358_v46  ;;  %v7378_v28 = vpack.c.bf16 %v3900_v16, %v3899_v13 }
 0x473   : > { %7363 = vmatprep.subr.bf16.mxu0 %v7362_v50 }
 0x475   : > { %6416 = vmatmul.mubr.f32.gmra.mrb[14].mxu0 %v8788_v7  ;;  %v7382_v7 = vpack.c.bf16 %v4024_v55, %v4023_v36 }
 0x476   : > { %7365 = vmatpush3.bf16.msra.mxu0 %v7362_v50  ;;  %6450 = vmatprep.mubr.f32.mxu0 %v8757_v20  ;;  %v7386_v20 = vpack.c.bf16 %v4026_v59, %v4025_v56 }
 0x477   : > { %7367 = vmatprep.subr.bf16.mxu0 %v7366_v33 }
 0x47a   : > { %7369 = vmatpush3.bf16.msra.mxu0 %v7366_v33 }
 0x47b   : > { %7371 = vmatprep.subr.bf16.mxu0 %v7370_v1 }
 0x47e   : > { %7373 = vmatpush3.bf16.msra.mxu0 %v7370_v1 }
 0x47f   : > { %7375 = vmatprep.subr.bf16.mxu0 %v7374_v42 }
 0x482   : > { %7377 = vmatpush3.bf16.msra.mxu0 %v7374_v42 }
 0x483   : > { %7379 = vmatprep.subr.bf16.mxu0 %v7378_v28 }
 0x486   : > { %7381 = vmatpush3.bf16.msra.mxu0 %v7378_v28 }
 0x487   : > { %7383 = vmatprep.subr.bf16.mxu0 %v7382_v7 }
 0x489   : > { %6451 = vmatmul.mubr.f32.vlgmr.msra.gmra.mrb[8].mxu0 %v8767_v30  ;;  %v7398_v30 = vpack.c.bf16 %v4032_v57, %v4031_v2 }
 0x48a   : > { %6453 = vmatprep.mubr.f32.mxu0 %v8764_v5  ;;  %7385 = vmatpush3.bf16.msra.mxu0 %v7382_v7  ;;  %v3883_v5 = vld [vmem:[#allocation3 + $0x91] sm:$0xff] }
 0x48b   : > { %7387 = vmatprep.subr.bf16.mxu0 %v7386_v20 }
 0x48d   : > { %6454 = vmatmul.mubr.f32.gmra.mrb[10].mxu0 %v8775_v37  ;;  %v4035_v37 = vld [vmem:[#allocation7 + $0x460] sm:$0xff] }
 0x48e   : > { %6456 = vmatprep.mubr.f32.mxu0 %v8772_v34  ;;  %7389 = vmatpush3.bf16.msra.mxu0 %v7386_v20  ;;  %v7402_v34 = vpack.c.bf16 %v4034_v58, %v4033_v8  ;;  %v7406_v62 = vpack.c.bf16 %v4036_v4, %v4035_v37 }
 0x48f   : > { %7391 = vmatprep.subr.bf16.mxu0 %v7390_v45 }
 0x491   : > { %6457 = vmatmul.mubr.f32.gmra.mrb[12].mxu0 %v8783_v44  ;;  %v4037_v44 = vld [vmem:[#allocation7 + $0x470] sm:$0xff] }
 0x492   : > { %6459 = vmatprep.mubr.f32.mxu0 %v8780_v41  ;;  %7393 = vmatpush3.bf16.msra.mxu0 %v7390_v45  ;;  %v7410_v41 = vpack.c.bf16 %v4038_v23, %v4037_v44 }
 0x493   : > { %7395 = vmatprep.subr.bf16.mxu0 %v7394_v53 }
 0x495   : > { %6460 = vmatmul.mubr.f32.gmra.mrb[14].mxu0 %v3883_v5 }
 0x496   : > { %7397 = vmatpush3.bf16.msra.mxu0 %v7394_v53  ;;  %6494 = vmatprep.mubr.f32.mxu0 %v8815_v12  ;;  %v4021_v12 = vld [vmem:[#allocation3 + $0x92] sm:$0xff] }
 0x497   : > { %7399 = vmatprep.subr.bf16.mxu0 %v7398_v30 }
 0x49a   : > { %7401 = vmatpush3.bf16.msra.mxu0 %v7398_v30 }
 0x49b   : > { %7403 = vmatprep.subr.bf16.mxu0 %v7402_v34 }
 0x49e   : > { %7405 = vmatpush3.bf16.msra.mxu0 %v7402_v34 }
 0x49f   : > { %7407 = vmatprep.subr.bf16.mxu0 %v7406_v62 }
 0x4a2   : > { %7409 = vmatpush3.bf16.msra.mxu0 %v7406_v62 }
 0x4a3   : > { %7411 = vmatprep.subr.bf16.mxu0 %v7410_v41 }
 0x4a6   : > { %7413 = vmatpush3.bf16.msra.mxu0 %v7410_v41 }
 0x4a9   : > { %6495 = vmatmul.mubr.f32.vlgmr.msra.gmra.mrb[8].mxu0 %v8818_v40 }
 0x4aa   : > { %6497 = vmatprep.mubr.f32.mxu0 %v8821_v18 }
 0x4ad   : > { %6498 = vmatmul.mubr.f32.gmra.mrb[10].mxu0 %v8824_v3  ;;  %v4630_v3 = vld [vmem:[%s9016_s6] ss:$0 sm:$0xff] }
 0x4ae   : > { %6500 = vmatprep.mubr.f32.mxu0 %v8827_v15  ;;  %v4639_v15 = vld [vmem:[%s9018_s8] ss:$0 sm:$0xff] }
 0x4b1   : > { %6501 = vmatmul.mubr.f32.gmra.mrb[12].mxu0 %v8830_v52 }
 0x4b2   : > { %6503 = vmatprep.mubr.f32.mxu0 %v8914_v22 }
 0x4b5   : > { %6504 = vmatmul.mubr.f32.gmra.mrb[14].mxu0 %v4021_v12 }
 0x4f8   : > { %v6540_v24 = vpop.f32.mrb[16].mxu1 }
 0x4f9   : > { %v4272_v26 = vpop.f32.mrb[17].mxu1  ;;  %v4278_v32 = vadd.f32 %v6540_v24, %v4639_v15 }
 0x4fa   : > { %v4273_v14 = vadd.f32 %v4639_v15, %v4272_v26 }
 0x4fc   : > { %v6543_v25 = vpop.f32.mrb[18].mxu1 }
 0x4fd   : > { %v4282_v27 = vpop.f32.mrb[19].mxu1  ;;  %v4288_v46 = vadd.f32 %v6543_v25, %v4639_v15 }
 0x4fe   : > { %v4283_v50 = vadd.f32 %v4639_v15, %v4282_v27 }
 0x500   : > { %v6546_v0 = vpop.f32.mrb[20].mxu1 }
 0x501   : > { %v4292_v40 = vpop.f32.mrb[21].mxu1  ;;  %v4298_v42 = vadd.f32 %v6546_v0, %v4639_v15 }
 0x502   : > { %v4293_v28 = vadd.f32 %v4639_v15, %v4292_v40 }
 0x504   : > { %v6549_v10 = vpop.f32.mrb[22].mxu1 }
 0x505   : > { %v4302_v18 = vpop.f32.mrb[23].mxu1  ;;  %v4308_v45 = vadd.f32 %v6549_v10, %v4639_v15 }
 0x506   : > { %v4303_v53 = vadd.f32 %v4639_v15, %v4302_v18 }
 0x57c   : > { %v6496_v52 = vpop.f32.mrb[8].mxu0 }
 0x57d   : > { %v4160_v22 = vadd.f32 %v6496_v52, %v4630_v3  ;;  %v4105_v6 = vpop.f32.mrb[9].mxu0 }
 0x57e   : > { %v4159_v9 = vadd.f32 %v4630_v3, %v4105_v6 }
 0x57f   : > { %v4168_v19 = vmax.f32 %v4160_v22, 0.0 }
 0x580   : > { %v4167_v29 = vmax.f32 %v4159_v9, 0.0  ;;  %v6499_v38 = vpop.f32.mrb[10].mxu0 }
 0x581   : > { %v4312_v31 = vadd.f32 %v4278_v32, %v4168_v19  ;;  %v4162_v17 = vadd.f32 %v6499_v38, %v4630_v3  ;;  %v4115_v21 = vpop.f32.mrb[11].mxu0 }
 0x582   : > { %v4311_v47 = vadd.f32 %v4273_v14, %v4167_v29  ;;  %v4161_v48 = vadd.f32 %v4630_v3, %v4115_v21 }
 0x583   : > { %v4320_v39 = vmax.f32 %v4312_v31, 0.0  ;;  %v4170_v60 = vmax.f32 %v4162_v17, 0.0 }
 0x584   : > { %v4319_v33 = vmax.f32 %v4311_v47, 0.0  ;;  %v4169_v51 = vmax.f32 %v4161_v48, 0.0  ;;  %v6502_v43 = vpop.f32.mrb[12].mxu0 }
 0x585   : > { %4328 = vst [vmem:[%s8948_s23 + $0x8] sm:$0xff] %v4320_v39  ;;  %v4314_v1 = vadd.f32 %v4288_v46, %v4170_v60  ;;  %v4164_v11 = vadd.f32 %v6502_v43, %v4630_v3  ;;  %v4125_v54 = vpop.f32.mrb[13].mxu0 }
 0x586   : > { %4327 = vst [vmem:[%s8948_s23] sm:$0xff] %v4319_v33  ;;  %v4313_v13 = vadd.f32 %v4283_v50, %v4169_v51  ;;  %v4163_v16 = vadd.f32 %v4630_v3, %v4125_v54 }
 0x587   : > { %v4322_v36 = vmax.f32 %v4314_v1, 0.0  ;;  %v4172_v55 = vmax.f32 %v4164_v11, 0.0 }
 0x588   : > { %v4321_v7 = vmax.f32 %v4313_v13, 0.0  ;;  %v4171_v56 = vmax.f32 %v4163_v16, 0.0  ;;  %v6505_v59 = vpop.f32.mrb[14].mxu0 }
 0x589   : > { %4330 = vst [vmem:[%s8948_s23 + $0x18] sm:$0xff] %v4322_v36  ;;  %v4316_v20 = vadd.f32 %v4298_v42, %v4172_v55  ;;  %v4166_v61 = vadd.f32 %v6505_v59, %v4630_v3  ;;  %v4135_v35 = vpop.f32.mrb[15].mxu0 }
 0x58a   : > { %4329 = vst [vmem:[%s8948_s23 + $0x10] sm:$0xff] %v4321_v7  ;;  %v4315_v63 = vadd.f32 %v4293_v28, %v4171_v56  ;;  %v4165_v49 = vadd.f32 %v4630_v3, %v4135_v35 }
 0x58b   : > { %v4324_v2 = vmax.f32 %v4316_v20, 0.0  ;;  %v4174_v57 = vmax.f32 %v4166_v61, 0.0 }
 0x58c   : > { %v4323_v5 = vmax.f32 %v4315_v63, 0.0  ;;  %v4173_v30 = vmax.f32 %v4165_v49, 0.0 }
 0x58d   : > { %4332 = vst [vmem:[%s8948_s23 + $0x28] sm:$0xff] %v4324_v2  ;;  %v4318_v8 = vadd.f32 %v4308_v45, %v4174_v57 }
 0x58e   : > { %4331 = vst [vmem:[%s8948_s23 + $0x20] sm:$0xff] %v4323_v5  ;;  %v4317_v58 = vadd.f32 %v4303_v53, %v4173_v30 }
 0x58f   : > { %v4326_v34 = vmax.f32 %v4318_v8, 0.0 }
 0x590   : > { %v4325_v37 = vmax.f32 %v4317_v58, 0.0 }
 0x591   : > { %4334 = vst [vmem:[%s8948_s23 + $0x38] sm:$0xff] %v4326_v34 }
 0x592   : > { %4333 = vst [vmem:[%s8948_s23 + $0x30] sm:$0xff] %v4325_v37 }
 0x593   : > { %7774 = shalt.err (!%p7771_p11)
}
 0x594   : > { %s7775_s28 = scalar_lea.hbm %s8963_s21, 1024  ;;  %s7779_s17 = scalar_lea.hbm %s9019_s9, 2048 }
 0x595   : > { %p7776_p13 = scmp.ne.s32.totalorder %s8963_s21, %s7775_s28  ;;  %p7780_p6 = scmp.lt.u32.totalorder %s8963_s21, %s9019_s9 }
 0x596   : > { %p7781_p9 = scmp.lt.u32.totalorder %s7779_s17, %s7775_s28  ;;  %p7783_p12 = scmp.lt.u32.totalorder %s7775_s28, %s8963_s21 }
 0x597   : > { %p7777_p5 = pnand %p7776_p13, %p9038_p1 }
 0x598   : > { %p7782_p10 = por %p7781_p9, %p7780_p6 }
 0x599   : > { %p7778_p0 = pneg %p7777_p5 }
 0x59a   : > { %p7784_p2 = por %p7783_p12, %p7782_p10 }
 0x59c   : > { %p7785_p3 = pnand %p7784_p2, %p7778_p0 }
 0x59e   : > { %7788 = shalt.err (!%p7785_p3)
}
 0x59f   : > { %s7839_s25 = smov 128   ;;  %s7840_s15 = smov 8  }
 0x5a0   : > { %7647 = dma.vmem_to_hbm [thread:$0]  (%p9038_p1), %s8958_s11, 1024, %s8963_s21, %s8969_s13, %s7839_s25, %s7839_s25, %s7840_s15  }
 0x5a1 PF: > { %p7664_p4 = scmp.ge.s32.totalorder %s7831_s12, 2  ;;  %s4364_s24 = sand.u32 1, %s7819_s30  }
 0x5a2   : > { %p9039_p7 = scmp.ne.s32.totalorder %s9030_s20, 0  ;;  %s4365_s26 = scalar_lea.sflag [#allocation6], %s4364_s24 }
 0x5a4   : > { %p7657_p8 = pnand %p7664_p4, %p9039_p7 }
 0x5a6   : > { %7814 = dma.done.wait (!%p7657_p8), %s4365_s26, 1024  }
 0x5a7   : > { %7816 = vsyncadd (!%p7657_p8), %s4365_s26, 4294966272  ;;  %s9040_s12 = sld [smem:[#allocation14_spill]]  ;;  %s9041_s18 = sld [smem:[#allocation13_spill]] }
 0x5a8   : > { %s9042_s11 = sld [smem:[#allocation15_spill]]  ;;  %s9043_s30 = smov %s7823_s10 }
 0x5ad   : > { %p21_p11 = scmp.ge.s32.totalorder %s9040_s12, 4   ;;  %s9044_s10 = smov %s9041_s18 }
 0x5af   :  { %23 = sbr.rel (!%p21_p11) target bundleno = 5 (0x5), region = 133 }
 0x5b6   :  { %4370 = vsyncpa [#allocation5], 1 }
 0x5b7   :  { %4372 = vsyncpa [#allocation5 + $0x1], 1 }
 0x5b8   :  { %4373 = vsyncpa [#allocation8], 1 }
 0x5b9   :  { %4374 = vsyncpa [#allocation6], 1 }
 0x5ba   :  { %4376 = vsyncpa [#allocation6 + $0x1], 1 }

</bundles_post_ra>
